<compile_context>
chip_gen: v6e
topology: v6e:2x2x1
jax: 0.10.0
libtpu: 0.0.40
codegen_flags: <defaults>
</compile_context>

<pallas_src>
import jax
import jax.numpy as jnp
from jax.experimental import pallas as pl
from jax.experimental.pallas import tpu as pltpu

_LANE = 128
_SMALL_N = 8192  # below this, pure-jnp fast path (launch overhead dominates)


def _logreg_kernel(w_ref, b_ref, x_ref, o_ref):
    # w_ref, b_ref: (1,) SMEM scalars
    # x_ref, o_ref: (tile_rows, 128) VMEM, lane-dense
    w = w_ref[0]
    b = b_ref[0]
    z = x_ref[...] * w + b
    # sigmoid(z) == 0.5*tanh(0.5*z)+0.5 : single EUP transcendental + VPU fma.
    o_ref[...] = (0.5 * jnp.tanh(0.5 * z) + 0.5).astype(o_ref.dtype)


def logistic_regression(x, weight, bias, *, tile_rows=2048):
    """sigmoid(x @ weight.T + bias) for nn.Linear(1, 1), computed on the VPU.

    x:      (..., 1) float32
    weight: (1, 1)   float32
    bias:   (1,)     float32
    returns (..., 1) float32
    """
    orig_shape = x.shape
    assert orig_shape[-1] == 1
    assert weight.shape == (1, 1) and bias.shape == (1,)
    # The (tr % 8) sublane rounding and SMEM scalar broadcast assume 32-bit data.
    assert x.dtype == jnp.float32, "kernel assumes float32 inputs"

    n = x.size  # in_features == 1, so total elements == batch size

    # Pure-jnp fast path for tiny inputs: XLA's fused elementwise path beats
    # kernel launch + lane-dense repack by orders of magnitude at these sizes.
    if n < _SMALL_N:
        return jax.nn.sigmoid(x * weight[0, 0] + bias[0])

    rows = pl.cdiv(n, _LANE)
    # Biggest tile that makes sense: 2048x128 f32 = 1 MiB per block, or a
    # single (rounded-to-8-sublane) block if the whole input is smaller.
    tr = min(tile_rows, max(8, ((rows + 7) // 8) * 8))
    grid = pl.cdiv(rows, tr)          # last block may be ragged; Pallas masks it
    total = rows * _LANE

    # Lane-dense repack. Pad only the sub-128 tail (no pad / no copy at all
    # when n is already a multiple of 128).
    if total == n:
        x2 = x.reshape(rows, _LANE)
    else:
        x2 = jnp.pad(x.reshape(-1), (0, total - n)).reshape(rows, _LANE)

    out2 = pl.pallas_call(
        _logreg_kernel,
        out_shape=jax.ShapeDtypeStruct((rows, _LANE), x.dtype),
        grid=(grid,),
        in_specs=[
            pl.BlockSpec(memory_space=pltpu.MemorySpace.SMEM),   # weight scalar
            pl.BlockSpec(memory_space=pltpu.MemorySpace.SMEM),   # bias scalar
            pl.BlockSpec((tr, _LANE), lambda i: (i, 0)),         # x tile
        ],
        out_specs=pl.BlockSpec((tr, _LANE), lambda i: (i, 0)),
        compiler_params=pltpu.CompilerParams(
            dimension_semantics=("parallel",)),
    )(weight.reshape(-1), bias.reshape(-1), x2)

    # Restore (..., 1). The slice only trims the <128-element tail (and is a
    # no-op reshape when n % 128 == 0).
    if total == n:
        return out2.reshape(orig_shape)
    return out2.reshape(-1)[:n].reshape(orig_shape)


if __name__ == "__main__":
    key = jax.random.PRNGKey(0)
    k_x, k_w, k_b, k_x2, k_x3 = jax.random.split(key, 5)

    # Module: nn.Linear(1, 1) -> in_features=1, out_features=1.
    # PyTorch default init: U(-1/sqrt(fan_in), 1/sqrt(fan_in)), fan_in = 1.
    weight = jax.random.uniform(k_w, (1, 1), minval=-1.0, maxval=1.0,
                                dtype=jnp.float32)
    bias = jax.random.uniform(k_b, (1,), minval=-1.0, maxval=1.0,
                              dtype=jnp.float32)

    # Small toy case (matches the original module's usage) -> jnp fast path.
    N = 8
    x = jax.random.normal(k_x, (N, 1), dtype=jnp.float32)
    y = jax.block_until_ready(logistic_regression(x, weight, bias))
    y_ref = jax.nn.sigmoid(x @ weight.T + bias)
    assert y.shape == (N, 1)
    assert jnp.allclose(y, y_ref, atol=2e-6, rtol=1e-6)

    # Larger case: exercises the kernel, a multi-step grid, the ragged last
    # row block, and the sub-128 tail pad/trim (300000 % 128 == 96).
    N2 = 300_000
    x2 = jax.random.normal(k_x2, (N2, 1), dtype=jnp.float32)
    y2 = jax.block_until_ready(logistic_regression(x2, weight, bias))
    y2_ref = jax.nn.sigmoid(x2 @ weight.T + bias)
    assert y2.shape == (N2, 1)
    assert jnp.allclose(y2, y2_ref, atol=2e-6, rtol=1e-6)

    # Exact-multiple case: zero-copy wrapper path (no pad, no output slice).
    N3 = 262_144  # 2048 * 128
    x3 = jax.random.normal(k_x3, (N3, 1), dtype=jnp.float32)
    y3 = jax.block_until_ready(logistic_regression(x3, weight, bias))
    y3_ref = jax.nn.sigmoid(x3 @ weight.T + bias)
    assert y3.shape == (N3, 1)
    assert jnp.allclose(y3, y3_ref, atol=2e-6, rtol=1e-6)

    print("KERNEL_OK")
</pallas_src>

<mosaic_0001>
module attributes {stable_mosaic.version = 11 : i64} {
  func.func @_logreg_kernel(%arg0: i32, %arg1: memref<1xf32, #tpu.memory_space<smem>>, %arg2: memref<1xf32, #tpu.memory_space<smem>>, %arg3: memref<2048x128xf32, #tpu.memory_space<vmem>>, %arg4: memref<2048x128xf32, #tpu.memory_space<vmem>>) attributes {dimension_semantics = [#tpu.dimension_semantics<parallel>], iteration_bounds = array<i64: 2>, scalar_prefetch = 0 : i64, scratch_operands = 0 : i64, tpu.core_type = #tpu.core_type<tc>, window_params = [{transform_indices = @transform_0, window_bounds = array<i64: 1>}, {transform_indices = @transform_1, window_bounds = array<i64: 1>}, {transform_indices = @transform_2, window_bounds = array<i64: 2048, 128>}, {transform_indices = @transform_3, window_bounds = array<i64: 2048, 128>}]} {
    %c0 = arith.constant 0 : index
    %0 = memref.load %arg1[%c0] : memref<1xf32, #tpu.memory_space<smem>>
    %c0_0 = arith.constant 0 : index
    %1 = memref.load %arg2[%c0_0] : memref<1xf32, #tpu.memory_space<smem>>
    %c0_1 = arith.constant 0 : index
    %c0_2 = arith.constant 0 : index
    %2 = vector.load %arg3[%c0_1, %c0_2] : memref<2048x128xf32, #tpu.memory_space<vmem>>, vector<2048x128xf32>
    %3 = vector.broadcast %0 : f32 to vector<2048x128xf32>
    %4 = arith.mulf %2, %3 : vector<2048x128xf32>
    %5 = vector.broadcast %1 : f32 to vector<2048x128xf32>
    %6 = arith.addf %4, %5 : vector<2048x128xf32>
    %cst = arith.constant 5.000000e-01 : f32
    %7 = vector.broadcast %cst : f32 to vector<2048x128xf32>
    %8 = arith.mulf %7, %6 : vector<2048x128xf32>
    %9 = math.tanh %8 : vector<2048x128xf32>
    %cst_3 = arith.constant 5.000000e-01 : f32
    %10 = vector.broadcast %cst_3 : f32 to vector<2048x128xf32>
    %11 = arith.mulf %10, %9 : vector<2048x128xf32>
    %cst_4 = arith.constant 5.000000e-01 : f32
    %12 = vector.broadcast %cst_4 : f32 to vector<2048x128xf32>
    %13 = arith.addf %11, %12 : vector<2048x128xf32>
    %c0_5 = arith.constant 0 : index
    %c0_6 = arith.constant 0 : index
    %14 = vector.load %arg4[%c0_5, %c0_6] : memref<2048x128xf32, #tpu.memory_space<vmem>>, vector<2048x128xf32>
    tpu.vector_store %arg4[%c0_5, %c0_6], %13 {strides = array<i32>} : memref<2048x128xf32, #tpu.memory_space<vmem>>, vector<2048x128xf32>,
    return
  }
  func.func @transform_0(%arg0: i32) -> i32 {
    %c0_i32 = arith.constant 0 : i32
    %c0_i32_0 = arith.constant 0 : i32
    return %c0_i32 : i32
  }
  func.func @transform_1(%arg0: i32) -> i32 {
    %c0_i32 = arith.constant 0 : i32
    %c0_i32_0 = arith.constant 0 : i32
    return %c0_i32 : i32
  }
  func.func @transform_2(%arg0: i32) -> (i32, i32) {
    %c0_i32 = arith.constant 0 : i32
    %c0_i32_0 = arith.constant 0 : i32
    return %arg0, %c0_i32 : i32, i32
  }
  func.func @transform_3(%arg0: i32) -> (i32, i32) {
    %c0_i32 = arith.constant 0 : i32
    %c0_i32_0 = arith.constant 0 : i32
    return %arg0, %c0_i32 : i32, i32
  }
}

</mosaic_0001>

<bundles_post_ra>
// kernel: tpu_custom_call.1
= control target key start
LH: loop header
LB: loop body
LE: loop exit
PB: predicated region body
PF: predicated region fallthrough
CT: control target
= control target key end

     0   :  { %s4260_s0 = inlined_call_operand.<no memory space> [shape: f32[1], index: 0, kind: input, shape index: {}]   ;;  %s4261_s1 = inlined_call_operand.<no memory space> [shape: f32[1], index: 1, kind: input, shape index: {}]   ;;  %s4262_s2 = inlined_call_operand.hbm [shape: f32[2344,128], index: 2, kind: input, shape index: {}]   ;;  %s4263_s3 = inlined_call_operand.hbm [shape: f32[2344,128], index: 3, kind: output, shape index: {}]  }
   0x1   :  { %8 = sst [smem:[#allocation2]] %s4260_s0 }
   0x2   :  { %9 = sst [smem:[#allocation3]] %s4261_s1 }
   0x3   :  { %10 = vsyncpa [#allocation5], 0 }
   0x4   :  { %12 = vsyncpa [#allocation5 + $0x1], 0 }
   0x5   :  { %13 = vsyncpa [#allocation6], 0 }
   0x6   :  { %15 = vsyncpa [#allocation6 + $0x1], 0  ;;  %s3055_s16 = smov 0   ;;  %s3057_s17 = smov 0  }
   0x7   :  { %s3059_s18 = smov 0   ;;  %s3061_s19 = smov 0  }
   0x8 LB: > { %s3076_s0 = sadd.s32 4294967295, %s3021_s19   ;;  %s2352_s1 = sadd.s32 4294967294, %s3021_s19   ;;  %s3021_s19 = sphi %s3061_s19, %s4273_s19   ;;  %s3017_s18 = sphi %s3059_s18, %s4272_s18   ;;  %s3013_s17 = sphi %s3057_s17, %s4271_s17   ;;  %s3009_s16 = sphi %s3055_s16, %s4270_s16  }
   0x9   : > { %s3080_s20 = sadd.s32 1, %s3021_s19   ;;  %s70_s21 = sadd.s32 1, %s3017_s18 }
   0xa   : > { %s67_s22 = ssub.s32 %s3021_s19, %s3080_s20  ;;  %p77_p0 = scmp.ne.s32.totalorder %s3017_s18, %s3013_s17 }
   0xb   : > { %p68_p1 = scmp.eq.s32.totalorder %s67_s22, 0  ;;  %p78_p2 = scmp.eq.s32.totalorder %s3021_s19, 0 }
   0xc   : > { %p83_p3 = scmp.ne.s32.totalorder %s3013_s17, %s3009_s16  ;;  %p84_p4 = scmp.eq.s32.totalorder %s3076_s0, 0 }
   0xd   : > { %s3092_s23 = scalar_select %p68_p1, %s3017_s18, %s70_s21  }
   0xe   : > { %p79_p5 = por %p78_p2, %p77_p0  ;;  %p3094_p6 = por %p84_p4, %p83_p3 }
   0xf   : > { %p107_p7 = scmp.eq.s32.totalorder %s3076_s0, 1  ;;  %p113_p8 = scmp.eq.s32.totalorder %s2352_s1, 1 }
  0x10   : > { %p4264_p11 = scmp.ge.s32.totalorder %s3021_s19, 2 }
  0x11   : > { %p3099_p9 = por %p107_p7, %p77_p0  ;;  %p3103_p10 = por %p113_p8, %p83_p3 }
  0x12   : > { %135 = sbr.rel (%p4264_p11) target bundleno = 55 (0x37), region = 24 }
  0x13   : > { %s4267_s26 = scalar_select %p3103_p10, 1, 0 }
  0x17   : > { %138 = sbr.rel (!%p79_p5) target bundleno = 55 (0x37), region = 28  ;;  %s139_s27 = sand.u32 (%p79_p5), 1, %s3017_s18  }
  0x18   : > { %s2356_s28 = sshll.u32 (%p79_p5), %s3021_s19, 8  ;;  %s2355_s29 = sshll.u32 (%p79_p5), %s139_s27, 11 }
  0x19   : > { %s145_s30 = ssub.s32 (%p79_p5), 293, %s2356_s28  ;;  %s3115_s6 = scalar_lea.sflag (%p79_p5), [#allocation5], %s139_s27 }
  0x1a   : > { %p146_p12 = scmp.lt.s32.totalorder (%p79_p5), %s145_s30, 256  ;;  %s143_s7 = scalar_lea.vmem (%p79_p5), [#allocation4], %s2355_s29 }
  0x1c   : > { %s4275_s30 = smov (!%p146_p12, %s145_s30), 256 }
  0x1d   : > { %s3112_s4 = sshll.u32 %s4275_s30, 7 }
  0x1e   : > { %s150_s5 = ssub.s32 32768, %s3112_s4 }
  0x1f   : > { %151 = vsyncadd %s3115_s6, %s150_s5  ;;  %p2358_p13 = scmp.ne.s32.totalorder %s3112_s4, 0  ;;  %s2374_s8 = sshll.u32 %s3021_s19, 15 }
  0x20   : > { %s3123_s11 = scalar_lea.hbm %s4262_s2, %s2374_s8  ;;  %s156_s12 = sshll.u32 %s143_s7, 4  ;;  %s3125_s12 = int_to_ptr.vmem [resolvable:$true] %s156_s12 }
  0x21   : > { %s2931_s13 = scalar_lea.hbm %s3123_s11, %s3112_s4  ;;  %s2935_s1 = scalar_lea.hbm %s4262_s2, 37504 }
  0x22   : > { %p2932_p0 = scmp.ne.s32.totalorder %s3123_s11, %s2931_s13  ;;  %p2936_p3 = scmp.lt.s32.totalorder %s3123_s11, %s4262_s2 }
  0x23   : > { %p2937_p4 = scmp.lt.s32.totalorder %s2935_s1, %s2931_s13 }
  0x24   : > { %p2933_p1 = pnand %p2932_p0, %p2358_p13 }
  0x25   : > { %p2938_p5 = por %p2937_p4, %p2936_p3 }
  0x26   : > { %p2934_p2 = pneg %p2933_p1 }
  0x28   : > { %p2939_p7 = pnand %p2938_p5, %p2934_p2 }
  0x2a   : > { %2942 = shalt.err (!%p2939_p7)
}
  0x2b   : > { %s2943_s27 = scalar_lea.vmem %s3125_s12, %s3112_s4  ;;  %s3023_s28 = smov [#allocation4]  }
  0x2c   : > { %p2944_p8 = scmp.ne.s32.totalorder %s3125_s12, %s2943_s27  ;;  %s2947_s29 = sshll.u32 %s3023_s28, 4  ;;  %s2948_s29 = int_to_ptr.vmem [resolvable:$false] %s2947_s29 }
  0x2d   : > { %s2949_s30 = scalar_lea.vmem %s2948_s29, 65536  ;;  %p2950_p1 = scmp.lt.s32.totalorder %s3125_s12, %s2948_s29 }
  0x2e   : > { %p2945_p12 = pnand %p2944_p8, %p2358_p13  ;;  %p2951_p11 = scmp.lt.s32.totalorder %s2949_s30, %s2943_s27 }
  0x30   : > { %p2946_p0 = pneg %p2945_p12  ;;  %p2952_p10 = por %p2951_p11, %p2950_p1 }
  0x32   : > { %p2953_p3 = pnand %p2952_p10, %p2946_p0 }
  0x34   : > { %2956 = shalt.err (!%p2953_p3)
}
  0x35   : > { %s3024_s5 = smov 128   ;;  %s3025_s7 = smov 8  }
  0x36   : > { %162 = dma.hbm_to_vmem [thread:$0]  (%p2358_p13), %s3123_s11, %s3112_s4, %s3125_s12, %s3115_s6, %s3024_s5, %s3024_s5, %s3025_s7  }
  0x37 PF: > { %p2362_p2 = scmp.ge.s32.totalorder %s3021_s19, 1  ;;  %p164_p4 = scmp.lt.s32.totalorder %s3021_s19, 3 }
  0x39   : > { %p165_p5 = pnand %p2362_p2, %p164_p4 }
  0x3a   : > { %s3154_s8 = sand.u32 (!%p165_p5), 1, %s3013_s17  }
  0x3b   : > { %168 = sbr.rel (%p165_p5) target bundleno = 498 (0x1f2), region = 32  ;;  %s2363_s9 = sshll.u32 (!%p165_p5), %s3154_s8, 11 }
  0x3c   : > { %s171_s10 = scalar_lea.sflag (!%p165_p5), [#allocation5], %s3154_s8  ;;  %s3160_s13 = scalar_lea.vmem (!%p165_p5), [#allocation4], %s2363_s9 }
  0x40   : > { %3000 = dma.done.wait (%p3094_p6), %s171_s10, 32768  }
  0x41   : > { %3002 = vsyncadd (%p3094_p6), %s171_s10, 4294934528  ;;  %s207_s4 = sld [smem:[#allocation2]]  ;;  %v209_v0 = vld [vmem:[%s3160_s13] sm:$0xff]  ;;  %v210_v2 = vld [vmem:[%s3160_s13 + $0x8] sm:$0xff]  ;;  %s3245_s24 = scalar_lea.vmem [#allocation7], %s2363_s9 }
  0x42   : > { %s208_s6 = sld [smem:[#allocation3]]  ;;  %v211_v3 = vld [vmem:[%s3160_s13 + $0x10] sm:$0xff]  ;;  %v212_v8 = vld [vmem:[%s3160_s13 + $0x18] sm:$0xff]  ;;  %v213_v9 = vld [vmem:[%s3160_s13 + $0x20] sm:$0xff]  ;;  %s2260_s11 = scalar_lea.sflag [#allocation6], %s3154_s8 }
  0x43   : > { %v214_v10 = vld [vmem:[%s3160_s13 + $0x28] sm:$0xff]  ;;  %v215_v14 = vld [vmem:[%s3160_s13 + $0x30] sm:$0xff]  ;;  %v216_v15 = vld [vmem:[%s3160_s13 + $0x38] sm:$0xff]  ;;  %s2366_s12 = sshll.u32 (%p3099_p9), %s3076_s0, 8 }
  0x44   : > { %v217_v24 = vld [vmem:[%s3160_s13 + $0x40] sm:$0xff]  ;;  %v218_v25 = vld [vmem:[%s3160_s13 + $0x48] sm:$0xff]  ;;  %v219_v30 = vld [vmem:[%s3160_s13 + $0x50] sm:$0xff]  ;;  %s2268_s14 = ssub.s32 (%p3099_p9), 293, %s2366_s12 }
  0x45   : > { %v220_v31 = vld [vmem:[%s3160_s13 + $0x58] sm:$0xff]  ;;  %v221_v36 = vld [vmem:[%s3160_s13 + $0x60] sm:$0xff]  ;;  %v222_v40 = vld [vmem:[%s3160_s13 + $0x68] sm:$0xff]  ;;  %p2269_p6 = scmp.lt.s32.totalorder (%p3099_p9), %s2268_s14, 256 }
  0x46   : > { %v223_v50 = vld [vmem:[%s3160_s13 + $0x70] sm:$0xff]  ;;  %v224_v51 = vld [vmem:[%s3160_s13 + $0x78] sm:$0xff]  ;;  %v225_v55 = vld [vmem:[%s3160_s13 + $0x80] sm:$0xff] }
  0x47   : > { %v3167_v1 = vstv %s207_s4  ;;  %v226_v56 = vld [vmem:[%s3160_s13 + $0x88] sm:$0xff]  ;;  %v227_v60 = vld [vmem:[%s3160_s13 + $0x90] sm:$0xff] }
  0x48   : > { %v466_v4 = vmul.f32 %v3167_v1, %v209_v0  ;;  %v3172_v5 = vstv %s208_s6  ;;  %v467_v6 = vmul.f32 %v3167_v1, %v210_v2  ;;  %v468_v7 = vmul.f32 %v3167_v1, %v211_v3  ;;  %v228_v0 = vld [vmem:[%s3160_s13 + $0x98] sm:$0xff] }
  0x49   : > { %v469_v11 = vmul.f32 %v3167_v1, %v212_v8  ;;  %v470_v12 = vmul.f32 %v3167_v1, %v213_v9  ;;  %v471_v13 = vmul.f32 %v3167_v1, %v214_v10  ;;  %v472_v19 = vmul.f32 %v3167_v1, %v215_v14 }
  0x4a   : > { %v723_v16 = vadd.f32 %v3172_v5, %v466_v4  ;;  %v724_v17 = vadd.f32 %v3172_v5, %v467_v6  ;;  %v725_v18 = vadd.f32 %v3172_v5, %v468_v7  ;;  %v473_v23 = vmul.f32 %v3167_v1, %v216_v15 }
  0x4b   : > { %v726_v20 = vadd.f32 %v3172_v5, %v469_v11  ;;  %v727_v21 = vadd.f32 %v3172_v5, %v470_v12  ;;  %v728_v22 = vadd.f32 %v3172_v5, %v471_v13  ;;  %v729_v29 = vadd.f32 %v3172_v5, %v472_v19  ;;  %v229_v12 = vld [vmem:[%s3160_s13 + $0xa0] sm:$0xff]  ;;  %v230_v13 = vld [vmem:[%s3160_s13 + $0xa8] sm:$0xff] }
  0x4c   : > { %v979_v26 = vmul.f32 0.5, %v723_v16  ;;  %v980_v27 = vmul.f32 0.5, %v724_v17  ;;  %v981_v28 = vmul.f32 0.5, %v725_v18  ;;  %v730_v35 = vadd.f32 %v3172_v5, %v473_v23  ;;  %v231_v17 = vld [vmem:[%s3160_s13 + $0xb0] sm:$0xff]  ;;  %v232_v18 = vld [vmem:[%s3160_s13 + $0xb8] sm:$0xff] }
  0x4d   : > { %v982_v32 = vmul.f32 0.5, %v726_v20  ;;  %v983_v33 = vmul.f32 0.5, %v727_v21  ;;  %v984_v34 = vmul.f32 0.5, %v728_v22  ;;  %v985_v37 = vmul.f32 0.5, %v729_v29 }
  0x4e   : > { %2419 = vtanh.f32 %v979_v26  ;;  %v474_v38 = vmul.f32 %v3167_v1, %v217_v24  ;;  %v475_v39 = vmul.f32 %v3167_v1, %v218_v25  ;;  %v986_v41 = vmul.f32 0.5, %v730_v35 }
  0x4f   : > { %2421 = vtanh.f32 %v980_v27  ;;  %v476_v42 = vmul.f32 %v3167_v1, %v219_v30  ;;  %v477_v43 = vmul.f32 %v3167_v1, %v220_v31  ;;  %v478_v46 = vmul.f32 %v3167_v1, %v221_v36 }
  0x50   : > { %2423 = vtanh.f32 %v981_v28  ;;  %v731_v44 = vadd.f32 %v3172_v5, %v474_v38  ;;  %v732_v45 = vadd.f32 %v3172_v5, %v475_v39  ;;  %v479_v49 = vmul.f32 %v3167_v1, %v222_v40 }
  0x51   : > { %2425 = vtanh.f32 %v982_v32  ;;  %v733_v47 = vadd.f32 %v3172_v5, %v476_v42  ;;  %v734_v48 = vadd.f32 %v3172_v5, %v477_v43  ;;  %v735_v54 = vadd.f32 %v3172_v5, %v478_v46 }
  0x52   : > { %2427 = vtanh.f32 %v983_v33  ;;  %v987_v52 = vmul.f32 0.5, %v731_v44  ;;  %v988_v53 = vmul.f32 0.5, %v732_v45  ;;  %v736_v59 = vadd.f32 %v3172_v5, %v479_v49  ;;  %v233_v45 = vld [vmem:[%s3160_s13 + $0xc0] sm:$0xff] }
  0x53   : > { %2429 = vtanh.f32 %v984_v34  ;;  %v989_v57 = vmul.f32 0.5, %v733_v47  ;;  %v990_v58 = vmul.f32 0.5, %v734_v48  ;;  %v991_v61 = vmul.f32 0.5, %v735_v54 }
  0x54   : > { %2431 = vtanh.f32 %v985_v37  ;;  %v480_v62 = vmul.f32 %v3167_v1, %v223_v50  ;;  %v481_v63 = vmul.f32 %v3167_v1, %v224_v51  ;;  %v992_v2 = vmul.f32 0.5, %v736_v59  ;;  %v234_v50 = vld [vmem:[%s3160_s13 + $0xc8] sm:$0xff] }
  0x55   : > { %2433 = vtanh.f32 %v986_v41  ;;  %v482_v3 = vmul.f32 %v3167_v1, %v225_v55  ;;  %v483_v4 = vmul.f32 %v3167_v1, %v226_v56  ;;  %v484_v8 = vmul.f32 %v3167_v1, %v227_v60 }
  0x56   : > { %2435 = vtanh.f32 %v987_v52  ;;  %v737_v6 = vadd.f32 %v3172_v5, %v480_v62  ;;  %v738_v7 = vadd.f32 %v3172_v5, %v481_v63  ;;  %v485_v11 = vmul.f32 %v3167_v1, %v228_v0  ;;  %v235_v63 = vld [vmem:[%s3160_s13 + $0xd0] sm:$0xff] }
  0x57   : > { %2437 = vtanh.f32 %v988_v53  ;;  %v739_v9 = vadd.f32 %v3172_v5, %v482_v3  ;;  %v740_v10 = vadd.f32 %v3172_v5, %v483_v4  ;;  %v741_v16 = vadd.f32 %v3172_v5, %v484_v8 }
  0x58   : > { %2439 = vtanh.f32 %v989_v57  ;;  %v993_v14 = vmul.f32 0.5, %v737_v6  ;;  %v994_v15 = vmul.f32 0.5, %v738_v7  ;;  %v742_v21 = vadd.f32 %v3172_v5, %v485_v11  ;;  %v236_v6 = vld [vmem:[%s3160_s13 + $0xd8] sm:$0xff] }
  0x59   : > { %2441 = vtanh.f32 %v990_v58  ;;  %v995_v19 = vmul.f32 0.5, %v739_v9  ;;  %v996_v20 = vmul.f32 0.5, %v740_v10  ;;  %v997_v22 = vmul.f32 0.5, %v741_v16 }
  0x5a   : > { %2443 = vtanh.f32 %v991_v61  ;;  %v486_v23 = vmul.f32 %v3167_v1, %v229_v12  ;;  %v487_v24 = vmul.f32 %v3167_v1, %v230_v13  ;;  %v998_v26 = vmul.f32 0.5, %v742_v21  ;;  %v237_v21 = vld [vmem:[%s3160_s13 + $0xe0] sm:$0xff] }
  0x5b   : > { %v2420_v25 = vpop.eup %2419  ;;  %2445 = vtanh.f32 %v992_v2  ;;  %v488_v27 = vmul.f32 %v3167_v1, %v231_v17  ;;  %v489_v28 = vmul.f32 %v3167_v1, %v232_v18  ;;  %v490_v58 = vmul.f32 %v3167_v1, %v233_v45 }
  0x5c   : > { %v2422_v29 = vpop.eup %2421  ;;  %v1491_v30 = vmul.f32 0.5, %v2420_v25  ;;  %2447 = vtanh.f32 %v993_v14  ;;  %v743_v31 = vadd.f32 %v3172_v5, %v486_v23  ;;  %v744_v32 = vadd.f32 %v3172_v5, %v487_v24 }
  0x5d   : > { %v2424_v33 = vpop.eup %2423  ;;  %v1492_v34 = vmul.f32 0.5, %v2422_v29  ;;  %2449 = vtanh.f32 %v994_v15  ;;  %v745_v35 = vadd.f32 %v3172_v5, %v488_v27  ;;  %v746_v36 = vadd.f32 %v3172_v5, %v489_v28 }
  0x5e   : > { %v2426_v37 = vpop.eup %2425  ;;  %v1747_v38 = vadd.f32 0.5, %v1491_v30  ;;  %v1493_v39 = vmul.f32 0.5, %v2424_v33  ;;  %2451 = vtanh.f32 %v995_v19  ;;  %v999_v40 = vmul.f32 0.5, %v743_v31 }
  0x5f   : > { %v2428_v41 = vpop.eup %2427  ;;  %v1748_v42 = vadd.f32 0.5, %v1492_v34  ;;  %v1494_v43 = vmul.f32 0.5, %v2426_v37  ;;  %2453 = vtanh.f32 %v996_v20  ;;  %v1000_v44 = vmul.f32 0.5, %v744_v32 }
  0x60   : > { %v2430_v46 = vpop.eup %2429  ;;  %2003 = vst [vmem:[%s3245_s24] sm:$0xff] %v1747_v38  ;;  %v1749_v47 = vadd.f32 0.5, %v1493_v39  ;;  %v1495_v48 = vmul.f32 0.5, %v2428_v41  ;;  %2455 = vtanh.f32 %v997_v22  ;;  %v1001_v49 = vmul.f32 0.5, %v745_v35  ;;  %v239_v41 = vld [vmem:[%s3160_s13 + $0xf0] sm:$0xff] }
  0x61   : > { %v2432_v51 = vpop.eup %2431  ;;  %2004 = vst [vmem:[%s3245_s24 + $0x8] sm:$0xff] %v1748_v42  ;;  %v1750_v52 = vadd.f32 0.5, %v1494_v43  ;;  %v1496_v53 = vmul.f32 0.5, %v2430_v46  ;;  %2457 = vtanh.f32 %v998_v26  ;;  %v1002_v54 = vmul.f32 0.5, %v746_v36  ;;  %v238_v26 = vld [vmem:[%s3160_s13 + $0xe8] sm:$0xff]  ;;  %v240_v46 = vld [vmem:[%s3160_s13 + $0xf8] sm:$0xff] }
  0x62   : > { %v2434_v55 = vpop.eup %2433  ;;  %2005 = vst [vmem:[%s3245_s24 + $0x10] sm:$0xff] %v1749_v47  ;;  %v1751_v56 = vadd.f32 0.5, %v1495_v48  ;;  %v1497_v57 = vmul.f32 0.5, %v2432_v51  ;;  %2459 = vtanh.f32 %v999_v40  ;;  %v491_v62 = vmul.f32 %v3167_v1, %v234_v50 }
  0x63   : > { %v2436_v59 = vpop.eup %2435  ;;  %2006 = vst [vmem:[%s3245_s24 + $0x18] sm:$0xff] %v1750_v52  ;;  %v1752_v60 = vadd.f32 0.5, %v1496_v53  ;;  %v1498_v61 = vmul.f32 0.5, %v2434_v55  ;;  %2461 = vtanh.f32 %v1000_v44  ;;  %v747_v4 = vadd.f32 %v3172_v5, %v490_v58 }
  0x64   : > { %v2438_v0 = vpop.eup %2437  ;;  %2007 = vst [vmem:[%s3245_s24 + $0x20] sm:$0xff] %v1751_v56  ;;  %v1753_v2 = vadd.f32 0.5, %v1497_v57  ;;  %v1499_v3 = vmul.f32 0.5, %v2436_v59  ;;  %2463 = vtanh.f32 %v1001_v49  ;;  %v748_v10 = vadd.f32 %v3172_v5, %v491_v62 }
  0x65   : > { %v2440_v7 = vpop.eup %2439  ;;  %2008 = vst [vmem:[%s3245_s24 + $0x28] sm:$0xff] %v1752_v60  ;;  %v1754_v8 = vadd.f32 0.5, %v1498_v61  ;;  %v1500_v9 = vmul.f32 0.5, %v2438_v0  ;;  %2465 = vtanh.f32 %v1002_v54  ;;  %v1003_v14 = vmul.f32 0.5, %v747_v4  ;;  %v241_v61 = vld [vmem:[%s3160_s13 + $0x100] sm:$0xff] }
  0x66   : > { %v2442_v11 = vpop.eup %2441  ;;  %2009 = vst [vmem:[%s3245_s24 + $0x30] sm:$0xff] %v1753_v2  ;;  %v1755_v12 = vadd.f32 0.5, %v1499_v3  ;;  %v1501_v13 = vmul.f32 0.5, %v2440_v7  ;;  %v492_v15 = vmul.f32 %v3167_v1, %v235_v63  ;;  %v1004_v19 = vmul.f32 0.5, %v748_v10  ;;  %v242_v3 = vld [vmem:[%s3160_s13 + $0x108] sm:$0xff] }
  0x67   : > { %v2444_v16 = vpop.eup %2443  ;;  %2010 = vst [vmem:[%s3245_s24 + $0x38] sm:$0xff] %v1754_v8  ;;  %v1756_v17 = vadd.f32 0.5, %v1500_v9  ;;  %v1502_v18 = vmul.f32 0.5, %v2442_v11  ;;  %v493_v20 = vmul.f32 %v3167_v1, %v236_v6  ;;  %2467 = vtanh.f32 %v1003_v14  ;;  %v243_v9 = vld [vmem:[%s3160_s13 + $0x110] sm:$0xff] }
  0x68   : > { %v2446_v22 = vpop.eup %2445  ;;  %2011 = vst [vmem:[%s3245_s24 + $0x40] sm:$0xff] %v1755_v12  ;;  %v1757_v23 = vadd.f32 0.5, %v1501_v13  ;;  %v1503_v24 = vmul.f32 0.5, %v2444_v16  ;;  %v749_v25 = vadd.f32 %v3172_v5, %v492_v15  ;;  %2469 = vtanh.f32 %v1004_v19  ;;  %v244_v15 = vld [vmem:[%s3160_s13 + $0x118] sm:$0xff] }
  0x69   : > { %v2448_v27 = vpop.eup %2447  ;;  %2012 = vst [vmem:[%s3245_s24 + $0x48] sm:$0xff] %v1756_v17  ;;  %v1758_v28 = vadd.f32 0.5, %v1502_v18  ;;  %v1504_v29 = vmul.f32 0.5, %v2446_v22  ;;  %v750_v30 = vadd.f32 %v3172_v5, %v493_v20  ;;  %v494_v35 = vmul.f32 %v3167_v1, %v237_v21  ;;  %v245_v20 = vld [vmem:[%s3160_s13 + $0x120] sm:$0xff] }
  0x6a   : > { %v2450_v31 = vpop.eup %2449  ;;  %2013 = vst [vmem:[%s3245_s24 + $0x50] sm:$0xff] %v1757_v23  ;;  %v1759_v32 = vadd.f32 0.5, %v1503_v24  ;;  %v1505_v33 = vmul.f32 0.5, %v2448_v27  ;;  %v1005_v34 = vmul.f32 0.5, %v749_v25  ;;  %v495_v40 = vmul.f32 %v3167_v1, %v238_v26  ;;  %v246_v24 = vld [vmem:[%s3160_s13 + $0x128] sm:$0xff] }
  0x6b   : > { %v2452_v36 = vpop.eup %2451  ;;  %2014 = vst [vmem:[%s3245_s24 + $0x58] sm:$0xff] %v1758_v28  ;;  %v1760_v37 = vadd.f32 0.5, %v1504_v29  ;;  %v1506_v38 = vmul.f32 0.5, %v2450_v31  ;;  %v1006_v39 = vmul.f32 0.5, %v750_v30  ;;  %v751_v45 = vadd.f32 %v3172_v5, %v494_v35 }
  0x6c   : > { %v2454_v42 = vpop.eup %2453  ;;  %2015 = vst [vmem:[%s3245_s24 + $0x60] sm:$0xff] %v1759_v32  ;;  %v1761_v43 = vadd.f32 0.5, %v1505_v33  ;;  %v1507_v44 = vmul.f32 0.5, %v2452_v36  ;;  %2471 = vtanh.f32 %v1005_v34  ;;  %v752_v50 = vadd.f32 %v3172_v5, %v495_v40 }
  0x6d   : > { %v2456_v47 = vpop.eup %2455  ;;  %2016 = vst [vmem:[%s3245_s24 + $0x68] sm:$0xff] %v1760_v37  ;;  %v1762_v48 = vadd.f32 0.5, %v1506_v38  ;;  %v1508_v49 = vmul.f32 0.5, %v2454_v42  ;;  %2473 = vtanh.f32 %v1006_v39  ;;  %v1007_v54 = vmul.f32 0.5, %v751_v45  ;;  %v247_v38 = vld [vmem:[%s3160_s13 + $0x130] sm:$0xff]  ;;  %v248_v42 = vld [vmem:[%s3160_s13 + $0x138] sm:$0xff] }
  0x6e   : > { %v2458_v51 = vpop.eup %2457  ;;  %2017 = vst [vmem:[%s3245_s24 + $0x70] sm:$0xff] %v1761_v43  ;;  %v1763_v52 = vadd.f32 0.5, %v1507_v44  ;;  %v1509_v53 = vmul.f32 0.5, %v2456_v47  ;;  %v496_v55 = vmul.f32 %v3167_v1, %v239_v41  ;;  %v1008_v59 = vmul.f32 0.5, %v752_v50  ;;  %v249_v47 = vld [vmem:[%s3160_s13 + $0x140] sm:$0xff] }
  0x6f   : > { %v2460_v56 = vpop.eup %2459  ;;  %2018 = vst [vmem:[%s3245_s24 + $0x78] sm:$0xff] %v1762_v48  ;;  %v1764_v57 = vadd.f32 0.5, %v1508_v49  ;;  %v1510_v58 = vmul.f32 0.5, %v2458_v51  ;;  %v497_v60 = vmul.f32 %v3167_v1, %v240_v46  ;;  %2475 = vtanh.f32 %v1007_v54 }
  0x70   : > { %v2462_v62 = vpop.eup %2461  ;;  %2019 = vst [vmem:[%s3245_s24 + $0x80] sm:$0xff] %v1763_v52  ;;  %v1765_v63 = vadd.f32 0.5, %v1509_v53  ;;  %v1511_v0 = vmul.f32 0.5, %v2460_v56  ;;  %v753_v2 = vadd.f32 %v3172_v5, %v496_v55  ;;  %2477 = vtanh.f32 %v1008_v59  ;;  %v250_v52 = vld [vmem:[%s3160_s13 + $0x148] sm:$0xff]  ;;  %v251_v56 = vld [vmem:[%s3160_s13 + $0x150] sm:$0xff] }
  0x71   : > { %v2464_v4 = vpop.eup %2463  ;;  %2020 = vst [vmem:[%s3245_s24 + $0x88] sm:$0xff] %v1764_v57  ;;  %v1766_v6 = vadd.f32 0.5, %v1510_v58  ;;  %v1512_v7 = vmul.f32 0.5, %v2462_v62  ;;  %v754_v8 = vadd.f32 %v3172_v5, %v497_v60  ;;  %v498_v14 = vmul.f32 %v3167_v1, %v241_v61  ;;  %v252_v60 = vld [vmem:[%s3160_s13 + $0x158] sm:$0xff] }
  0x72   : > { %v2466_v10 = vpop.eup %2465  ;;  %2021 = vst [vmem:[%s3245_s24 + $0x90] sm:$0xff] %v1765_v63  ;;  %v1767_v11 = vadd.f32 0.5, %v1511_v0  ;;  %v1513_v12 = vmul.f32 0.5, %v2464_v4  ;;  %v1009_v13 = vmul.f32 0.5, %v753_v2  ;;  %v499_v19 = vmul.f32 %v3167_v1, %v242_v3 }
  0x73   : > { %2022 = vst [vmem:[%s3245_s24 + $0x98] sm:$0xff] %v1766_v6  ;;  %v1768_v16 = vadd.f32 0.5, %v1512_v7  ;;  %v1514_v17 = vmul.f32 0.5, %v2466_v10  ;;  %v1010_v18 = vmul.f32 0.5, %v754_v8  ;;  %v755_v22 = vadd.f32 %v3172_v5, %v498_v14 }
  0x74   : > { %2023 = vst [vmem:[%s3245_s24 + $0xa0] sm:$0xff] %v1767_v11  ;;  %v1769_v21 = vadd.f32 0.5, %v1513_v12  ;;  %2479 = vtanh.f32 %v1009_v13  ;;  %v500_v23 = vmul.f32 %v3167_v1, %v243_v9  ;;  %v2468_v25 = vpop.eup %2467  ;;  %v756_v27 = vadd.f32 %v3172_v5, %v499_v19  ;;  %v253_v12 = vld [vmem:[%s3160_s13 + $0x160] sm:$0xff] }
  0x75   : > { %2024 = vst [vmem:[%s3245_s24 + $0xa8] sm:$0xff] %v1768_v16  ;;  %v1770_v26 = vadd.f32 0.5, %v1514_v17  ;;  %2481 = vtanh.f32 %v1010_v18  ;;  %v501_v28 = vmul.f32 %v3167_v1, %v244_v15  ;;  %v2470_v29 = vpop.eup %2469  ;;  %v1515_v30 = vmul.f32 0.5, %v2468_v25  ;;  %v254_v16 = vld [vmem:[%s3160_s13 + $0x168] sm:$0xff] }
  0x76   : > { %2025 = vst [vmem:[%s3245_s24 + $0xb0] sm:$0xff] %v1769_v21  ;;  %v1011_v31 = vmul.f32 0.5, %v755_v22  ;;  %v757_v32 = vadd.f32 %v3172_v5, %v500_v23  ;;  %v502_v33 = vmul.f32 %v3167_v1, %v245_v20  ;;  %v1516_v34 = vmul.f32 0.5, %v2470_v29  ;;  %v255_v21 = vld [vmem:[%s3160_s13 + $0x170] sm:$0xff] }
  0x77   : > { %2026 = vst [vmem:[%s3245_s24 + $0xb8] sm:$0xff] %v1770_v26  ;;  %v1012_v35 = vmul.f32 0.5, %v756_v27  ;;  %v758_v36 = vadd.f32 %v3172_v5, %v501_v28  ;;  %v503_v37 = vmul.f32 %v3167_v1, %v246_v24  ;;  %v1771_v39 = vadd.f32 0.5, %v1515_v30  ;;  %v256_v26 = vld [vmem:[%s3160_s13 + $0x178] sm:$0xff]  ;;  %v257_v30 = vld [vmem:[%s3160_s13 + $0x180] sm:$0xff] }
  0x78   : > { %2483 = vtanh.f32 %v1011_v31  ;;  %v1013_v40 = vmul.f32 0.5, %v757_v32  ;;  %v759_v41 = vadd.f32 %v3172_v5, %v502_v33  ;;  %v1772_v44 = vadd.f32 0.5, %v1516_v34  ;;  %v258_v34 = vld [vmem:[%s3160_s13 + $0x188] sm:$0xff] }
  0x79   : > { %v2472_v43 = vpop.eup %2471  ;;  %2485 = vtanh.f32 %v1012_v35  ;;  %v1014_v45 = vmul.f32 0.5, %v758_v36  ;;  %v760_v46 = vadd.f32 %v3172_v5, %v503_v37  ;;  %2027 = vst [vmem:[%s3245_s24 + $0xc0] sm:$0xff] %v1771_v39  ;;  %v504_v51 = vmul.f32 %v3167_v1, %v247_v38 }
  0x7a   : > { %v2474_v48 = vpop.eup %2473  ;;  %v1517_v49 = vmul.f32 0.5, %v2472_v43  ;;  %2487 = vtanh.f32 %v1013_v40  ;;  %v1015_v50 = vmul.f32 0.5, %v759_v41  ;;  %2028 = vst [vmem:[%s3245_s24 + $0xc8] sm:$0xff] %v1772_v44  ;;  %v505_v55 = vmul.f32 %v3167_v1, %v248_v42 }
  0x7b   : > { %v1518_v53 = vmul.f32 0.5, %v2474_v48  ;;  %2489 = vtanh.f32 %v1014_v45  ;;  %v1016_v54 = vmul.f32 0.5, %v760_v46  ;;  %v761_v58 = vadd.f32 %v3172_v5, %v504_v51 }
  0x7c   : > { %v1773_v57 = vadd.f32 0.5, %v1517_v49  ;;  %2491 = vtanh.f32 %v1015_v50  ;;  %v506_v59 = vmul.f32 %v3167_v1, %v249_v47  ;;  %v2476_v61 = vpop.eup %2475  ;;  %v762_v63 = vadd.f32 %v3172_v5, %v505_v55 }
  0x7d   : > { %v1774_v62 = vadd.f32 0.5, %v1518_v53  ;;  %2493 = vtanh.f32 %v1016_v54  ;;  %v507_v0 = vmul.f32 %v3167_v1, %v250_v52  ;;  %v2478_v2 = vpop.eup %2477  ;;  %v1519_v3 = vmul.f32 0.5, %v2476_v61 }
  0x7e   : > { %2029 = vst [vmem:[%s3245_s24 + $0xd0] sm:$0xff] %v1773_v57  ;;  %v1017_v4 = vmul.f32 0.5, %v761_v58  ;;  %v763_v6 = vadd.f32 %v3172_v5, %v506_v59  ;;  %v508_v7 = vmul.f32 %v3167_v1, %v251_v56  ;;  %v1520_v8 = vmul.f32 0.5, %v2478_v2  ;;  %v259_v57 = vld [vmem:[%s3160_s13 + $0x190] sm:$0xff]  ;;  %v260_v58 = vld [vmem:[%s3160_s13 + $0x198] sm:$0xff] }
  0x7f   : > { %2030 = vst [vmem:[%s3245_s24 + $0xd8] sm:$0xff] %v1774_v62  ;;  %v1018_v9 = vmul.f32 0.5, %v762_v63  ;;  %v764_v10 = vadd.f32 %v3172_v5, %v507_v0  ;;  %v509_v11 = vmul.f32 %v3167_v1, %v252_v60  ;;  %v1775_v13 = vadd.f32 0.5, %v1519_v3  ;;  %v261_v63 = vld [vmem:[%s3160_s13 + $0x1a0] sm:$0xff]  ;;  %v262_v0 = vld [vmem:[%s3160_s13 + $0x1a8] sm:$0xff] }
  0x80   : > { %2495 = vtanh.f32 %v1017_v4  ;;  %v1019_v14 = vmul.f32 0.5, %v763_v6  ;;  %v765_v15 = vadd.f32 %v3172_v5, %v508_v7  ;;  %v1776_v18 = vadd.f32 0.5, %v1520_v8 }
  0x81   : > { %v2480_v17 = vpop.eup %2479  ;;  %2497 = vtanh.f32 %v1018_v9  ;;  %v1020_v19 = vmul.f32 0.5, %v764_v10  ;;  %v766_v20 = vadd.f32 %v3172_v5, %v509_v11  ;;  %2031 = vst [vmem:[%s3245_s24 + $0xe0] sm:$0xff] %v1775_v13  ;;  %v510_v25 = vmul.f32 %v3167_v1, %v253_v12 }
  0x82   : > { %v2482_v22 = vpop.eup %2481  ;;  %v1521_v23 = vmul.f32 0.5, %v2480_v17  ;;  %2499 = vtanh.f32 %v1019_v14  ;;  %v1021_v24 = vmul.f32 0.5, %v765_v15  ;;  %2032 = vst [vmem:[%s3245_s24 + $0xe8] sm:$0xff] %v1776_v18  ;;  %v511_v29 = vmul.f32 %v3167_v1, %v254_v16 }
  0x83   : > { %v1522_v27 = vmul.f32 0.5, %v2482_v22  ;;  %2501 = vtanh.f32 %v1020_v19  ;;  %v1022_v28 = vmul.f32 0.5, %v766_v20  ;;  %v767_v32 = vadd.f32 %v3172_v5, %v510_v25 }
  0x84   : > { %v1777_v31 = vadd.f32 0.5, %v1521_v23  ;;  %2503 = vtanh.f32 %v1021_v24  ;;  %v512_v33 = vmul.f32 %v3167_v1, %v255_v21  ;;  %v768_v37 = vadd.f32 %v3172_v5, %v511_v29  ;;  %v263_v23 = vld [vmem:[%s3160_s13 + $0x1b0] sm:$0xff]  ;;  %v264_v29 = vld [vmem:[%s3160_s13 + $0x1b8] sm:$0xff] }
  0x85   : > { %v2484_v35 = vpop.eup %2483  ;;  %v1778_v36 = vadd.f32 0.5, %v1522_v27  ;;  %2505 = vtanh.f32 %v1022_v28  ;;  %v513_v38 = vmul.f32 %v3167_v1, %v256_v26  ;;  %v1023_v41 = vmul.f32 0.5, %v767_v32 }
  0x86   : > { %v2486_v39 = vpop.eup %2485  ;;  %2033 = vst [vmem:[%s3245_s24 + $0xf0] sm:$0xff] %v1777_v31  ;;  %v1523_v40 = vmul.f32 0.5, %v2484_v35  ;;  %v769_v42 = vadd.f32 %v3172_v5, %v512_v33  ;;  %v514_v43 = vmul.f32 %v3167_v1, %v257_v30  ;;  %v1024_v46 = vmul.f32 0.5, %v768_v37  ;;  %v265_v35 = vld [vmem:[%s3160_s13 + $0x1c0] sm:$0xff] }
  0x87   : > { %v2488_v44 = vpop.eup %2487  ;;  %2034 = vst [vmem:[%s3245_s24 + $0xf8] sm:$0xff] %v1778_v36  ;;  %v1524_v45 = vmul.f32 0.5, %v2486_v39  ;;  %v770_v47 = vadd.f32 %v3172_v5, %v513_v38  ;;  %v515_v48 = vmul.f32 %v3167_v1, %v258_v34  ;;  %2507 = vtanh.f32 %v1023_v41 }
  0x88   : > { %v2490_v49 = vpop.eup %2489  ;;  %v1779_v50 = vadd.f32 0.5, %v1523_v40  ;;  %v1525_v51 = vmul.f32 0.5, %v2488_v44  ;;  %v1025_v52 = vmul.f32 0.5, %v769_v42  ;;  %2509 = vtanh.f32 %v1024_v46  ;;  %v266_v40 = vld [vmem:[%s3160_s13 + $0x1c8] sm:$0xff]  ;;  %v267_v44 = vld [vmem:[%s3160_s13 + $0x1d0] sm:$0xff] }
  0x89   : > { %v2492_v53 = vpop.eup %2491  ;;  %v1780_v54 = vadd.f32 0.5, %v1524_v45  ;;  %v1526_v55 = vmul.f32 0.5, %v2490_v49  ;;  %v1026_v56 = vmul.f32 0.5, %v770_v47  ;;  %v771_v62 = vadd.f32 %v3172_v5, %v514_v43 }
  0x8a   : > { %v2494_v59 = vpop.eup %2493  ;;  %2035 = vst [vmem:[%s3245_s24 + $0x100] sm:$0xff] %v1779_v50  ;;  %v1781_v60 = vadd.f32 0.5, %v1525_v51  ;;  %v1527_v61 = vmul.f32 0.5, %v2492_v53  ;;  %2511 = vtanh.f32 %v1025_v52  ;;  %v772_v4 = vadd.f32 %v3172_v5, %v515_v48  ;;  %v268_v48 = vld [vmem:[%s3160_s13 + $0x1d8] sm:$0xff] }
  0x8b   : > { %2036 = vst [vmem:[%s3245_s24 + $0x108] sm:$0xff] %v1780_v54  ;;  %v1782_v2 = vadd.f32 0.5, %v1526_v55  ;;  %v1528_v3 = vmul.f32 0.5, %v2494_v59  ;;  %2513 = vtanh.f32 %v1026_v56  ;;  %v1027_v7 = vmul.f32 0.5, %v771_v62 }
  0x8c   : > { %2037 = vst [vmem:[%s3245_s24 + $0x110] sm:$0xff] %v1781_v60  ;;  %v1783_v6 = vadd.f32 0.5, %v1527_v61  ;;  %v516_v8 = vmul.f32 %v3167_v1, %v259_v57  ;;  %v517_v9 = vmul.f32 %v3167_v1, %v260_v58  ;;  %v1028_v12 = vmul.f32 0.5, %v772_v4  ;;  %v269_v4 = vld [vmem:[%s3160_s13 + $0x1e0] sm:$0xff] }
  0x8d   : > { %v2496_v10 = vpop.eup %2495  ;;  %2038 = vst [vmem:[%s3245_s24 + $0x118] sm:$0xff] %v1782_v2  ;;  %v1784_v11 = vadd.f32 0.5, %v1528_v3  ;;  %v518_v13 = vmul.f32 %v3167_v1, %v261_v63  ;;  %v519_v14 = vmul.f32 %v3167_v1, %v262_v0  ;;  %2515 = vtanh.f32 %v1027_v7 }
  0x8e   : > { %v2498_v15 = vpop.eup %2497  ;;  %2039 = vst [vmem:[%s3245_s24 + $0x120] sm:$0xff] %v1783_v6  ;;  %v1529_v16 = vmul.f32 0.5, %v2496_v10  ;;  %v773_v17 = vadd.f32 %v3172_v5, %v516_v8  ;;  %v774_v18 = vadd.f32 %v3172_v5, %v517_v9  ;;  %2517 = vtanh.f32 %v1028_v12  ;;  %v270_v6 = vld [vmem:[%s3160_s13 + $0x1e8] sm:$0xff]  ;;  %v271_v10 = vld [vmem:[%s3160_s13 + $0x1f0] sm:$0xff] }
  0x8f   : > { %v2500_v19 = vpop.eup %2499  ;;  %2040 = vst [vmem:[%s3245_s24 + $0x128] sm:$0xff] %v1784_v11  ;;  %v1530_v20 = vmul.f32 0.5, %v2498_v15  ;;  %v775_v21 = vadd.f32 %v3172_v5, %v518_v13  ;;  %v776_v22 = vadd.f32 %v3172_v5, %v519_v14  ;;  %v520_v39 = vmul.f32 %v3167_v1, %v263_v23  ;;  %v272_v14 = vld [vmem:[%s3160_s13 + $0x1f8] sm:$0xff] }
  0x90   : > { %v2502_v24 = vpop.eup %2501  ;;  %v1785_v25 = vadd.f32 0.5, %v1529_v16  ;;  %v1531_v26 = vmul.f32 0.5, %v2500_v19  ;;  %v1029_v27 = vmul.f32 0.5, %v773_v17  ;;  %v1030_v28 = vmul.f32 0.5, %v774_v18  ;;  %v273_v19 = vld [vmem:[%s3160_s13 + $0x200] sm:$0xff] }
  0x91   : > { %v2504_v30 = vpop.eup %2503  ;;  %v1786_v31 = vadd.f32 0.5, %v1530_v20  ;;  %v1532_v32 = vmul.f32 0.5, %v2502_v24  ;;  %v1031_v33 = vmul.f32 0.5, %v775_v21  ;;  %v1032_v34 = vmul.f32 0.5, %v776_v22 }
  0x92   : > { %v2506_v36 = vpop.eup %2505  ;;  %2041 = vst [vmem:[%s3245_s24 + $0x130] sm:$0xff] %v1785_v25  ;;  %v1787_v37 = vadd.f32 0.5, %v1531_v26  ;;  %v1533_v38 = vmul.f32 0.5, %v2504_v30  ;;  %2519 = vtanh.f32 %v1029_v27  ;;  %v521_v43 = vmul.f32 %v3167_v1, %v264_v29 }
  0x93   : > { %2042 = vst [vmem:[%s3245_s24 + $0x138] sm:$0xff] %v1786_v31  ;;  %v1788_v41 = vadd.f32 0.5, %v1532_v32  ;;  %v1534_v42 = vmul.f32 0.5, %v2506_v36  ;;  %2521 = vtanh.f32 %v1030_v28  ;;  %v777_v46 = vadd.f32 %v3172_v5, %v520_v39  ;;  %v274_v32 = vld [vmem:[%s3160_s13 + $0x208] sm:$0xff] }
  0x94   : > { %2043 = vst [vmem:[%s3245_s24 + $0x140] sm:$0xff] %v1787_v37  ;;  %v1789_v45 = vadd.f32 0.5, %v1533_v38  ;;  %2523 = vtanh.f32 %v1031_v33  ;;  %v522_v47 = vmul.f32 %v3167_v1, %v265_v35  ;;  %v2508_v49 = vpop.eup %2507  ;;  %v778_v51 = vadd.f32 %v3172_v5, %v521_v43  ;;  %v275_v33 = vld [vmem:[%s3160_s13 + $0x210] sm:$0xff] }
  0x95   : > { %2044 = vst [vmem:[%s3245_s24 + $0x148] sm:$0xff] %v1788_v41  ;;  %v1790_v50 = vadd.f32 0.5, %v1534_v42  ;;  %2525 = vtanh.f32 %v1032_v34  ;;  %v523_v52 = vmul.f32 %v3167_v1, %v266_v40  ;;  %v2510_v53 = vpop.eup %2509  ;;  %v1535_v54 = vmul.f32 0.5, %v2508_v49 }
  0x96   : > { %2045 = vst [vmem:[%s3245_s24 + $0x150] sm:$0xff] %v1789_v45  ;;  %v1033_v55 = vmul.f32 0.5, %v777_v46  ;;  %v779_v56 = vadd.f32 %v3172_v5, %v522_v47  ;;  %v524_v57 = vmul.f32 %v3167_v1, %v267_v44  ;;  %v1536_v59 = vmul.f32 0.5, %v2510_v53 }
  0x97   : > { %v2512_v58 = vpop.eup %2511  ;;  %2046 = vst [vmem:[%s3245_s24 + $0x158] sm:$0xff] %v1790_v50  ;;  %v1034_v60 = vmul.f32 0.5, %v778_v51  ;;  %v780_v61 = vadd.f32 %v3172_v5, %v523_v52  ;;  %v525_v62 = vmul.f32 %v3167_v1, %v268_v48  ;;  %v1791_v0 = vadd.f32 0.5, %v1535_v54  ;;  %v276_v51 = vld [vmem:[%s3160_s13 + $0x218] sm:$0xff]  ;;  %v277_v52 = vld [vmem:[%s3160_s13 + $0x220] sm:$0xff] }
  0x98   : > { %v2514_v63 = vpop.eup %2513  ;;  %v1537_v2 = vmul.f32 0.5, %v2512_v58  ;;  %2527 = vtanh.f32 %v1033_v55  ;;  %v1035_v3 = vmul.f32 0.5, %v779_v56  ;;  %v1792_v7 = vadd.f32 0.5, %v1536_v59  ;;  %v278_v56 = vld [vmem:[%s3160_s13 + $0x228] sm:$0xff] }
  0x99   : > { %v1538_v8 = vmul.f32 0.5, %v2514_v63  ;;  %2529 = vtanh.f32 %v1034_v60  ;;  %v1036_v9 = vmul.f32 0.5, %v780_v61  ;;  %2047 = vst [vmem:[%s3245_s24 + $0x160] sm:$0xff] %v1791_v0  ;;  %v781_v12 = vadd.f32 %v3172_v5, %v524_v57  ;;  %v279_v60 = vld [vmem:[%s3160_s13 + $0x230] sm:$0xff] }
  0x9a   : > { %v1793_v11 = vadd.f32 0.5, %v1537_v2  ;;  %2531 = vtanh.f32 %v1035_v3  ;;  %v782_v13 = vadd.f32 %v3172_v5, %v525_v62  ;;  %v2516_v15 = vpop.eup %2515  ;;  %2048 = vst [vmem:[%s3245_s24 + $0x168] sm:$0xff] %v1792_v7  ;;  %v526_v17 = vmul.f32 %v3167_v1, %v269_v4 }
  0x9b   : > { %v1794_v16 = vadd.f32 0.5, %v1538_v8  ;;  %2533 = vtanh.f32 %v1036_v9  ;;  %v527_v18 = vmul.f32 %v3167_v1, %v270_v6  ;;  %v2518_v20 = vpop.eup %2517  ;;  %v1539_v21 = vmul.f32 0.5, %v2516_v15 }
  0x9c   : > { %2049 = vst [vmem:[%s3245_s24 + $0x170] sm:$0xff] %v1793_v11  ;;  %v1037_v22 = vmul.f32 0.5, %v781_v12  ;;  %v1038_v23 = vmul.f32 0.5, %v782_v13  ;;  %v528_v24 = vmul.f32 %v3167_v1, %v271_v10  ;;  %v1540_v25 = vmul.f32 0.5, %v2518_v20 }
  0x9d   : > { %2050 = vst [vmem:[%s3245_s24 + $0x178] sm:$0xff] %v1794_v16  ;;  %v783_v26 = vadd.f32 %v3172_v5, %v526_v17  ;;  %v784_v27 = vadd.f32 %v3172_v5, %v527_v18  ;;  %v529_v28 = vmul.f32 %v3167_v1, %v272_v14  ;;  %v1795_v29 = vadd.f32 0.5, %v1539_v21  ;;  %v280_v17 = vld [vmem:[%s3160_s13 + $0x238] sm:$0xff]  ;;  %v281_v18 = vld [vmem:[%s3160_s13 + $0x240] sm:$0xff] }
  0x9e   : > { %2535 = vtanh.f32 %v1037_v22  ;;  %v785_v30 = vadd.f32 %v3172_v5, %v528_v24  ;;  %v530_v31 = vmul.f32 %v3167_v1, %v273_v19  ;;  %v1796_v35 = vadd.f32 0.5, %v1540_v25  ;;  %v282_v22 = vld [vmem:[%s3160_s13 + $0x248] sm:$0xff] }
  0x9f   : > { %v2520_v34 = vpop.eup %2519  ;;  %2537 = vtanh.f32 %v1038_v23  ;;  %v1039_v36 = vmul.f32 0.5, %v783_v26  ;;  %v1040_v37 = vmul.f32 0.5, %v784_v27  ;;  %2051 = vst [vmem:[%s3245_s24 + $0x180] sm:$0xff] %v1795_v29  ;;  %v786_v41 = vadd.f32 %v3172_v5, %v529_v28 }
  0xa0   : > { %v2522_v38 = vpop.eup %2521  ;;  %v1541_v39 = vmul.f32 0.5, %v2520_v34  ;;  %v1041_v40 = vmul.f32 0.5, %v785_v30  ;;  %v787_v42 = vadd.f32 %v3172_v5, %v530_v31  ;;  %2052 = vst [vmem:[%s3245_s24 + $0x188] sm:$0xff] %v1796_v35  ;;  %v531_v45 = vmul.f32 %v3167_v1, %v274_v32  ;;  %v283_v31 = vld [vmem:[%s3160_s13 + $0x250] sm:$0xff] }
  0xa1   : > { %v2524_v43 = vpop.eup %2523  ;;  %v1542_v44 = vmul.f32 0.5, %v2522_v38  ;;  %2539 = vtanh.f32 %v1039_v36  ;;  %v532_v46 = vmul.f32 %v3167_v1, %v275_v33  ;;  %v1042_v50 = vmul.f32 0.5, %v786_v41 }
  0xa2   : > { %v2526_v47 = vpop.eup %2525  ;;  %v1797_v48 = vadd.f32 0.5, %v1541_v39  ;;  %v1543_v49 = vmul.f32 0.5, %v2524_v43  ;;  %2541 = vtanh.f32 %v1040_v37  ;;  %v1043_v55 = vmul.f32 0.5, %v787_v42  ;;  %v284_v39 = vld [vmem:[%s3160_s13 + $0x258] sm:$0xff] }
  0xa3   : > { %v1798_v53 = vadd.f32 0.5, %v1542_v44  ;;  %v1544_v54 = vmul.f32 0.5, %v2526_v47  ;;  %2543 = vtanh.f32 %v1041_v40  ;;  %v788_v58 = vadd.f32 %v3172_v5, %v531_v45  ;;  %v285_v44 = vld [vmem:[%s3160_s13 + $0x260] sm:$0xff] }
  0xa4   : > { %2053 = vst [vmem:[%s3245_s24 + $0x190] sm:$0xff] %v1797_v48  ;;  %v1799_v57 = vadd.f32 0.5, %v1543_v49  ;;  %2545 = vtanh.f32 %v1042_v50  ;;  %v789_v59 = vadd.f32 %v3172_v5, %v532_v46  ;;  %v533_v63 = vmul.f32 %v3167_v1, %v276_v51 }
  0xa5   : > { %v2528_v61 = vpop.eup %2527  ;;  %2054 = vst [vmem:[%s3245_s24 + $0x198] sm:$0xff] %v1798_v53  ;;  %v1800_v62 = vadd.f32 0.5, %v1544_v54  ;;  %2547 = vtanh.f32 %v1043_v55  ;;  %v534_v0 = vmul.f32 %v3167_v1, %v277_v52  ;;  %v1044_v4 = vmul.f32 0.5, %v788_v58 }
  0xa6   : > { %v2530_v2 = vpop.eup %2529  ;;  %2055 = vst [vmem:[%s3245_s24 + $0x1a0] sm:$0xff] %v1799_v57  ;;  %v1545_v3 = vmul.f32 0.5, %v2528_v61  ;;  %v1045_v6 = vmul.f32 0.5, %v789_v59  ;;  %v535_v7 = vmul.f32 %v3167_v1, %v278_v56  ;;  %v790_v10 = vadd.f32 %v3172_v5, %v533_v63  ;;  %v286_v59 = vld [vmem:[%s3160_s13 + $0x268] sm:$0xff] }
  0xa7   : > { %v2532_v8 = vpop.eup %2531  ;;  %2056 = vst [vmem:[%s3245_s24 + $0x1a8] sm:$0xff] %v1800_v62  ;;  %v1546_v9 = vmul.f32 0.5, %v2530_v2  ;;  %v791_v11 = vadd.f32 %v3172_v5, %v534_v0  ;;  %v536_v12 = vmul.f32 %v3167_v1, %v279_v60  ;;  %2549 = vtanh.f32 %v1044_v4  ;;  %v287_v0 = vld [vmem:[%s3160_s13 + $0x270] sm:$0xff]  ;;  %v288_v2 = vld [vmem:[%s3160_s13 + $0x278] sm:$0xff] }
  0xa8   : > { %v2534_v13 = vpop.eup %2533  ;;  %v1801_v14 = vadd.f32 0.5, %v1545_v3  ;;  %v1547_v15 = vmul.f32 0.5, %v2532_v8  ;;  %v792_v16 = vadd.f32 %v3172_v5, %v535_v7  ;;  %2551 = vtanh.f32 %v1045_v6  ;;  %v289_v7 = vld [vmem:[%s3160_s13 + $0x280] sm:$0xff] }
  0xa9   : > { %v1802_v19 = vadd.f32 0.5, %v1546_v9  ;;  %v1548_v20 = vmul.f32 0.5, %v2534_v13  ;;  %v1046_v21 = vmul.f32 0.5, %v790_v10  ;;  %v1047_v24 = vmul.f32 0.5, %v791_v11 }
  0xaa   : > { %2057 = vst [vmem:[%s3245_s24 + $0x1b0] sm:$0xff] %v1801_v14  ;;  %v1803_v23 = vadd.f32 0.5, %v1547_v15  ;;  %v1048_v25 = vmul.f32 0.5, %v792_v16  ;;  %v793_v26 = vadd.f32 %v3172_v5, %v536_v12  ;;  %v537_v29 = vmul.f32 %v3167_v1, %v280_v17 }
  0xab   : > { %v2536_v27 = vpop.eup %2535  ;;  %2058 = vst [vmem:[%s3245_s24 + $0x1b8] sm:$0xff] %v1802_v19  ;;  %v1804_v28 = vadd.f32 0.5, %v1548_v20  ;;  %2553 = vtanh.f32 %v1046_v21  ;;  %v538_v30 = vmul.f32 %v3167_v1, %v281_v18  ;;  %v539_v35 = vmul.f32 %v3167_v1, %v282_v22 }
  0xac   : > { %v2538_v32 = vpop.eup %2537  ;;  %2059 = vst [vmem:[%s3245_s24 + $0x1c0] sm:$0xff] %v1803_v23  ;;  %v1549_v33 = vmul.f32 0.5, %v2536_v27  ;;  %2555 = vtanh.f32 %v1047_v24  ;;  %v1049_v34 = vmul.f32 0.5, %v793_v26  ;;  %v794_v37 = vadd.f32 %v3172_v5, %v537_v29  ;;  %v290_v24 = vld [vmem:[%s3160_s13 + $0x288] sm:$0xff]  ;;  %v291_v29 = vld [vmem:[%s3160_s13 + $0x290] sm:$0xff] }
  0xad   : > { %2060 = vst [vmem:[%s3245_s24 + $0x1c8] sm:$0xff] %v1804_v28  ;;  %v1550_v36 = vmul.f32 0.5, %v2538_v32  ;;  %2557 = vtanh.f32 %v1048_v25  ;;  %v795_v38 = vadd.f32 %v3172_v5, %v538_v30  ;;  %v796_v42 = vadd.f32 %v3172_v5, %v539_v35 }
  0xae   : > { %v2540_v40 = vpop.eup %2539  ;;  %v1805_v41 = vadd.f32 0.5, %v1549_v33  ;;  %2559 = vtanh.f32 %v1049_v34  ;;  %v540_v43 = vmul.f32 %v3167_v1, %v283_v31  ;;  %v1050_v48 = vmul.f32 0.5, %v794_v37 }
  0xaf   : > { %v2542_v45 = vpop.eup %2541  ;;  %v1806_v46 = vadd.f32 0.5, %v1550_v36  ;;  %v1551_v47 = vmul.f32 0.5, %v2540_v40  ;;  %v1051_v49 = vmul.f32 0.5, %v795_v38  ;;  %v1052_v52 = vmul.f32 0.5, %v796_v42 }
  0xb0   : > { %v2544_v50 = vpop.eup %2543  ;;  %2061 = vst [vmem:[%s3245_s24 + $0x1d0] sm:$0xff] %v1805_v41  ;;  %v1552_v51 = vmul.f32 0.5, %v2542_v45  ;;  %v797_v53 = vadd.f32 %v3172_v5, %v540_v43  ;;  %v541_v54 = vmul.f32 %v3167_v1, %v284_v39  ;;  %2561 = vtanh.f32 %v1050_v48  ;;  %v292_v39 = vld [vmem:[%s3160_s13 + $0x298] sm:$0xff]  ;;  %v294_v45 = vld [vmem:[%s3160_s13 + $0x2a8] sm:$0xff] }
  0xb1   : > { %v2546_v55 = vpop.eup %2545  ;;  %2062 = vst [vmem:[%s3245_s24 + $0x1d8] sm:$0xff] %v1806_v46  ;;  %v1807_v56 = vadd.f32 0.5, %v1551_v47  ;;  %v1553_v57 = vmul.f32 0.5, %v2544_v50  ;;  %v542_v58 = vmul.f32 %v3167_v1, %v285_v44  ;;  %2563 = vtanh.f32 %v1051_v49  ;;  %v293_v44 = vld [vmem:[%s3160_s13 + $0x2a0] sm:$0xff]  ;;  %v295_v49 = vld [vmem:[%s3160_s13 + $0x2b0] sm:$0xff] }
  0xb2   : > { %v2548_v60 = vpop.eup %2547  ;;  %v1808_v61 = vadd.f32 0.5, %v1552_v51  ;;  %v1554_v62 = vmul.f32 0.5, %v2546_v55  ;;  %v1053_v63 = vmul.f32 0.5, %v797_v53  ;;  %2565 = vtanh.f32 %v1052_v52 }
  0xb3   : > { %2063 = vst [vmem:[%s3245_s24 + $0x1e0] sm:$0xff] %v1807_v56  ;;  %v1809_v3 = vadd.f32 0.5, %v1553_v57  ;;  %v1555_v4 = vmul.f32 0.5, %v2548_v60  ;;  %v798_v6 = vadd.f32 %v3172_v5, %v541_v54  ;;  %v799_v9 = vadd.f32 %v3172_v5, %v542_v58 }
  0xb4   : > { %2064 = vst [vmem:[%s3245_s24 + $0x1e8] sm:$0xff] %v1808_v61  ;;  %v1810_v8 = vadd.f32 0.5, %v1554_v62  ;;  %2567 = vtanh.f32 %v1053_v63  ;;  %v543_v10 = vmul.f32 %v3167_v1, %v286_v59  ;;  %v2550_v11 = vpop.eup %2549  ;;  %v544_v14 = vmul.f32 %v3167_v1, %v287_v0 }
  0xb5   : > { %2065 = vst [vmem:[%s3245_s24 + $0x1f0] sm:$0xff] %v1809_v3  ;;  %v1811_v12 = vadd.f32 0.5, %v1555_v4  ;;  %v1054_v13 = vmul.f32 0.5, %v798_v6  ;;  %v545_v15 = vmul.f32 %v3167_v1, %v288_v2  ;;  %v2552_v16 = vpop.eup %2551  ;;  %v1556_v17 = vmul.f32 0.5, %v2550_v11  ;;  %v296_v4 = vld [vmem:[%s3160_s13 + $0x2b8] sm:$0xff]  ;;  %v298_v11 = vld [vmem:[%s3160_s13 + $0x2c8] sm:$0xff] }
  0xb6   : > { %2066 = vst [vmem:[%s3245_s24 + $0x1f8] sm:$0xff] %v1810_v8  ;;  %v1055_v18 = vmul.f32 0.5, %v799_v9  ;;  %v800_v19 = vadd.f32 %v3172_v5, %v543_v10  ;;  %v546_v20 = vmul.f32 %v3167_v1, %v289_v7  ;;  %v1557_v21 = vmul.f32 0.5, %v2552_v16  ;;  %v297_v10 = vld [vmem:[%s3160_s13 + $0x2c0] sm:$0xff] }
  0xb7   : > { %2067 = vst [vmem:[%s3245_s24 + $0x200] sm:$0xff] %v1811_v12  ;;  %2569 = vtanh.f32 %v1054_v13  ;;  %v801_v22 = vadd.f32 %v3172_v5, %v544_v14  ;;  %v802_v23 = vadd.f32 %v3172_v5, %v545_v15  ;;  %v1812_v26 = vadd.f32 0.5, %v1556_v17 }
  0xb8   : > { %v2554_v25 = vpop.eup %2553  ;;  %2571 = vtanh.f32 %v1055_v18  ;;  %v1056_v27 = vmul.f32 0.5, %v800_v19  ;;  %v803_v28 = vadd.f32 %v3172_v5, %v546_v20  ;;  %v1813_v31 = vadd.f32 0.5, %v1557_v21  ;;  %v299_v19 = vld [vmem:[%s3160_s13 + $0x2d0] sm:$0xff] }
  0xb9   : > { %v2556_v30 = vpop.eup %2555  ;;  %v1558_v32 = vmul.f32 0.5, %v2554_v25  ;;  %v1057_v33 = vmul.f32 0.5, %v801_v22  ;;  %v1058_v34 = vmul.f32 0.5, %v802_v23  ;;  %2068 = vst [vmem:[%s3245_s24 + $0x208] sm:$0xff] %v1812_v26  ;;  %v547_v38 = vmul.f32 %v3167_v1, %v290_v24  ;;  %v300_v24 = vld [vmem:[%s3160_s13 + $0x2d8] sm:$0xff] }
  0xba   : > { %v2558_v35 = vpop.eup %2557  ;;  %v1559_v36 = vmul.f32 0.5, %v2556_v30  ;;  %2573 = vtanh.f32 %v1056_v27  ;;  %v1059_v37 = vmul.f32 0.5, %v803_v28  ;;  %2069 = vst [vmem:[%s3245_s24 + $0x210] sm:$0xff] %v1813_v31  ;;  %v548_v43 = vmul.f32 %v3167_v1, %v291_v29 }
  0xbb   : > { %v2560_v40 = vpop.eup %2559  ;;  %v1814_v41 = vadd.f32 0.5, %v1558_v32  ;;  %v1560_v42 = vmul.f32 0.5, %v2558_v35  ;;  %2575 = vtanh.f32 %v1057_v33  ;;  %v804_v48 = vadd.f32 %v3172_v5, %v547_v38 }
  0xbc   : > { %v1815_v46 = vadd.f32 0.5, %v1559_v36  ;;  %v1561_v47 = vmul.f32 0.5, %v2560_v40  ;;  %2577 = vtanh.f32 %v1058_v34  ;;  %v805_v51 = vadd.f32 %v3172_v5, %v548_v43 }
  0xbd   : > { %2070 = vst [vmem:[%s3245_s24 + $0x218] sm:$0xff] %v1814_v41  ;;  %v1816_v50 = vadd.f32 0.5, %v1560_v42  ;;  %2579 = vtanh.f32 %v1059_v37  ;;  %v549_v52 = vmul.f32 %v3167_v1, %v292_v39  ;;  %v2562_v53 = vpop.eup %2561  ;;  %v1060_v55 = vmul.f32 0.5, %v804_v48  ;;  %v301_v37 = vld [vmem:[%s3160_s13 + $0x2e0] sm:$0xff] }
  0xbe   : > { %2071 = vst [vmem:[%s3245_s24 + $0x220] sm:$0xff] %v1815_v46  ;;  %v1817_v54 = vadd.f32 0.5, %v1561_v47  ;;  %v550_v56 = vmul.f32 %v3167_v1, %v293_v44  ;;  %v551_v57 = vmul.f32 %v3167_v1, %v294_v45  ;;  %v2564_v58 = vpop.eup %2563  ;;  %v1562_v59 = vmul.f32 0.5, %v2562_v53  ;;  %v302_v47 = vld [vmem:[%s3160_s13 + $0x2e8] sm:$0xff]  ;;  %v304_v53 = vld [vmem:[%s3160_s13 + $0x2f8] sm:$0xff] }
  0xbf   : > { %2072 = vst [vmem:[%s3245_s24 + $0x228] sm:$0xff] %v1816_v50  ;;  %v1061_v60 = vmul.f32 0.5, %v805_v51  ;;  %v806_v61 = vadd.f32 %v3172_v5, %v549_v52  ;;  %v552_v62 = vmul.f32 %v3167_v1, %v295_v49  ;;  %v2566_v63 = vpop.eup %2565  ;;  %v1563_v0 = vmul.f32 0.5, %v2564_v58  ;;  %v303_v52 = vld [vmem:[%s3160_s13 + $0x2f0] sm:$0xff] }
  0xc0   : > { %2073 = vst [vmem:[%s3245_s24 + $0x230] sm:$0xff] %v1817_v54  ;;  %2581 = vtanh.f32 %v1060_v55  ;;  %v807_v2 = vadd.f32 %v3172_v5, %v550_v56  ;;  %v808_v3 = vadd.f32 %v3172_v5, %v551_v57  ;;  %v1818_v7 = vadd.f32 0.5, %v1562_v59 }
  0xc1   : > { %v2568_v6 = vpop.eup %2567  ;;  %v1564_v8 = vmul.f32 0.5, %v2566_v63  ;;  %2583 = vtanh.f32 %v1061_v60  ;;  %v1062_v9 = vmul.f32 0.5, %v806_v61  ;;  %v1819_v12 = vadd.f32 0.5, %v1563_v0  ;;  %v305_v61 = vld [vmem:[%s3160_s13 + $0x300] sm:$0xff] }
  0xc2   : > { %v1565_v13 = vmul.f32 0.5, %v2568_v6  ;;  %v1063_v14 = vmul.f32 0.5, %v807_v2  ;;  %v1064_v15 = vmul.f32 0.5, %v808_v3  ;;  %2074 = vst [vmem:[%s3245_s24 + $0x238] sm:$0xff] %v1818_v7  ;;  %v809_v17 = vadd.f32 %v3172_v5, %v552_v62  ;;  %v306_v3 = vld [vmem:[%s3160_s13 + $0x308] sm:$0xff] }
  0xc3   : > { %v1820_v16 = vadd.f32 0.5, %v1564_v8  ;;  %2585 = vtanh.f32 %v1062_v9  ;;  %v553_v18 = vmul.f32 %v3167_v1, %v296_v4  ;;  %2075 = vst [vmem:[%s3245_s24 + $0x240] sm:$0xff] %v1819_v12  ;;  %v554_v22 = vmul.f32 %v3167_v1, %v297_v10 }
  0xc4   : > { %v2570_v20 = vpop.eup %2569  ;;  %v1821_v21 = vadd.f32 0.5, %v1565_v13  ;;  %2587 = vtanh.f32 %v1063_v14  ;;  %v555_v23 = vmul.f32 %v3167_v1, %v298_v11  ;;  %v1065_v27 = vmul.f32 0.5, %v809_v17  ;;  %v307_v17 = vld [vmem:[%s3160_s13 + $0x310] sm:$0xff] }
  0xc5   : > { %v2572_v25 = vpop.eup %2571  ;;  %2076 = vst [vmem:[%s3245_s24 + $0x248] sm:$0xff] %v1820_v16  ;;  %v1566_v26 = vmul.f32 0.5, %v2570_v20  ;;  %2589 = vtanh.f32 %v1064_v15  ;;  %v810_v28 = vadd.f32 %v3172_v5, %v553_v18  ;;  %v811_v30 = vadd.f32 %v3172_v5, %v554_v22 }
  0xc6   : > { %2077 = vst [vmem:[%s3245_s24 + $0x250] sm:$0xff] %v1821_v21  ;;  %v1567_v29 = vmul.f32 0.5, %v2572_v25  ;;  %v812_v31 = vadd.f32 %v3172_v5, %v555_v23  ;;  %v556_v32 = vmul.f32 %v3167_v1, %v299_v19  ;;  %2591 = vtanh.f32 %v1065_v27  ;;  %v308_v27 = vld [vmem:[%s3160_s13 + $0x318] sm:$0xff] }
  0xc7   : > { %v2574_v33 = vpop.eup %2573  ;;  %v1822_v34 = vadd.f32 0.5, %v1566_v26  ;;  %v1066_v35 = vmul.f32 0.5, %v810_v28  ;;  %v557_v36 = vmul.f32 %v3167_v1, %v300_v24  ;;  %v1067_v41 = vmul.f32 0.5, %v811_v30 }
  0xc8   : > { %v2576_v38 = vpop.eup %2575  ;;  %v1823_v39 = vadd.f32 0.5, %v1567_v29  ;;  %v1568_v40 = vmul.f32 0.5, %v2574_v33  ;;  %v1068_v42 = vmul.f32 0.5, %v812_v31  ;;  %v813_v45 = vadd.f32 %v3172_v5, %v556_v32  ;;  %v309_v31 = vld [vmem:[%s3160_s13 + $0x320] sm:$0xff]  ;;  %v310_v32 = vld [vmem:[%s3160_s13 + $0x328] sm:$0xff]  ;;  %v311_v33 = vld [vmem:[%s3160_s13 + $0x330] sm:$0xff] }
  0xc9   : > { %v2578_v43 = vpop.eup %2577  ;;  %2078 = vst [vmem:[%s3245_s24 + $0x258] sm:$0xff] %v1822_v34  ;;  %v1569_v44 = vmul.f32 0.5, %v2576_v38  ;;  %2593 = vtanh.f32 %v1066_v35  ;;  %v814_v46 = vadd.f32 %v3172_v5, %v557_v36  ;;  %v558_v51 = vmul.f32 %v3167_v1, %v301_v37 }
  0xca   : > { %v2580_v48 = vpop.eup %2579  ;;  %2079 = vst [vmem:[%s3245_s24 + $0x260] sm:$0xff] %v1823_v39  ;;  %v1824_v49 = vadd.f32 0.5, %v1568_v40  ;;  %v1570_v50 = vmul.f32 0.5, %v2578_v43  ;;  %2595 = vtanh.f32 %v1067_v41  ;;  %v1069_v56 = vmul.f32 0.5, %v813_v45 }
  0xcb   : > { %v1825_v54 = vadd.f32 0.5, %v1569_v44  ;;  %v1571_v55 = vmul.f32 0.5, %v2580_v48  ;;  %2597 = vtanh.f32 %v1068_v42  ;;  %v1070_v58 = vmul.f32 0.5, %v814_v46 }
  0xcc   : > { %2080 = vst [vmem:[%s3245_s24 + $0x268] sm:$0xff] %v1824_v49  ;;  %v1826_v57 = vadd.f32 0.5, %v1570_v50  ;;  %v815_v59 = vadd.f32 %v3172_v5, %v558_v51  ;;  %v559_v60 = vmul.f32 %v3167_v1, %v302_v47  ;;  %2599 = vtanh.f32 %v1069_v56 }
  0xcd   : > { %v2582_v62 = vpop.eup %2581  ;;  %2081 = vst [vmem:[%s3245_s24 + $0x270] sm:$0xff] %v1825_v54  ;;  %v1827_v63 = vadd.f32 0.5, %v1571_v55  ;;  %v560_v0 = vmul.f32 %v3167_v1, %v303_v52  ;;  %v561_v2 = vmul.f32 %v3167_v1, %v304_v53  ;;  %2601 = vtanh.f32 %v1070_v58  ;;  %v312_v55 = vld [vmem:[%s3160_s13 + $0x338] sm:$0xff] }
  0xce   : > { %v2584_v4 = vpop.eup %2583  ;;  %2082 = vst [vmem:[%s3245_s24 + $0x278] sm:$0xff] %v1826_v57  ;;  %v1572_v6 = vmul.f32 0.5, %v2582_v62  ;;  %v1071_v7 = vmul.f32 0.5, %v815_v59  ;;  %v816_v8 = vadd.f32 %v3172_v5, %v559_v60  ;;  %v562_v12 = vmul.f32 %v3167_v1, %v305_v61  ;;  %v313_v59 = vld [vmem:[%s3160_s13 + $0x340] sm:$0xff]  ;;  %v314_v60 = vld [vmem:[%s3160_s13 + $0x348] sm:$0xff] }
  0xcf   : > { %2083 = vst [vmem:[%s3245_s24 + $0x280] sm:$0xff] %v1827_v63  ;;  %v1573_v9 = vmul.f32 0.5, %v2584_v4  ;;  %v817_v10 = vadd.f32 %v3172_v5, %v560_v0  ;;  %v818_v11 = vadd.f32 %v3172_v5, %v561_v2  ;;  %v563_v16 = vmul.f32 %v3167_v1, %v306_v3  ;;  %v315_v3 = vld [vmem:[%s3160_s13 + $0x350] sm:$0xff] }
  0xd0   : > { %v2586_v13 = vpop.eup %2585  ;;  %v1828_v14 = vadd.f32 0.5, %v1572_v6  ;;  %2603 = vtanh.f32 %v1071_v7  ;;  %v1072_v15 = vmul.f32 0.5, %v816_v8  ;;  %v819_v25 = vadd.f32 %v3172_v5, %v562_v12 }
  0xd1   : > { %v2588_v18 = vpop.eup %2587  ;;  %v1829_v19 = vadd.f32 0.5, %v1573_v9  ;;  %v1574_v20 = vmul.f32 0.5, %v2586_v13  ;;  %v1073_v21 = vmul.f32 0.5, %v817_v10  ;;  %v1074_v22 = vmul.f32 0.5, %v818_v11 }
  0xd2   : > { %v2590_v23 = vpop.eup %2589  ;;  %2084 = vst [vmem:[%s3245_s24 + $0x288] sm:$0xff] %v1828_v14  ;;  %v1575_v24 = vmul.f32 0.5, %v2588_v18  ;;  %2605 = vtanh.f32 %v1072_v15  ;;  %v820_v26 = vadd.f32 %v3172_v5, %v563_v16  ;;  %v564_v30 = vmul.f32 %v3167_v1, %v307_v17  ;;  %v316_v17 = vld [vmem:[%s3160_s13 + $0x358] sm:$0xff] }
  0xd3   : > { %2085 = vst [vmem:[%s3245_s24 + $0x290] sm:$0xff] %v1829_v19  ;;  %v1830_v28 = vadd.f32 0.5, %v1574_v20  ;;  %v1576_v29 = vmul.f32 0.5, %v2590_v23  ;;  %2607 = vtanh.f32 %v1073_v21  ;;  %v2592_v34 = vpop.eup %2591  ;;  %v1075_v36 = vmul.f32 0.5, %v819_v25 }
  0xd4   : > { %v1831_v35 = vadd.f32 0.5, %v1575_v24  ;;  %2609 = vtanh.f32 %v1074_v22  ;;  %v1076_v37 = vmul.f32 0.5, %v820_v26  ;;  %v1577_v39 = vmul.f32 0.5, %v2592_v34 }
  0xd5   : > { %2086 = vst [vmem:[%s3245_s24 + $0x298] sm:$0xff] %v1830_v28  ;;  %v1832_v38 = vadd.f32 0.5, %v1576_v29  ;;  %v821_v40 = vadd.f32 %v3172_v5, %v564_v30  ;;  %v565_v41 = vmul.f32 %v3167_v1, %v308_v27  ;;  %2611 = vtanh.f32 %v1075_v36  ;;  %v317_v30 = vld [vmem:[%s3160_s13 + $0x360] sm:$0xff] }
  0xd6   : > { %v2594_v42 = vpop.eup %2593  ;;  %2087 = vst [vmem:[%s3245_s24 + $0x2a0] sm:$0xff] %v1831_v35  ;;  %v566_v43 = vmul.f32 %v3167_v1, %v309_v31  ;;  %v567_v44 = vmul.f32 %v3167_v1, %v310_v32  ;;  %v568_v45 = vmul.f32 %v3167_v1, %v311_v33  ;;  %v1833_v47 = vadd.f32 0.5, %v1577_v39  ;;  %v318_v31 = vld [vmem:[%s3160_s13 + $0x368] sm:$0xff]  ;;  %v319_v39 = vld [vmem:[%s3160_s13 + $0x370] sm:$0xff] }
  0xd7   : > { %v2596_v46 = vpop.eup %2595  ;;  %2088 = vst [vmem:[%s3245_s24 + $0x2a8] sm:$0xff] %v1832_v38  ;;  %v1578_v48 = vmul.f32 0.5, %v2594_v42  ;;  %2613 = vtanh.f32 %v1076_v37  ;;  %v1077_v49 = vmul.f32 0.5, %v821_v40  ;;  %v822_v52 = vadd.f32 %v3172_v5, %v565_v41 }
  0xd8   : > { %v2598_v50 = vpop.eup %2597  ;;  %v1579_v51 = vmul.f32 0.5, %v2596_v46  ;;  %v823_v53 = vadd.f32 %v3172_v5, %v566_v43  ;;  %v824_v54 = vadd.f32 %v3172_v5, %v567_v44  ;;  %2089 = vst [vmem:[%s3245_s24 + $0x2b0] sm:$0xff] %v1833_v47  ;;  %v825_v58 = vadd.f32 %v3172_v5, %v568_v45  ;;  %v320_v44 = vld [vmem:[%s3160_s13 + $0x378] sm:$0xff]  ;;  %v321_v45 = vld [vmem:[%s3160_s13 + $0x380] sm:$0xff] }
  0xd9   : > { %v1834_v56 = vadd.f32 0.5, %v1578_v48  ;;  %v1580_v57 = vmul.f32 0.5, %v2598_v50  ;;  %2615 = vtanh.f32 %v1077_v49  ;;  %v2600_v61 = vpop.eup %2599  ;;  %v1078_v63 = vmul.f32 0.5, %v822_v52 }
  0xda   : > { %v1835_v62 = vadd.f32 0.5, %v1579_v51  ;;  %v1079_v0 = vmul.f32 0.5, %v823_v53  ;;  %v1080_v2 = vmul.f32 0.5, %v824_v54  ;;  %v2602_v4 = vpop.eup %2601  ;;  %v1581_v7 = vmul.f32 0.5, %v2600_v61  ;;  %v322_v54 = vld [vmem:[%s3160_s13 + $0x388] sm:$0xff] }
  0xdb   : > { %2090 = vst [vmem:[%s3245_s24 + $0x2b8] sm:$0xff] %v1834_v56  ;;  %v1836_v6 = vadd.f32 0.5, %v1580_v57  ;;  %v1081_v8 = vmul.f32 0.5, %v825_v58  ;;  %v569_v9 = vmul.f32 %v3167_v1, %v312_v55  ;;  %v1582_v10 = vmul.f32 0.5, %v2602_v4 }
  0xdc   : > { %2091 = vst [vmem:[%s3245_s24 + $0x2c0] sm:$0xff] %v1835_v62  ;;  %2617 = vtanh.f32 %v1078_v63  ;;  %v570_v11 = vmul.f32 %v3167_v1, %v313_v59  ;;  %v571_v12 = vmul.f32 %v3167_v1, %v314_v60  ;;  %v1837_v14 = vadd.f32 0.5, %v1581_v7  ;;  %v323_v59 = vld [vmem:[%s3160_s13 + $0x390] sm:$0xff]  ;;  %v324_v60 = vld [vmem:[%s3160_s13 + $0x398] sm:$0xff] }
  0xdd   : > { %v2604_v13 = vpop.eup %2603  ;;  %2092 = vst [vmem:[%s3245_s24 + $0x2c8] sm:$0xff] %v1836_v6  ;;  %2619 = vtanh.f32 %v1079_v0  ;;  %v826_v15 = vadd.f32 %v3172_v5, %v569_v9  ;;  %v572_v16 = vmul.f32 %v3167_v1, %v315_v3  ;;  %v1838_v18 = vadd.f32 0.5, %v1582_v10 }
  0xde   : > { %v1583_v19 = vmul.f32 0.5, %v2604_v13  ;;  %2621 = vtanh.f32 %v1080_v2  ;;  %v827_v20 = vadd.f32 %v3172_v5, %v570_v11  ;;  %2093 = vst [vmem:[%s3245_s24 + $0x2d0] sm:$0xff] %v1837_v14  ;;  %v828_v23 = vadd.f32 %v3172_v5, %v571_v12 }
  0xdf   : > { %v2606_v21 = vpop.eup %2605  ;;  %2623 = vtanh.f32 %v1081_v8  ;;  %v1082_v22 = vmul.f32 0.5, %v826_v15  ;;  %v829_v24 = vadd.f32 %v3172_v5, %v572_v16  ;;  %2094 = vst [vmem:[%s3245_s24 + $0x2d8] sm:$0xff] %v1838_v18  ;;  %v573_v29 = vmul.f32 %v3167_v1, %v316_v17 }
  0xe0   : > { %v2608_v25 = vpop.eup %2607  ;;  %v1839_v26 = vadd.f32 0.5, %v1583_v19  ;;  %v1584_v27 = vmul.f32 0.5, %v2606_v21  ;;  %v1083_v28 = vmul.f32 0.5, %v827_v20  ;;  %v1084_v34 = vmul.f32 0.5, %v828_v23 }
  0xe1   : > { %v2610_v32 = vpop.eup %2609  ;;  %v1585_v33 = vmul.f32 0.5, %v2608_v25  ;;  %2625 = vtanh.f32 %v1082_v22  ;;  %v1085_v35 = vmul.f32 0.5, %v829_v24  ;;  %v830_v38 = vadd.f32 %v3172_v5, %v573_v29  ;;  %v325_v24 = vld [vmem:[%s3160_s13 + $0x3a0] sm:$0xff]  ;;  %v327_v29 = vld [vmem:[%s3160_s13 + $0x3b0] sm:$0xff] }
  0xe2   : > { %2095 = vst [vmem:[%s3245_s24 + $0x2e0] sm:$0xff] %v1839_v26  ;;  %v1840_v36 = vadd.f32 0.5, %v1584_v27  ;;  %v1586_v37 = vmul.f32 0.5, %v2610_v32  ;;  %2627 = vtanh.f32 %v1083_v28  ;;  %v2612_v40 = vpop.eup %2611  ;;  %v574_v42 = vmul.f32 %v3167_v1, %v317_v30  ;;  %v326_v28 = vld [vmem:[%s3160_s13 + $0x3a8] sm:$0xff] }
  0xe3   : > { %v1841_v41 = vadd.f32 0.5, %v1585_v33  ;;  %2629 = vtanh.f32 %v1084_v34  ;;  %v575_v43 = vmul.f32 %v3167_v1, %v318_v31  ;;  %v1587_v48 = vmul.f32 0.5, %v2612_v40 }
  0xe4   : > { %v2614_v46 = vpop.eup %2613  ;;  %2096 = vst [vmem:[%s3245_s24 + $0x2e8] sm:$0xff] %v1840_v36  ;;  %v1842_v47 = vadd.f32 0.5, %v1586_v37  ;;  %2631 = vtanh.f32 %v1085_v35  ;;  %v1086_v49 = vmul.f32 0.5, %v830_v38  ;;  %v831_v51 = vadd.f32 %v3172_v5, %v574_v42  ;;  %v328_v42 = vld [vmem:[%s3160_s13 + $0x3b8] sm:$0xff] }
  0xe5   : > { %2097 = vst [vmem:[%s3245_s24 + $0x2f0] sm:$0xff] %v1841_v41  ;;  %v1588_v50 = vmul.f32 0.5, %v2614_v46  ;;  %v832_v52 = vadd.f32 %v3172_v5, %v575_v43  ;;  %v576_v53 = vmul.f32 %v3167_v1, %v319_v39  ;;  %v1843_v56 = vadd.f32 0.5, %v1587_v48  ;;  %v329_v43 = vld [vmem:[%s3160_s13 + $0x3c0] sm:$0xff] }
  0xe6   : > { %v2616_v55 = vpop.eup %2615  ;;  %2098 = vst [vmem:[%s3245_s24 + $0x2f8] sm:$0xff] %v1842_v47  ;;  %2633 = vtanh.f32 %v1086_v49  ;;  %v577_v57 = vmul.f32 %v3167_v1, %v320_v44  ;;  %v578_v58 = vmul.f32 %v3167_v1, %v321_v45  ;;  %v1087_v63 = vmul.f32 0.5, %v831_v51 }
  0xe7   : > { %v1844_v61 = vadd.f32 0.5, %v1588_v50  ;;  %v1589_v62 = vmul.f32 0.5, %v2616_v55  ;;  %v1088_v0 = vmul.f32 0.5, %v832_v52  ;;  %2099 = vst [vmem:[%s3245_s24 + $0x300] sm:$0xff] %v1843_v56  ;;  %v833_v2 = vadd.f32 %v3172_v5, %v576_v53  ;;  %v330_v52 = vld [vmem:[%s3160_s13 + $0x3c8] sm:$0xff] }
  0xe8   : > { %v834_v3 = vadd.f32 %v3172_v5, %v577_v57  ;;  %v835_v4 = vadd.f32 %v3172_v5, %v578_v58  ;;  %v579_v6 = vmul.f32 %v3167_v1, %v322_v54  ;;  %2635 = vtanh.f32 %v1087_v63  ;;  %v331_v58 = vld [vmem:[%s3160_s13 + $0x3d0] sm:$0xff] }
  0xe9   : > { %v2618_v7 = vpop.eup %2617  ;;  %2100 = vst [vmem:[%s3245_s24 + $0x308] sm:$0xff] %v1844_v61  ;;  %v1845_v8 = vadd.f32 0.5, %v1589_v62  ;;  %v580_v9 = vmul.f32 %v3167_v1, %v323_v59  ;;  %v581_v10 = vmul.f32 %v3167_v1, %v324_v60  ;;  %2637 = vtanh.f32 %v1088_v0  ;;  %v332_v59 = vld [vmem:[%s3160_s13 + $0x3d8] sm:$0xff] }
  0xea   : > { %v2620_v11 = vpop.eup %2619  ;;  %v1590_v12 = vmul.f32 0.5, %v2618_v7  ;;  %v1089_v13 = vmul.f32 0.5, %v833_v2  ;;  %v1090_v14 = vmul.f32 0.5, %v834_v3  ;;  %v1091_v17 = vmul.f32 0.5, %v835_v4 }
  0xeb   : > { %v2622_v15 = vpop.eup %2621  ;;  %2101 = vst [vmem:[%s3245_s24 + $0x310] sm:$0xff] %v1845_v8  ;;  %v1591_v16 = vmul.f32 0.5, %v2620_v11  ;;  %v836_v18 = vadd.f32 %v3172_v5, %v579_v6  ;;  %v837_v19 = vadd.f32 %v3172_v5, %v580_v9  ;;  %v838_v23 = vadd.f32 %v3172_v5, %v581_v10  ;;  %v333_v9 = vld [vmem:[%s3160_s13 + $0x3e0] sm:$0xff]  ;;  %v334_v10 = vld [vmem:[%s3160_s13 + $0x3e8] sm:$0xff] }
  0xec   : > { %v2624_v20 = vpop.eup %2623  ;;  %v1846_v21 = vadd.f32 0.5, %v1590_v12  ;;  %v1592_v22 = vmul.f32 0.5, %v2622_v15  ;;  %2639 = vtanh.f32 %v1089_v13  ;;  %v582_v37 = vmul.f32 %v3167_v1, %v325_v24 }
  0xed   : > { %v1847_v25 = vadd.f32 0.5, %v1591_v16  ;;  %v1593_v26 = vmul.f32 0.5, %v2624_v20  ;;  %2641 = vtanh.f32 %v1090_v14  ;;  %v1092_v27 = vmul.f32 0.5, %v836_v18 }
  0xee   : > { %v2626_v30 = vpop.eup %2625  ;;  %2102 = vst [vmem:[%s3245_s24 + $0x318] sm:$0xff] %v1846_v21  ;;  %v1848_v31 = vadd.f32 0.5, %v1592_v22  ;;  %2643 = vtanh.f32 %v1091_v17  ;;  %v1093_v32 = vmul.f32 0.5, %v837_v19  ;;  %v1094_v33 = vmul.f32 0.5, %v838_v23 }
  0xef   : > { %v2628_v34 = vpop.eup %2627  ;;  %2103 = vst [vmem:[%s3245_s24 + $0x320] sm:$0xff] %v1847_v25  ;;  %v1849_v35 = vadd.f32 0.5, %v1593_v26  ;;  %v1594_v36 = vmul.f32 0.5, %v2626_v30  ;;  %2645 = vtanh.f32 %v1092_v27  ;;  %v583_v40 = vmul.f32 %v3167_v1, %v326_v28 }
  0xf0   : > { %v2630_v38 = vpop.eup %2629  ;;  %2104 = vst [vmem:[%s3245_s24 + $0x328] sm:$0xff] %v1848_v31  ;;  %v1595_v39 = vmul.f32 0.5, %v2628_v34  ;;  %2647 = vtanh.f32 %v1093_v32  ;;  %v584_v41 = vmul.f32 %v3167_v1, %v327_v29  ;;  %v839_v47 = vadd.f32 %v3172_v5, %v582_v37 }
  0xf1   : > { %v2632_v44 = vpop.eup %2631  ;;  %2105 = vst [vmem:[%s3245_s24 + $0x330] sm:$0xff] %v1849_v35  ;;  %v1850_v45 = vadd.f32 0.5, %v1594_v36  ;;  %v1596_v46 = vmul.f32 0.5, %v2630_v38  ;;  %2649 = vtanh.f32 %v1094_v33  ;;  %v840_v50 = vadd.f32 %v3172_v5, %v583_v40  ;;  %v335_v36 = vld [vmem:[%s3160_s13 + $0x3f0] sm:$0xff] }
  0xf2   : > { %v1851_v48 = vadd.f32 0.5, %v1595_v39  ;;  %v1597_v49 = vmul.f32 0.5, %v2632_v44  ;;  %v841_v51 = vadd.f32 %v3172_v5, %v584_v41  ;;  %v1095_v55 = vmul.f32 0.5, %v839_v47  ;;  %v336_v41 = vld [vmem:[%s3160_s13 + $0x3f8] sm:$0xff]  ;;  %v338_v47 = vld [vmem:[%s3160_s13 + $0x408] sm:$0xff] }
  0xf3   : > { %v2634_v53 = vpop.eup %2633  ;;  %2106 = vst [vmem:[%s3245_s24 + $0x338] sm:$0xff] %v1850_v45  ;;  %v1852_v54 = vadd.f32 0.5, %v1596_v46  ;;  %v585_v56 = vmul.f32 %v3167_v1, %v328_v42  ;;  %v586_v57 = vmul.f32 %v3167_v1, %v329_v43  ;;  %v1096_v62 = vmul.f32 0.5, %v840_v50  ;;  %v337_v42 = vld [vmem:[%s3160_s13 + $0x400] sm:$0xff] }
  0xf4   : > { %2107 = vst [vmem:[%s3245_s24 + $0x340] sm:$0xff] %v1851_v48  ;;  %v1853_v60 = vadd.f32 0.5, %v1597_v49  ;;  %v1598_v61 = vmul.f32 0.5, %v2634_v53  ;;  %v1097_v63 = vmul.f32 0.5, %v841_v51  ;;  %2651 = vtanh.f32 %v1095_v55  ;;  %v339_v48 = vld [vmem:[%s3160_s13 + $0x410] sm:$0xff]  ;;  %v341_v53 = vld [vmem:[%s3160_s13 + $0x420] sm:$0xff] }
  0xf5   : > { %2108 = vst [vmem:[%s3245_s24 + $0x348] sm:$0xff] %v1852_v54  ;;  %v842_v0 = vadd.f32 %v3172_v5, %v585_v56  ;;  %v843_v2 = vadd.f32 %v3172_v5, %v586_v57  ;;  %v587_v3 = vmul.f32 %v3167_v1, %v330_v52  ;;  %v2636_v4 = vpop.eup %2635  ;;  %2653 = vtanh.f32 %v1096_v62  ;;  %v340_v52 = vld [vmem:[%s3160_s13 + $0x418] sm:$0xff] }
  0xf6   : > { %2109 = vst [vmem:[%s3245_s24 + $0x350] sm:$0xff] %v1853_v60  ;;  %v1854_v6 = vadd.f32 0.5, %v1598_v61  ;;  %v588_v7 = vmul.f32 %v3167_v1, %v331_v58  ;;  %v589_v8 = vmul.f32 %v3167_v1, %v332_v59  ;;  %v2638_v11 = vpop.eup %2637  ;;  %v1599_v12 = vmul.f32 0.5, %v2636_v4 }
  0xf7   : > { %2655 = vtanh.f32 %v1097_v63  ;;  %v1098_v13 = vmul.f32 0.5, %v842_v0  ;;  %v1099_v14 = vmul.f32 0.5, %v843_v2  ;;  %v1600_v15 = vmul.f32 0.5, %v2638_v11 }
  0xf8   : > { %2110 = vst [vmem:[%s3245_s24 + $0x358] sm:$0xff] %v1854_v6  ;;  %v844_v16 = vadd.f32 %v3172_v5, %v587_v3  ;;  %v845_v17 = vadd.f32 %v3172_v5, %v588_v7  ;;  %v846_v18 = vadd.f32 %v3172_v5, %v589_v8  ;;  %v1855_v20 = vadd.f32 0.5, %v1599_v12 }
  0xf9   : > { %v2640_v19 = vpop.eup %2639  ;;  %2657 = vtanh.f32 %v1098_v13  ;;  %v590_v21 = vmul.f32 %v3167_v1, %v333_v9  ;;  %v591_v22 = vmul.f32 %v3167_v1, %v334_v10  ;;  %v1856_v24 = vadd.f32 0.5, %v1600_v15 }
  0xfa   : > { %v2642_v23 = vpop.eup %2641  ;;  %v1601_v25 = vmul.f32 0.5, %v2640_v19  ;;  %2659 = vtanh.f32 %v1099_v14  ;;  %v1100_v26 = vmul.f32 0.5, %v844_v16  ;;  %2111 = vst [vmem:[%s3245_s24 + $0x360] sm:$0xff] %v1855_v20  ;;  %v1101_v29 = vmul.f32 0.5, %v845_v17  ;;  %v342_v17 = vld [vmem:[%s3160_s13 + $0x428] sm:$0xff] }
  0xfb   : > { %v2644_v27 = vpop.eup %2643  ;;  %v1602_v28 = vmul.f32 0.5, %v2642_v23  ;;  %v1102_v30 = vmul.f32 0.5, %v846_v18  ;;  %v847_v31 = vadd.f32 %v3172_v5, %v590_v21  ;;  %2112 = vst [vmem:[%s3245_s24 + $0x368] sm:$0xff] %v1856_v24  ;;  %v848_v35 = vadd.f32 %v3172_v5, %v591_v22  ;;  %v343_v18 = vld [vmem:[%s3160_s13 + $0x430] sm:$0xff]  ;;  %v344_v23 = vld [vmem:[%s3160_s13 + $0x438] sm:$0xff] }
  0xfc   : > { %v2646_v32 = vpop.eup %2645  ;;  %v1857_v33 = vadd.f32 0.5, %v1601_v25  ;;  %v1603_v34 = vmul.f32 0.5, %v2644_v27  ;;  %2661 = vtanh.f32 %v1100_v26  ;;  %v592_v51 = vmul.f32 %v3167_v1, %v335_v36 }
  0xfd   : > { %v2648_v37 = vpop.eup %2647  ;;  %v1858_v38 = vadd.f32 0.5, %v1602_v28  ;;  %v1604_v39 = vmul.f32 0.5, %v2646_v32  ;;  %2663 = vtanh.f32 %v1101_v29  ;;  %v1103_v40 = vmul.f32 0.5, %v847_v31 }
  0xfe   : > { %v2650_v43 = vpop.eup %2649  ;;  %2113 = vst [vmem:[%s3245_s24 + $0x370] sm:$0xff] %v1857_v33  ;;  %v1859_v44 = vadd.f32 0.5, %v1603_v34  ;;  %v1605_v45 = vmul.f32 0.5, %v2648_v37  ;;  %2665 = vtanh.f32 %v1102_v30  ;;  %v1104_v46 = vmul.f32 0.5, %v848_v35  ;;  %v345_v35 = vld [vmem:[%s3160_s13 + $0x440] sm:$0xff] }
  0xff   : > { %2114 = vst [vmem:[%s3245_s24 + $0x378] sm:$0xff] %v1858_v38  ;;  %v1860_v49 = vadd.f32 0.5, %v1604_v39  ;;  %v1606_v50 = vmul.f32 0.5, %v2650_v43  ;;  %2667 = vtanh.f32 %v1103_v40  ;;  %v593_v55 = vmul.f32 %v3167_v1, %v336_v41 }
 0x100   : > { %2115 = vst [vmem:[%s3245_s24 + $0x380] sm:$0xff] %v1859_v44  ;;  %v1861_v54 = vadd.f32 0.5, %v1605_v45  ;;  %2669 = vtanh.f32 %v1104_v46  ;;  %v594_v56 = vmul.f32 %v3167_v1, %v337_v42  ;;  %v849_v58 = vadd.f32 %v3172_v5, %v592_v51 }
 0x101   : > { %2116 = vst [vmem:[%s3245_s24 + $0x388] sm:$0xff] %v1860_v49  ;;  %v1862_v57 = vadd.f32 0.5, %v1606_v50  ;;  %v595_v59 = vmul.f32 %v3167_v1, %v338_v47  ;;  %v596_v60 = vmul.f32 %v3167_v1, %v339_v48  ;;  %v2652_v61 = vpop.eup %2651  ;;  %v850_v62 = vadd.f32 %v3172_v5, %v593_v55  ;;  %v346_v49 = vld [vmem:[%s3160_s13 + $0x448] sm:$0xff]  ;;  %v347_v50 = vld [vmem:[%s3160_s13 + $0x450] sm:$0xff] }
 0x102   : > { %2117 = vst [vmem:[%s3245_s24 + $0x390] sm:$0xff] %v1861_v54  ;;  %v851_v63 = vadd.f32 %v3172_v5, %v594_v56  ;;  %v597_v0 = vmul.f32 %v3167_v1, %v340_v52  ;;  %v598_v2 = vmul.f32 %v3167_v1, %v341_v53  ;;  %v2654_v3 = vpop.eup %2653  ;;  %v1607_v4 = vmul.f32 0.5, %v2652_v61  ;;  %v348_v56 = vld [vmem:[%s3160_s13 + $0x458] sm:$0xff]  ;;  %v350_v61 = vld [vmem:[%s3160_s13 + $0x468] sm:$0xff] }
 0x103   : > { %2118 = vst [vmem:[%s3245_s24 + $0x398] sm:$0xff] %v1862_v57  ;;  %v1105_v6 = vmul.f32 0.5, %v849_v58  ;;  %v852_v7 = vadd.f32 %v3172_v5, %v595_v59  ;;  %v853_v8 = vadd.f32 %v3172_v5, %v596_v60  ;;  %v1608_v10 = vmul.f32 0.5, %v2654_v3  ;;  %v349_v60 = vld [vmem:[%s3160_s13 + $0x460] sm:$0xff]  ;;  %v352_v3 = vld [vmem:[%s3160_s13 + $0x478] sm:$0xff] }
 0x104   : > { %v2656_v9 = vpop.eup %2655  ;;  %v1106_v11 = vmul.f32 0.5, %v850_v62  ;;  %v1107_v12 = vmul.f32 0.5, %v851_v63  ;;  %v854_v13 = vadd.f32 %v3172_v5, %v597_v0  ;;  %v1863_v14 = vadd.f32 0.5, %v1607_v4 }
 0x105   : > { %v1609_v15 = vmul.f32 0.5, %v2656_v9  ;;  %2671 = vtanh.f32 %v1105_v6  ;;  %v1108_v16 = vmul.f32 0.5, %v852_v7  ;;  %v1864_v20 = vadd.f32 0.5, %v1608_v10 }
 0x106   : > { %v2658_v19 = vpop.eup %2657  ;;  %2673 = vtanh.f32 %v1106_v11  ;;  %v1109_v21 = vmul.f32 0.5, %v853_v8  ;;  %v1110_v22 = vmul.f32 0.5, %v854_v13  ;;  %2119 = vst [vmem:[%s3245_s24 + $0x3a0] sm:$0xff] %v1863_v14  ;;  %v855_v27 = vadd.f32 %v3172_v5, %v598_v2  ;;  %v351_v2 = vld [vmem:[%s3160_s13 + $0x470] sm:$0xff] }
 0x107   : > { %v2660_v24 = vpop.eup %2659  ;;  %v1865_v25 = vadd.f32 0.5, %v1609_v15  ;;  %v1610_v26 = vmul.f32 0.5, %v2658_v19  ;;  %2675 = vtanh.f32 %v1107_v12  ;;  %2120 = vst [vmem:[%s3245_s24 + $0x3a8] sm:$0xff] %v1864_v20  ;;  %v599_v29 = vmul.f32 %v3167_v1, %v342_v17 }
 0x108   : > { %v1611_v28 = vmul.f32 0.5, %v2660_v24  ;;  %2677 = vtanh.f32 %v1108_v16  ;;  %v600_v30 = vmul.f32 %v3167_v1, %v343_v18  ;;  %v1111_v33 = vmul.f32 0.5, %v855_v27 }
 0x109   : > { %v2662_v31 = vpop.eup %2661  ;;  %2121 = vst [vmem:[%s3245_s24 + $0x3b0] sm:$0xff] %v1865_v25  ;;  %v1866_v32 = vadd.f32 0.5, %v1610_v26  ;;  %2679 = vtanh.f32 %v1109_v21  ;;  %v601_v34 = vmul.f32 %v3167_v1, %v344_v23  ;;  %v856_v39 = vadd.f32 %v3172_v5, %v599_v29 }
 0x10a   : > { %v2664_v36 = vpop.eup %2663  ;;  %v1867_v37 = vadd.f32 0.5, %v1611_v28  ;;  %v1612_v38 = vmul.f32 0.5, %v2662_v31  ;;  %2681 = vtanh.f32 %v1110_v22  ;;  %v857_v42 = vadd.f32 %v3172_v5, %v600_v30 }
 0x10b   : > { %v2666_v40 = vpop.eup %2665  ;;  %2122 = vst [vmem:[%s3245_s24 + $0x3b8] sm:$0xff] %v1866_v32  ;;  %v1613_v41 = vmul.f32 0.5, %v2664_v36  ;;  %2683 = vtanh.f32 %v1111_v33  ;;  %v858_v43 = vadd.f32 %v3172_v5, %v601_v34  ;;  %v1112_v47 = vmul.f32 0.5, %v856_v39  ;;  %v353_v34 = vld [vmem:[%s3160_s13 + $0x480] sm:$0xff]  ;;  %v354_v39 = vld [vmem:[%s3160_s13 + $0x488] sm:$0xff] }
 0x10c   : > { %v2668_v44 = vpop.eup %2667  ;;  %2123 = vst [vmem:[%s3245_s24 + $0x3c0] sm:$0xff] %v1867_v37  ;;  %v1868_v45 = vadd.f32 0.5, %v1612_v38  ;;  %v1614_v46 = vmul.f32 0.5, %v2666_v40  ;;  %v602_v48 = vmul.f32 %v3167_v1, %v345_v35  ;;  %v1113_v54 = vmul.f32 0.5, %v857_v42 }
 0x10d   : > { %v2670_v51 = vpop.eup %2669  ;;  %v1869_v52 = vadd.f32 0.5, %v1613_v41  ;;  %v1615_v53 = vmul.f32 0.5, %v2668_v44  ;;  %v1114_v55 = vmul.f32 0.5, %v858_v43  ;;  %2685 = vtanh.f32 %v1112_v47  ;;  %v355_v44 = vld [vmem:[%s3160_s13 + $0x490] sm:$0xff] }
 0x10e   : > { %2124 = vst [vmem:[%s3245_s24 + $0x3c8] sm:$0xff] %v1868_v45  ;;  %v1870_v57 = vadd.f32 0.5, %v1614_v46  ;;  %v1616_v58 = vmul.f32 0.5, %v2670_v51  ;;  %v859_v59 = vadd.f32 %v3172_v5, %v602_v48  ;;  %2687 = vtanh.f32 %v1113_v54  ;;  %v356_v45 = vld [vmem:[%s3160_s13 + $0x498] sm:$0xff] }
 0x10f   : > { %2125 = vst [vmem:[%s3245_s24 + $0x3d0] sm:$0xff] %v1869_v52  ;;  %v1871_v62 = vadd.f32 0.5, %v1615_v53  ;;  %v603_v63 = vmul.f32 %v3167_v1, %v346_v49  ;;  %v604_v0 = vmul.f32 %v3167_v1, %v347_v50  ;;  %2689 = vtanh.f32 %v1114_v55  ;;  %v357_v49 = vld [vmem:[%s3160_s13 + $0x4a0] sm:$0xff] }
 0x110   : > { %2126 = vst [vmem:[%s3245_s24 + $0x3d8] sm:$0xff] %v1870_v57  ;;  %v1872_v4 = vadd.f32 0.5, %v1616_v58  ;;  %v1115_v6 = vmul.f32 0.5, %v859_v59  ;;  %v605_v7 = vmul.f32 %v3167_v1, %v348_v56  ;;  %v606_v10 = vmul.f32 %v3167_v1, %v349_v60 }
 0x111   : > { %2127 = vst [vmem:[%s3245_s24 + $0x3e0] sm:$0xff] %v1871_v62  ;;  %v860_v8 = vadd.f32 %v3172_v5, %v603_v63  ;;  %v861_v9 = vadd.f32 %v3172_v5, %v604_v0  ;;  %v607_v11 = vmul.f32 %v3167_v1, %v350_v61  ;;  %v608_v14 = vmul.f32 %v3167_v1, %v351_v2 }
 0x112   : > { %v2672_v12 = vpop.eup %2671  ;;  %2128 = vst [vmem:[%s3245_s24 + $0x3e8] sm:$0xff] %v1872_v4  ;;  %2691 = vtanh.f32 %v1115_v6  ;;  %v862_v13 = vadd.f32 %v3172_v5, %v605_v7  ;;  %v609_v15 = vmul.f32 %v3167_v1, %v352_v3  ;;  %v863_v20 = vadd.f32 %v3172_v5, %v606_v10  ;;  %v359_v10 = vld [vmem:[%s3160_s13 + $0x4b0] sm:$0xff] }
 0x113   : > { %v2674_v16 = vpop.eup %2673  ;;  %v1617_v17 = vmul.f32 0.5, %v2672_v12  ;;  %v1116_v18 = vmul.f32 0.5, %v860_v8  ;;  %v1117_v19 = vmul.f32 0.5, %v861_v9  ;;  %v864_v24 = vadd.f32 %v3172_v5, %v607_v11  ;;  %v358_v9 = vld [vmem:[%s3160_s13 + $0x4a8] sm:$0xff]  ;;  %v360_v11 = vld [vmem:[%s3160_s13 + $0x4b8] sm:$0xff] }
 0x114   : > { %v2676_v21 = vpop.eup %2675  ;;  %v1618_v22 = vmul.f32 0.5, %v2674_v16  ;;  %v1118_v23 = vmul.f32 0.5, %v862_v13  ;;  %v865_v25 = vadd.f32 %v3172_v5, %v608_v14  ;;  %v1119_v29 = vmul.f32 0.5, %v863_v20  ;;  %v361_v16 = vld [vmem:[%s3160_s13 + $0x4c0] sm:$0xff] }
 0x115   : > { %v2678_v26 = vpop.eup %2677  ;;  %v1873_v27 = vadd.f32 0.5, %v1617_v17  ;;  %v1619_v28 = vmul.f32 0.5, %v2676_v21  ;;  %2693 = vtanh.f32 %v1116_v18  ;;  %v1120_v33 = vmul.f32 0.5, %v864_v24  ;;  %v362_v17 = vld [vmem:[%s3160_s13 + $0x4c8] sm:$0xff] }
 0x116   : > { %v2680_v30 = vpop.eup %2679  ;;  %v1874_v31 = vadd.f32 0.5, %v1618_v22  ;;  %v1620_v32 = vmul.f32 0.5, %v2678_v26  ;;  %2695 = vtanh.f32 %v1117_v19  ;;  %v1121_v38 = vmul.f32 0.5, %v865_v25 }
 0x117   : > { %v2682_v35 = vpop.eup %2681  ;;  %2129 = vst [vmem:[%s3245_s24 + $0x3f0] sm:$0xff] %v1873_v27  ;;  %v1875_v36 = vadd.f32 0.5, %v1619_v28  ;;  %v1621_v37 = vmul.f32 0.5, %v2680_v30  ;;  %2697 = vtanh.f32 %v1118_v23  ;;  %v866_v43 = vadd.f32 %v3172_v5, %v609_v15 }
 0x118   : > { %v2684_v40 = vpop.eup %2683  ;;  %2130 = vst [vmem:[%s3245_s24 + $0x3f8] sm:$0xff] %v1874_v31  ;;  %v1876_v41 = vadd.f32 0.5, %v1620_v32  ;;  %v1622_v42 = vmul.f32 0.5, %v2682_v35  ;;  %2699 = vtanh.f32 %v1119_v29  ;;  %v610_v48 = vmul.f32 %v3167_v1, %v353_v34 }
 0x119   : > { %2131 = vst [vmem:[%s3245_s24 + $0x400] sm:$0xff] %v1875_v36  ;;  %v1877_v46 = vadd.f32 0.5, %v1621_v37  ;;  %v1623_v47 = vmul.f32 0.5, %v2684_v40  ;;  %2701 = vtanh.f32 %v1120_v33  ;;  %v1122_v51 = vmul.f32 0.5, %v866_v43 }
 0x11a   : > { %2132 = vst [vmem:[%s3245_s24 + $0x408] sm:$0xff] %v1876_v41  ;;  %v1878_v50 = vadd.f32 0.5, %v1622_v42  ;;  %2703 = vtanh.f32 %v1121_v38  ;;  %v611_v52 = vmul.f32 %v3167_v1, %v354_v39  ;;  %v2686_v53 = vpop.eup %2685  ;;  %v867_v55 = vadd.f32 %v3172_v5, %v610_v48  ;;  %v363_v42 = vld [vmem:[%s3160_s13 + $0x4d0] sm:$0xff]  ;;  %v364_v48 = vld [vmem:[%s3160_s13 + $0x4d8] sm:$0xff] }
 0x11b   : > { %2133 = vst [vmem:[%s3245_s24 + $0x410] sm:$0xff] %v1877_v46  ;;  %v1879_v54 = vadd.f32 0.5, %v1623_v47  ;;  %v612_v56 = vmul.f32 %v3167_v1, %v355_v44  ;;  %v613_v57 = vmul.f32 %v3167_v1, %v356_v45  ;;  %v2688_v58 = vpop.eup %2687  ;;  %v1624_v59 = vmul.f32 0.5, %v2686_v53 }
 0x11c   : > { %2134 = vst [vmem:[%s3245_s24 + $0x418] sm:$0xff] %v1878_v50  ;;  %2705 = vtanh.f32 %v1122_v51  ;;  %v868_v60 = vadd.f32 %v3172_v5, %v611_v52  ;;  %v614_v61 = vmul.f32 %v3167_v1, %v357_v49  ;;  %v2690_v62 = vpop.eup %2689  ;;  %v1625_v63 = vmul.f32 0.5, %v2688_v58  ;;  %v365_v49 = vld [vmem:[%s3160_s13 + $0x4e0] sm:$0xff] }
 0x11d   : > { %2135 = vst [vmem:[%s3245_s24 + $0x420] sm:$0xff] %v1879_v54  ;;  %v1123_v0 = vmul.f32 0.5, %v867_v55  ;;  %v869_v2 = vadd.f32 %v3172_v5, %v612_v56  ;;  %v870_v3 = vadd.f32 %v3172_v5, %v613_v57  ;;  %v1880_v4 = vadd.f32 0.5, %v1624_v59  ;;  %v366_v57 = vld [vmem:[%s3160_s13 + $0x4e8] sm:$0xff] }
 0x11e   : > { %v1626_v6 = vmul.f32 0.5, %v2690_v62  ;;  %v1124_v7 = vmul.f32 0.5, %v868_v60  ;;  %v871_v8 = vadd.f32 %v3172_v5, %v614_v61  ;;  %v1881_v13 = vadd.f32 0.5, %v1625_v63  ;;  %v367_v62 = vld [vmem:[%s3160_s13 + $0x4f0] sm:$0xff]  ;;  %v368_v63 = vld [vmem:[%s3160_s13 + $0x4f8] sm:$0xff] }
 0x11f   : > { %v2692_v12 = vpop.eup %2691  ;;  %2707 = vtanh.f32 %v1123_v0  ;;  %v1125_v14 = vmul.f32 0.5, %v869_v2  ;;  %v1126_v15 = vmul.f32 0.5, %v870_v3  ;;  %2136 = vst [vmem:[%s3245_s24 + $0x428] sm:$0xff] %v1880_v4  ;;  %v615_v21 = vmul.f32 %v3167_v1, %v358_v9 }
 0x120   : > { %v1882_v18 = vadd.f32 0.5, %v1626_v6  ;;  %v1627_v19 = vmul.f32 0.5, %v2692_v12  ;;  %2709 = vtanh.f32 %v1124_v7  ;;  %v1127_v20 = vmul.f32 0.5, %v871_v8  ;;  %2137 = vst [vmem:[%s3245_s24 + $0x430] sm:$0xff] %v1881_v13 }
 0x121   : > { %2711 = vtanh.f32 %v1125_v14  ;;  %v616_v22 = vmul.f32 %v3167_v1, %v359_v10  ;;  %v617_v23 = vmul.f32 %v3167_v1, %v360_v11  ;;  %v618_v26 = vmul.f32 %v3167_v1, %v361_v16 }
 0x122   : > { %v2694_v24 = vpop.eup %2693  ;;  %2138 = vst [vmem:[%s3245_s24 + $0x438] sm:$0xff] %v1882_v18  ;;  %v1883_v25 = vadd.f32 0.5, %v1627_v19  ;;  %2713 = vtanh.f32 %v1126_v15  ;;  %v619_v27 = vmul.f32 %v3167_v1, %v362_v17  ;;  %v872_v30 = vadd.f32 %v3172_v5, %v615_v21 }
 0x123   : > { %v2696_v28 = vpop.eup %2695  ;;  %v1628_v29 = vmul.f32 0.5, %v2694_v24  ;;  %2715 = vtanh.f32 %v1127_v20  ;;  %v873_v31 = vadd.f32 %v3172_v5, %v616_v22  ;;  %v874_v34 = vadd.f32 %v3172_v5, %v617_v23 }
 0x124   : > { %v2698_v32 = vpop.eup %2697  ;;  %2139 = vst [vmem:[%s3245_s24 + $0x440] sm:$0xff] %v1883_v25  ;;  %v1629_v33 = vmul.f32 0.5, %v2696_v28  ;;  %v875_v35 = vadd.f32 %v3172_v5, %v618_v26  ;;  %v876_v36 = vadd.f32 %v3172_v5, %v619_v27  ;;  %v1128_v40 = vmul.f32 0.5, %v872_v30  ;;  %v369_v26 = vld [vmem:[%s3160_s13 + $0x500] sm:$0xff]  ;;  %v370_v27 = vld [vmem:[%s3160_s13 + $0x508] sm:$0xff] }
 0x125   : > { %v2700_v37 = vpop.eup %2699  ;;  %v1884_v38 = vadd.f32 0.5, %v1628_v29  ;;  %v1630_v39 = vmul.f32 0.5, %v2698_v32  ;;  %v1129_v41 = vmul.f32 0.5, %v873_v31  ;;  %v1130_v46 = vmul.f32 0.5, %v874_v34  ;;  %v371_v32 = vld [vmem:[%s3160_s13 + $0x510] sm:$0xff] }
 0x126   : > { %v2702_v43 = vpop.eup %2701  ;;  %v1885_v44 = vadd.f32 0.5, %v1629_v33  ;;  %v1631_v45 = vmul.f32 0.5, %v2700_v37  ;;  %v1131_v47 = vmul.f32 0.5, %v875_v35  ;;  %2717 = vtanh.f32 %v1128_v40  ;;  %v372_v33 = vld [vmem:[%s3160_s13 + $0x518] sm:$0xff]  ;;  %v373_v37 = vld [vmem:[%s3160_s13 + $0x520] sm:$0xff] }
 0x127   : > { %v2704_v50 = vpop.eup %2703  ;;  %2140 = vst [vmem:[%s3245_s24 + $0x448] sm:$0xff] %v1884_v38  ;;  %v1886_v51 = vadd.f32 0.5, %v1630_v39  ;;  %v1632_v52 = vmul.f32 0.5, %v2702_v43  ;;  %v1132_v53 = vmul.f32 0.5, %v876_v36  ;;  %2719 = vtanh.f32 %v1129_v41  ;;  %v374_v38 = vld [vmem:[%s3160_s13 + $0x528] sm:$0xff] }
 0x128   : > { %2141 = vst [vmem:[%s3245_s24 + $0x450] sm:$0xff] %v1885_v44  ;;  %v1887_v54 = vadd.f32 0.5, %v1631_v45  ;;  %v1633_v55 = vmul.f32 0.5, %v2704_v50  ;;  %v620_v56 = vmul.f32 %v3167_v1, %v363_v42  ;;  %2721 = vtanh.f32 %v1130_v46  ;;  %v375_v42 = vld [vmem:[%s3160_s13 + $0x530] sm:$0xff] }
 0x129   : > { %v2706_v58 = vpop.eup %2705  ;;  %2142 = vst [vmem:[%s3245_s24 + $0x458] sm:$0xff] %v1886_v51  ;;  %v1888_v59 = vadd.f32 0.5, %v1632_v52  ;;  %v621_v60 = vmul.f32 %v3167_v1, %v364_v48  ;;  %v622_v61 = vmul.f32 %v3167_v1, %v365_v49  ;;  %2723 = vtanh.f32 %v1131_v47 }
 0x12a   : > { %2143 = vst [vmem:[%s3245_s24 + $0x460] sm:$0xff] %v1887_v54  ;;  %v1889_v0 = vadd.f32 0.5, %v1633_v55  ;;  %v1634_v2 = vmul.f32 0.5, %v2706_v58  ;;  %v877_v3 = vadd.f32 %v3172_v5, %v620_v56  ;;  %2725 = vtanh.f32 %v1132_v53 }
 0x12b   : > { %2144 = vst [vmem:[%s3245_s24 + $0x468] sm:$0xff] %v1888_v59  ;;  %v878_v4 = vadd.f32 %v3172_v5, %v621_v60  ;;  %v879_v6 = vadd.f32 %v3172_v5, %v622_v61  ;;  %v623_v7 = vmul.f32 %v3167_v1, %v366_v57  ;;  %v624_v11 = vmul.f32 %v3167_v1, %v367_v62 }
 0x12c   : > { %v2708_v8 = vpop.eup %2707  ;;  %2145 = vst [vmem:[%s3245_s24 + $0x470] sm:$0xff] %v1889_v0  ;;  %v1890_v9 = vadd.f32 0.5, %v1634_v2  ;;  %v1133_v10 = vmul.f32 0.5, %v877_v3  ;;  %v625_v12 = vmul.f32 %v3167_v1, %v368_v63  ;;  %v626_v40 = vmul.f32 %v3167_v1, %v369_v26  ;;  %v376_v3 = vld [vmem:[%s3160_s13 + $0x538] sm:$0xff] }
 0x12d   : > { %v2710_v13 = vpop.eup %2709  ;;  %v1635_v14 = vmul.f32 0.5, %v2708_v8  ;;  %v1134_v15 = vmul.f32 0.5, %v878_v4  ;;  %v1135_v16 = vmul.f32 0.5, %v879_v6  ;;  %v880_v17 = vadd.f32 %v3172_v5, %v623_v7 }
 0x12e   : > { %v2712_v18 = vpop.eup %2711  ;;  %2146 = vst [vmem:[%s3245_s24 + $0x478] sm:$0xff] %v1890_v9  ;;  %v1636_v19 = vmul.f32 0.5, %v2710_v13  ;;  %2727 = vtanh.f32 %v1133_v10  ;;  %v881_v20 = vadd.f32 %v3172_v5, %v624_v11  ;;  %v882_v21 = vadd.f32 %v3172_v5, %v625_v12  ;;  %v377_v9 = vld [vmem:[%s3160_s13 + $0x540] sm:$0xff] }
 0x12f   : > { %v2714_v22 = vpop.eup %2713  ;;  %v1891_v23 = vadd.f32 0.5, %v1635_v14  ;;  %v1637_v24 = vmul.f32 0.5, %v2712_v18  ;;  %2729 = vtanh.f32 %v1134_v15  ;;  %v1136_v25 = vmul.f32 0.5, %v880_v17 }
 0x130   : > { %v2716_v28 = vpop.eup %2715  ;;  %v1892_v29 = vadd.f32 0.5, %v1636_v19  ;;  %v1638_v30 = vmul.f32 0.5, %v2714_v22  ;;  %2731 = vtanh.f32 %v1135_v16  ;;  %v1137_v31 = vmul.f32 0.5, %v881_v20  ;;  %v378_v16 = vld [vmem:[%s3160_s13 + $0x548] sm:$0xff] }
 0x131   : > { %2147 = vst [vmem:[%s3245_s24 + $0x480] sm:$0xff] %v1891_v23  ;;  %v1893_v34 = vadd.f32 0.5, %v1637_v24  ;;  %v1639_v35 = vmul.f32 0.5, %v2716_v28  ;;  %2733 = vtanh.f32 %v1136_v25  ;;  %v1138_v36 = vmul.f32 0.5, %v882_v21 }
 0x132   : > { %2148 = vst [vmem:[%s3245_s24 + $0x488] sm:$0xff] %v1892_v29  ;;  %v1894_v39 = vadd.f32 0.5, %v1638_v30  ;;  %2735 = vtanh.f32 %v1137_v31  ;;  %v627_v41 = vmul.f32 %v3167_v1, %v370_v27  ;;  %v628_v44 = vmul.f32 %v3167_v1, %v371_v32  ;;  %v379_v29 = vld [vmem:[%s3160_s13 + $0x550] sm:$0xff] }
 0x133   : > { %2149 = vst [vmem:[%s3245_s24 + $0x490] sm:$0xff] %v1893_v34  ;;  %v1895_v43 = vadd.f32 0.5, %v1639_v35  ;;  %2737 = vtanh.f32 %v1138_v36  ;;  %v629_v45 = vmul.f32 %v3167_v1, %v372_v33  ;;  %v2718_v46 = vpop.eup %2717  ;;  %v883_v47 = vadd.f32 %v3172_v5, %v626_v40  ;;  %v381_v40 = vld [vmem:[%s3160_s13 + $0x560] sm:$0xff] }
 0x134   : > { %2150 = vst [vmem:[%s3245_s24 + $0x498] sm:$0xff] %v1894_v39  ;;  %v884_v48 = vadd.f32 %v3172_v5, %v627_v41  ;;  %v630_v49 = vmul.f32 %v3167_v1, %v373_v37  ;;  %v631_v50 = vmul.f32 %v3167_v1, %v374_v38  ;;  %v2720_v51 = vpop.eup %2719  ;;  %v1640_v52 = vmul.f32 0.5, %v2718_v46  ;;  %v380_v39 = vld [vmem:[%s3160_s13 + $0x558] sm:$0xff]  ;;  %v383_v46 = vld [vmem:[%s3160_s13 + $0x570] sm:$0xff] }
 0x135   : > { %2151 = vst [vmem:[%s3245_s24 + $0x4a0] sm:$0xff] %v1895_v43  ;;  %v885_v53 = vadd.f32 %v3172_v5, %v628_v44  ;;  %v886_v54 = vadd.f32 %v3172_v5, %v629_v45  ;;  %v632_v55 = vmul.f32 %v3167_v1, %v375_v42  ;;  %v2722_v56 = vpop.eup %2721  ;;  %v1641_v57 = vmul.f32 0.5, %v2720_v51  ;;  %v382_v45 = vld [vmem:[%s3160_s13 + $0x568] sm:$0xff] }
 0x136   : > { %v1139_v58 = vmul.f32 0.5, %v883_v47  ;;  %v1140_v59 = vmul.f32 0.5, %v884_v48  ;;  %v887_v60 = vadd.f32 %v3172_v5, %v630_v49  ;;  %v2724_v61 = vpop.eup %2723  ;;  %v1896_v62 = vadd.f32 0.5, %v1640_v52 }
 0x137   : > { %v1642_v63 = vmul.f32 0.5, %v2722_v56  ;;  %v1141_v0 = vmul.f32 0.5, %v885_v53  ;;  %v1142_v2 = vmul.f32 0.5, %v886_v54  ;;  %v2726_v4 = vpop.eup %2725  ;;  %v1897_v6 = vadd.f32 0.5, %v1641_v57  ;;  %v386_v56 = vld [vmem:[%s3160_s13 + $0x588] sm:$0xff] }
 0x138   : > { %v1643_v7 = vmul.f32 0.5, %v2724_v61  ;;  %2739 = vtanh.f32 %v1139_v58  ;;  %v1143_v8 = vmul.f32 0.5, %v887_v60  ;;  %2152 = vst [vmem:[%s3245_s24 + $0x4a8] sm:$0xff] %v1896_v62  ;;  %v1644_v11 = vmul.f32 0.5, %v2726_v4 }
 0x139   : > { %v1898_v10 = vadd.f32 0.5, %v1642_v63  ;;  %2741 = vtanh.f32 %v1140_v59  ;;  %v888_v12 = vadd.f32 %v3172_v5, %v631_v50  ;;  %2153 = vst [vmem:[%s3245_s24 + $0x4b0] sm:$0xff] %v1897_v6  ;;  %v889_v14 = vadd.f32 %v3172_v5, %v632_v55  ;;  %v384_v50 = vld [vmem:[%s3160_s13 + $0x578] sm:$0xff]  ;;  %v385_v55 = vld [vmem:[%s3160_s13 + $0x580] sm:$0xff] }
 0x13a   : > { %v1899_v13 = vadd.f32 0.5, %v1643_v7  ;;  %2743 = vtanh.f32 %v1141_v0  ;;  %v633_v15 = vmul.f32 %v3167_v1, %v376_v3  ;;  %v1900_v18 = vadd.f32 0.5, %v1644_v11 }
 0x13b   : > { %v2728_v17 = vpop.eup %2727  ;;  %2154 = vst [vmem:[%s3245_s24 + $0x4b8] sm:$0xff] %v1898_v10  ;;  %2745 = vtanh.f32 %v1142_v2  ;;  %v1144_v19 = vmul.f32 0.5, %v888_v12  ;;  %v634_v20 = vmul.f32 %v3167_v1, %v377_v9  ;;  %v1145_v23 = vmul.f32 0.5, %v889_v14 }
 0x13c   : > { %v2730_v21 = vpop.eup %2729  ;;  %2155 = vst [vmem:[%s3245_s24 + $0x4c0] sm:$0xff] %v1899_v13  ;;  %v1645_v22 = vmul.f32 0.5, %v2728_v17  ;;  %2747 = vtanh.f32 %v1143_v8  ;;  %v890_v24 = vadd.f32 %v3172_v5, %v633_v15  ;;  %2156 = vst [vmem:[%s3245_s24 + $0x4c8] sm:$0xff] %v1900_v18  ;;  %v635_v28 = vmul.f32 %v3167_v1, %v378_v16 }
 0x13d   : > { %v2732_v25 = vpop.eup %2731  ;;  %v1646_v26 = vmul.f32 0.5, %v2730_v21  ;;  %2749 = vtanh.f32 %v1144_v19  ;;  %v891_v27 = vadd.f32 %v3172_v5, %v634_v20  ;;  %v636_v44 = vmul.f32 %v3167_v1, %v379_v29  ;;  %v388_v29 = vld [vmem:[%s3160_s13 + $0x598] sm:$0xff] }
 0x13e   : > { %v2734_v30 = vpop.eup %2733  ;;  %v1901_v31 = vadd.f32 0.5, %v1645_v22  ;;  %v1647_v32 = vmul.f32 0.5, %v2732_v25  ;;  %2751 = vtanh.f32 %v1145_v23  ;;  %v1146_v33 = vmul.f32 0.5, %v890_v24  ;;  %v387_v24 = vld [vmem:[%s3160_s13 + $0x590] sm:$0xff] }
 0x13f   : > { %v2736_v34 = vpop.eup %2735  ;;  %v1902_v35 = vadd.f32 0.5, %v1646_v26  ;;  %v1648_v36 = vmul.f32 0.5, %v2734_v30  ;;  %v1147_v37 = vmul.f32 0.5, %v891_v27  ;;  %v892_v38 = vadd.f32 %v3172_v5, %v635_v28 }
 0x140   : > { %v2738_v41 = vpop.eup %2737  ;;  %2157 = vst [vmem:[%s3245_s24 + $0x4d0] sm:$0xff] %v1901_v31  ;;  %v1903_v42 = vadd.f32 0.5, %v1647_v32  ;;  %v1649_v43 = vmul.f32 0.5, %v2736_v34  ;;  %2753 = vtanh.f32 %v1146_v33  ;;  %v893_v52 = vadd.f32 %v3172_v5, %v636_v44  ;;  %v389_v34 = vld [vmem:[%s3160_s13 + $0x5a0] sm:$0xff] }
 0x141   : > { %2158 = vst [vmem:[%s3245_s24 + $0x4d8] sm:$0xff] %v1902_v35  ;;  %v1904_v47 = vadd.f32 0.5, %v1648_v36  ;;  %v1650_v48 = vmul.f32 0.5, %v2738_v41  ;;  %2755 = vtanh.f32 %v1147_v37  ;;  %v1148_v49 = vmul.f32 0.5, %v892_v38  ;;  %v390_v38 = vld [vmem:[%s3160_s13 + $0x5a8] sm:$0xff] }
 0x142   : > { %2159 = vst [vmem:[%s3245_s24 + $0x4e0] sm:$0xff] %v1903_v42  ;;  %v1905_v51 = vadd.f32 0.5, %v1649_v43  ;;  %v637_v53 = vmul.f32 %v3167_v1, %v380_v39  ;;  %v638_v54 = vmul.f32 %v3167_v1, %v381_v40  ;;  %v639_v58 = vmul.f32 %v3167_v1, %v382_v45  ;;  %v391_v43 = vld [vmem:[%s3160_s13 + $0x5b0] sm:$0xff] }
 0x143   : > { %2160 = vst [vmem:[%s3245_s24 + $0x4e8] sm:$0xff] %v1904_v47  ;;  %v1906_v57 = vadd.f32 0.5, %v1650_v48  ;;  %2757 = vtanh.f32 %v1148_v49  ;;  %v640_v59 = vmul.f32 %v3167_v1, %v383_v46  ;;  %v1149_v60 = vmul.f32 0.5, %v893_v52  ;;  %v392_v52 = vld [vmem:[%s3160_s13 + $0x5b8] sm:$0xff] }
 0x144   : > { %2161 = vst [vmem:[%s3245_s24 + $0x4f0] sm:$0xff] %v1905_v51  ;;  %v894_v61 = vadd.f32 %v3172_v5, %v637_v53  ;;  %v895_v62 = vadd.f32 %v3172_v5, %v638_v54  ;;  %v641_v63 = vmul.f32 %v3167_v1, %v384_v50  ;;  %v896_v2 = vadd.f32 %v3172_v5, %v639_v58  ;;  %v393_v58 = vld [vmem:[%s3160_s13 + $0x5c0] sm:$0xff] }
 0x145   : > { %v2740_v0 = vpop.eup %2739  ;;  %2162 = vst [vmem:[%s3245_s24 + $0x4f8] sm:$0xff] %v1906_v57  ;;  %v897_v3 = vadd.f32 %v3172_v5, %v640_v59  ;;  %v642_v4 = vmul.f32 %v3167_v1, %v385_v55  ;;  %v643_v6 = vmul.f32 %v3167_v1, %v386_v56  ;;  %2759 = vtanh.f32 %v1149_v60 }
 0x146   : > { %v2742_v7 = vpop.eup %2741  ;;  %v1651_v8 = vmul.f32 0.5, %v2740_v0  ;;  %v1150_v9 = vmul.f32 0.5, %v894_v61  ;;  %v1151_v10 = vmul.f32 0.5, %v895_v62  ;;  %v1152_v13 = vmul.f32 0.5, %v896_v2 }
 0x147   : > { %v2744_v11 = vpop.eup %2743  ;;  %v1652_v12 = vmul.f32 0.5, %v2742_v7  ;;  %v1153_v14 = vmul.f32 0.5, %v897_v3  ;;  %v898_v15 = vadd.f32 %v3172_v5, %v641_v63  ;;  %v899_v19 = vadd.f32 %v3172_v5, %v642_v4  ;;  %v394_v3 = vld [vmem:[%s3160_s13 + $0x5c8] sm:$0xff]  ;;  %v395_v4 = vld [vmem:[%s3160_s13 + $0x5d0] sm:$0xff] }
 0x148   : > { %v2746_v16 = vpop.eup %2745  ;;  %v1907_v17 = vadd.f32 0.5, %v1651_v8  ;;  %v1653_v18 = vmul.f32 0.5, %v2744_v11  ;;  %2761 = vtanh.f32 %v1150_v9  ;;  %v900_v33 = vadd.f32 %v3172_v5, %v643_v6 }
 0x149   : > { %v2748_v20 = vpop.eup %2747  ;;  %v1908_v21 = vadd.f32 0.5, %v1652_v12  ;;  %v1654_v22 = vmul.f32 0.5, %v2746_v16  ;;  %2763 = vtanh.f32 %v1151_v10  ;;  %v1154_v23 = vmul.f32 0.5, %v898_v15 }
 0x14a   : > { %v2750_v25 = vpop.eup %2749  ;;  %2163 = vst [vmem:[%s3245_s24 + $0x500] sm:$0xff] %v1907_v17  ;;  %v1909_v26 = vadd.f32 0.5, %v1653_v18  ;;  %v1655_v27 = vmul.f32 0.5, %v2748_v20  ;;  %2765 = vtanh.f32 %v1152_v13  ;;  %v1155_v28 = vmul.f32 0.5, %v899_v19  ;;  %v396_v17 = vld [vmem:[%s3160_s13 + $0x5d8] sm:$0xff] }
 0x14b   : > { %v2752_v30 = vpop.eup %2751  ;;  %2164 = vst [vmem:[%s3245_s24 + $0x508] sm:$0xff] %v1908_v21  ;;  %v1910_v31 = vadd.f32 0.5, %v1654_v22  ;;  %v1656_v32 = vmul.f32 0.5, %v2750_v25  ;;  %2767 = vtanh.f32 %v1153_v14  ;;  %v644_v37 = vmul.f32 %v3167_v1, %v387_v24 }
 0x14c   : > { %2165 = vst [vmem:[%s3245_s24 + $0x510] sm:$0xff] %v1909_v26  ;;  %v1911_v35 = vadd.f32 0.5, %v1655_v27  ;;  %v1657_v36 = vmul.f32 0.5, %v2752_v30  ;;  %2769 = vtanh.f32 %v1154_v23  ;;  %v1156_v41 = vmul.f32 0.5, %v900_v33 }
 0x14d   : > { %v2754_v39 = vpop.eup %2753  ;;  %2166 = vst [vmem:[%s3245_s24 + $0x518] sm:$0xff] %v1910_v31  ;;  %v1912_v40 = vadd.f32 0.5, %v1656_v32  ;;  %2771 = vtanh.f32 %v1155_v28  ;;  %v645_v42 = vmul.f32 %v3167_v1, %v388_v29  ;;  %v901_v47 = vadd.f32 %v3172_v5, %v644_v37  ;;  %v397_v31 = vld [vmem:[%s3160_s13 + $0x5e0] sm:$0xff] }
 0x14e   : > { %v2756_v44 = vpop.eup %2755  ;;  %2167 = vst [vmem:[%s3245_s24 + $0x520] sm:$0xff] %v1911_v35  ;;  %v1913_v45 = vadd.f32 0.5, %v1657_v36  ;;  %v1658_v46 = vmul.f32 0.5, %v2754_v39  ;;  %v646_v48 = vmul.f32 %v3167_v1, %v389_v34  ;;  %2773 = vtanh.f32 %v1156_v41  ;;  %v398_v36 = vld [vmem:[%s3160_s13 + $0x5e8] sm:$0xff] }
 0x14f   : > { %2168 = vst [vmem:[%s3245_s24 + $0x528] sm:$0xff] %v1912_v40  ;;  %v1659_v49 = vmul.f32 0.5, %v2756_v44  ;;  %v902_v50 = vadd.f32 %v3172_v5, %v645_v42  ;;  %v647_v51 = vmul.f32 %v3167_v1, %v390_v38  ;;  %v1157_v55 = vmul.f32 0.5, %v901_v47  ;;  %v399_v42 = vld [vmem:[%s3160_s13 + $0x5f0] sm:$0xff]  ;;  %v401_v47 = vld [vmem:[%s3160_s13 + $0x600] sm:$0xff] }
 0x150   : > { %v2758_v53 = vpop.eup %2757  ;;  %2169 = vst [vmem:[%s3245_s24 + $0x530] sm:$0xff] %v1913_v45  ;;  %v1914_v54 = vadd.f32 0.5, %v1658_v46  ;;  %v903_v56 = vadd.f32 %v3172_v5, %v646_v48  ;;  %v648_v57 = vmul.f32 %v3167_v1, %v391_v43  ;;  %v649_v2 = vmul.f32 %v3167_v1, %v392_v52  ;;  %v400_v46 = vld [vmem:[%s3160_s13 + $0x5f8] sm:$0xff]  ;;  %v402_v52 = vld [vmem:[%s3160_s13 + $0x608] sm:$0xff] }
 0x151   : > { %v1915_v59 = vadd.f32 0.5, %v1659_v49  ;;  %v1660_v60 = vmul.f32 0.5, %v2758_v53  ;;  %v1158_v61 = vmul.f32 0.5, %v902_v50  ;;  %v904_v62 = vadd.f32 %v3172_v5, %v647_v51 }
 0x152   : > { %2170 = vst [vmem:[%s3245_s24 + $0x538] sm:$0xff] %v1914_v54  ;;  %2775 = vtanh.f32 %v1157_v55  ;;  %v1159_v63 = vmul.f32 0.5, %v903_v56  ;;  %v905_v0 = vadd.f32 %v3172_v5, %v648_v57  ;;  %v2760_v6 = vpop.eup %2759  ;;  %v650_v9 = vmul.f32 %v3167_v1, %v393_v58 }
 0x153   : > { %2171 = vst [vmem:[%s3245_s24 + $0x540] sm:$0xff] %v1915_v59  ;;  %v1916_v7 = vadd.f32 0.5, %v1660_v60  ;;  %2777 = vtanh.f32 %v1158_v61  ;;  %v1160_v8 = vmul.f32 0.5, %v904_v62  ;;  %v1661_v10 = vmul.f32 0.5, %v2760_v6 }
 0x154   : > { %2779 = vtanh.f32 %v1159_v63  ;;  %v1161_v11 = vmul.f32 0.5, %v905_v0  ;;  %v906_v12 = vadd.f32 %v3172_v5, %v649_v2  ;;  %v907_v14 = vadd.f32 %v3172_v5, %v650_v9 }
 0x155   : > { %v2762_v13 = vpop.eup %2761  ;;  %2172 = vst [vmem:[%s3245_s24 + $0x548] sm:$0xff] %v1916_v7  ;;  %2781 = vtanh.f32 %v1160_v8  ;;  %v651_v15 = vmul.f32 %v3167_v1, %v394_v3  ;;  %v652_v16 = vmul.f32 %v3167_v1, %v395_v4  ;;  %v1917_v19 = vadd.f32 0.5, %v1661_v10 }
 0x156   : > { %v2764_v18 = vpop.eup %2763  ;;  %v1662_v20 = vmul.f32 0.5, %v2762_v13  ;;  %2783 = vtanh.f32 %v1161_v11  ;;  %v1162_v21 = vmul.f32 0.5, %v906_v12  ;;  %v1163_v24 = vmul.f32 0.5, %v907_v14 }
 0x157   : > { %v2766_v22 = vpop.eup %2765  ;;  %v1663_v23 = vmul.f32 0.5, %v2764_v18  ;;  %v908_v25 = vadd.f32 %v3172_v5, %v651_v15  ;;  %v909_v26 = vadd.f32 %v3172_v5, %v652_v16  ;;  %2173 = vst [vmem:[%s3245_s24 + $0x550] sm:$0xff] %v1917_v19  ;;  %v653_v30 = vmul.f32 %v3167_v1, %v396_v17  ;;  %v403_v16 = vld [vmem:[%s3160_s13 + $0x610] sm:$0xff]  ;;  %v404_v17 = vld [vmem:[%s3160_s13 + $0x618] sm:$0xff] }
 0x158   : > { %v2768_v27 = vpop.eup %2767  ;;  %v1918_v28 = vadd.f32 0.5, %v1662_v20  ;;  %v1664_v29 = vmul.f32 0.5, %v2766_v22  ;;  %2785 = vtanh.f32 %v1162_v21  ;;  %v654_v45 = vmul.f32 %v3167_v1, %v397_v31  ;;  %v405_v22 = vld [vmem:[%s3160_s13 + $0x620] sm:$0xff]  ;;  %v407_v31 = vld [vmem:[%s3160_s13 + $0x630] sm:$0xff] }
 0x159   : > { %v2770_v32 = vpop.eup %2769  ;;  %v1919_v33 = vadd.f32 0.5, %v1663_v23  ;;  %v1665_v34 = vmul.f32 0.5, %v2768_v27  ;;  %2787 = vtanh.f32 %v1163_v24  ;;  %v1164_v35 = vmul.f32 0.5, %v908_v25 }
 0x15a   : > { %v2772_v37 = vpop.eup %2771  ;;  %2174 = vst [vmem:[%s3245_s24 + $0x558] sm:$0xff] %v1918_v28  ;;  %v1920_v38 = vadd.f32 0.5, %v1664_v29  ;;  %v1666_v39 = vmul.f32 0.5, %v2770_v32  ;;  %v1165_v40 = vmul.f32 0.5, %v909_v26  ;;  %v910_v41 = vadd.f32 %v3172_v5, %v653_v30  ;;  %v406_v26 = vld [vmem:[%s3160_s13 + $0x628] sm:$0xff]  ;;  %v408_v32 = vld [vmem:[%s3160_s13 + $0x638] sm:$0xff] }
 0x15b   : > { %2175 = vst [vmem:[%s3245_s24 + $0x560] sm:$0xff] %v1919_v33  ;;  %v1921_v43 = vadd.f32 0.5, %v1665_v34  ;;  %v1667_v44 = vmul.f32 0.5, %v2772_v37  ;;  %2789 = vtanh.f32 %v1164_v35  ;;  %v2774_v48 = vpop.eup %2773  ;;  %v655_v51 = vmul.f32 %v3167_v1, %v398_v36 }
 0x15c   : > { %2176 = vst [vmem:[%s3245_s24 + $0x568] sm:$0xff] %v1920_v38  ;;  %v1922_v49 = vadd.f32 0.5, %v1666_v39  ;;  %2791 = vtanh.f32 %v1165_v40  ;;  %v1166_v50 = vmul.f32 0.5, %v910_v41  ;;  %v1668_v54 = vmul.f32 0.5, %v2774_v48 }
 0x15d   : > { %2177 = vst [vmem:[%s3245_s24 + $0x570] sm:$0xff] %v1921_v43  ;;  %v1923_v53 = vadd.f32 0.5, %v1667_v44  ;;  %v911_v55 = vadd.f32 %v3172_v5, %v654_v45  ;;  %v656_v56 = vmul.f32 %v3167_v1, %v399_v42  ;;  %v912_v57 = vadd.f32 %v3172_v5, %v655_v51 }
 0x15e   : > { %2178 = vst [vmem:[%s3245_s24 + $0x578] sm:$0xff] %v1922_v49  ;;  %2793 = vtanh.f32 %v1166_v50  ;;  %v657_v58 = vmul.f32 %v3167_v1, %v400_v46  ;;  %v658_v59 = vmul.f32 %v3167_v1, %v401_v47  ;;  %v1924_v61 = vadd.f32 0.5, %v1668_v54  ;;  %v409_v46 = vld [vmem:[%s3160_s13 + $0x640] sm:$0xff] }
 0x15f   : > { %v2776_v60 = vpop.eup %2775  ;;  %2179 = vst [vmem:[%s3245_s24 + $0x580] sm:$0xff] %v1923_v53  ;;  %v1167_v62 = vmul.f32 0.5, %v911_v55  ;;  %v913_v63 = vadd.f32 %v3172_v5, %v656_v56  ;;  %v659_v0 = vmul.f32 %v3167_v1, %v402_v52  ;;  %v1168_v4 = vmul.f32 0.5, %v912_v57 }
 0x160   : > { %v2778_v2 = vpop.eup %2777  ;;  %v1669_v3 = vmul.f32 0.5, %v2776_v60  ;;  %v914_v6 = vadd.f32 %v3172_v5, %v657_v58  ;;  %v915_v7 = vadd.f32 %v3172_v5, %v658_v59  ;;  %2180 = vst [vmem:[%s3245_s24 + $0x588] sm:$0xff] %v1924_v61  ;;  %v660_v29 = vmul.f32 %v3167_v1, %v403_v16  ;;  %v410_v60 = vld [vmem:[%s3160_s13 + $0x648] sm:$0xff]  ;;  %v411_v61 = vld [vmem:[%s3160_s13 + $0x650] sm:$0xff] }
 0x161   : > { %v2780_v8 = vpop.eup %2779  ;;  %v1670_v9 = vmul.f32 0.5, %v2778_v2  ;;  %2795 = vtanh.f32 %v1167_v62  ;;  %v1169_v10 = vmul.f32 0.5, %v913_v63  ;;  %v916_v11 = vadd.f32 %v3172_v5, %v659_v0  ;;  %v412_v2 = vld [vmem:[%s3160_s13 + $0x658] sm:$0xff] }
 0x162   : > { %v2782_v12 = vpop.eup %2781  ;;  %v1925_v13 = vadd.f32 0.5, %v1669_v3  ;;  %v1671_v14 = vmul.f32 0.5, %v2780_v8  ;;  %2797 = vtanh.f32 %v1168_v4  ;;  %v1170_v15 = vmul.f32 0.5, %v914_v6 }
 0x163   : > { %v2784_v18 = vpop.eup %2783  ;;  %v1926_v19 = vadd.f32 0.5, %v1670_v9  ;;  %v1672_v20 = vmul.f32 0.5, %v2782_v12  ;;  %2799 = vtanh.f32 %v1169_v10  ;;  %v1171_v21 = vmul.f32 0.5, %v915_v7 }
 0x164   : > { %2181 = vst [vmem:[%s3245_s24 + $0x590] sm:$0xff] %v1925_v13  ;;  %v1927_v23 = vadd.f32 0.5, %v1671_v14  ;;  %v1673_v24 = vmul.f32 0.5, %v2784_v18  ;;  %2801 = vtanh.f32 %v1170_v15  ;;  %v1172_v25 = vmul.f32 0.5, %v916_v11 }
 0x165   : > { %v2786_v27 = vpop.eup %2785  ;;  %2182 = vst [vmem:[%s3245_s24 + $0x598] sm:$0xff] %v1926_v19  ;;  %v1928_v28 = vadd.f32 0.5, %v1672_v20  ;;  %2803 = vtanh.f32 %v1171_v21  ;;  %v661_v30 = vmul.f32 %v3167_v1, %v404_v17  ;;  %v662_v36 = vmul.f32 %v3167_v1, %v405_v22  ;;  %v413_v19 = vld [vmem:[%s3160_s13 + $0x660] sm:$0xff] }
 0x166   : > { %v2788_v33 = vpop.eup %2787  ;;  %2183 = vst [vmem:[%s3245_s24 + $0x5a0] sm:$0xff] %v1927_v23  ;;  %v1929_v34 = vadd.f32 0.5, %v1673_v24  ;;  %v1674_v35 = vmul.f32 0.5, %v2786_v27  ;;  %2805 = vtanh.f32 %v1172_v25  ;;  %v917_v38 = vadd.f32 %v3172_v5, %v660_v29  ;;  %v414_v24 = vld [vmem:[%s3160_s13 + $0x668] sm:$0xff] }
 0x167   : > { %2184 = vst [vmem:[%s3245_s24 + $0x5a8] sm:$0xff] %v1928_v28  ;;  %v1675_v37 = vmul.f32 0.5, %v2788_v33  ;;  %v918_v39 = vadd.f32 %v3172_v5, %v661_v30  ;;  %v663_v40 = vmul.f32 %v3167_v1, %v406_v26  ;;  %v919_v43 = vadd.f32 %v3172_v5, %v662_v36  ;;  %v415_v30 = vld [vmem:[%s3160_s13 + $0x670] sm:$0xff]  ;;  %v416_v36 = vld [vmem:[%s3160_s13 + $0x678] sm:$0xff] }
 0x168   : > { %v2790_v41 = vpop.eup %2789  ;;  %2185 = vst [vmem:[%s3245_s24 + $0x5b0] sm:$0xff] %v1929_v34  ;;  %v1930_v42 = vadd.f32 0.5, %v1674_v35  ;;  %v664_v44 = vmul.f32 %v3167_v1, %v407_v31  ;;  %v665_v45 = vmul.f32 %v3167_v1, %v408_v32  ;;  %v1173_v50 = vmul.f32 0.5, %v917_v38 }
 0x169   : > { %v2792_v47 = vpop.eup %2791  ;;  %v1931_v48 = vadd.f32 0.5, %v1675_v37  ;;  %v1676_v49 = vmul.f32 0.5, %v2790_v41  ;;  %v1174_v51 = vmul.f32 0.5, %v918_v39  ;;  %v1175_v53 = vmul.f32 0.5, %v919_v43  ;;  %v418_v41 = vld [vmem:[%s3160_s13 + $0x688] sm:$0xff] }
 0x16a   : > { %2186 = vst [vmem:[%s3245_s24 + $0x5b8] sm:$0xff] %v1930_v42  ;;  %v1677_v52 = vmul.f32 0.5, %v2792_v47  ;;  %v920_v54 = vadd.f32 %v3172_v5, %v663_v40  ;;  %v921_v55 = vadd.f32 %v3172_v5, %v664_v44  ;;  %2807 = vtanh.f32 %v1173_v50  ;;  %v417_v40 = vld [vmem:[%s3160_s13 + $0x680] sm:$0xff] }
 0x16b   : > { %v2794_v56 = vpop.eup %2793  ;;  %2187 = vst [vmem:[%s3245_s24 + $0x5c0] sm:$0xff] %v1931_v48  ;;  %v1932_v57 = vadd.f32 0.5, %v1676_v49  ;;  %v922_v58 = vadd.f32 %v3172_v5, %v665_v45  ;;  %v666_v59 = vmul.f32 %v3167_v1, %v409_v46  ;;  %2809 = vtanh.f32 %v1174_v51  ;;  %v419_v45 = vld [vmem:[%s3160_s13 + $0x690] sm:$0xff]  ;;  %v420_v46 = vld [vmem:[%s3160_s13 + $0x698] sm:$0xff] }
 0x16c   : > { %v1933_v62 = vadd.f32 0.5, %v1677_v52  ;;  %v1678_v63 = vmul.f32 0.5, %v2794_v56  ;;  %v1176_v0 = vmul.f32 0.5, %v920_v54  ;;  %2811 = vtanh.f32 %v1175_v53 }
 0x16d   : > { %2188 = vst [vmem:[%s3245_s24 + $0x5c8] sm:$0xff] %v1932_v57  ;;  %v1177_v3 = vmul.f32 0.5, %v921_v55  ;;  %v1178_v4 = vmul.f32 0.5, %v922_v58  ;;  %v923_v6 = vadd.f32 %v3172_v5, %v666_v59  ;;  %v667_v9 = vmul.f32 %v3167_v1, %v410_v60 }
 0x16e   : > { %v2796_v7 = vpop.eup %2795  ;;  %2189 = vst [vmem:[%s3245_s24 + $0x5d0] sm:$0xff] %v1933_v62  ;;  %v1934_v8 = vadd.f32 0.5, %v1678_v63  ;;  %2813 = vtanh.f32 %v1176_v0  ;;  %v668_v10 = vmul.f32 %v3167_v1, %v411_v61  ;;  %v669_v14 = vmul.f32 %v3167_v1, %v412_v2 }
 0x16f   : > { %v2798_v11 = vpop.eup %2797  ;;  %v1679_v12 = vmul.f32 0.5, %v2796_v7  ;;  %2815 = vtanh.f32 %v1177_v3  ;;  %v1179_v13 = vmul.f32 0.5, %v923_v6  ;;  %v924_v17 = vadd.f32 %v3172_v5, %v667_v9 }
 0x170   : > { %v2800_v15 = vpop.eup %2799  ;;  %2190 = vst [vmem:[%s3245_s24 + $0x5d8] sm:$0xff] %v1934_v8  ;;  %v1680_v16 = vmul.f32 0.5, %v2798_v11  ;;  %2817 = vtanh.f32 %v1178_v4  ;;  %v925_v18 = vadd.f32 %v3172_v5, %v668_v10  ;;  %v926_v23 = vadd.f32 %v3172_v5, %v669_v14 }
 0x171   : > { %v2802_v20 = vpop.eup %2801  ;;  %v1935_v21 = vadd.f32 0.5, %v1679_v12  ;;  %v1681_v22 = vmul.f32 0.5, %v2800_v15  ;;  %2819 = vtanh.f32 %v1179_v13  ;;  %v1180_v28 = vmul.f32 0.5, %v924_v17  ;;  %v421_v13 = vld [vmem:[%s3160_s13 + $0x6a0] sm:$0xff] }
 0x172   : > { %v2804_v25 = vpop.eup %2803  ;;  %v1936_v26 = vadd.f32 0.5, %v1680_v16  ;;  %v1682_v27 = vmul.f32 0.5, %v2802_v20  ;;  %v1181_v29 = vmul.f32 0.5, %v925_v18  ;;  %v1182_v34 = vmul.f32 0.5, %v926_v23  ;;  %v422_v18 = vld [vmem:[%s3160_s13 + $0x6a8] sm:$0xff] }
 0x173   : > { %v2806_v31 = vpop.eup %2805  ;;  %2191 = vst [vmem:[%s3245_s24 + $0x5e0] sm:$0xff] %v1935_v21  ;;  %v1937_v32 = vadd.f32 0.5, %v1681_v22  ;;  %v1683_v33 = vmul.f32 0.5, %v2804_v25  ;;  %v670_v35 = vmul.f32 %v3167_v1, %v413_v19  ;;  %2821 = vtanh.f32 %v1180_v28  ;;  %v423_v19 = vld [vmem:[%s3160_s13 + $0x6b0] sm:$0xff] }
 0x174   : > { %2192 = vst [vmem:[%s3245_s24 + $0x5e8] sm:$0xff] %v1936_v26  ;;  %v1938_v37 = vadd.f32 0.5, %v1682_v27  ;;  %v1684_v38 = vmul.f32 0.5, %v2806_v31  ;;  %v671_v39 = vmul.f32 %v3167_v1, %v414_v24  ;;  %2823 = vtanh.f32 %v1181_v29  ;;  %v424_v24 = vld [vmem:[%s3160_s13 + $0x6b8] sm:$0xff] }
 0x175   : > { %2193 = vst [vmem:[%s3245_s24 + $0x5f0] sm:$0xff] %v1937_v32  ;;  %v1939_v42 = vadd.f32 0.5, %v1683_v33  ;;  %v927_v43 = vadd.f32 %v3172_v5, %v670_v35  ;;  %v672_v44 = vmul.f32 %v3167_v1, %v415_v30  ;;  %2825 = vtanh.f32 %v1182_v34  ;;  %v425_v33 = vld [vmem:[%s3160_s13 + $0x6c0] sm:$0xff] }
 0x176   : > { %2194 = vst [vmem:[%s3245_s24 + $0x5f8] sm:$0xff] %v1938_v37  ;;  %v1940_v47 = vadd.f32 0.5, %v1684_v38  ;;  %v928_v48 = vadd.f32 %v3172_v5, %v671_v39  ;;  %v673_v49 = vmul.f32 %v3167_v1, %v416_v36  ;;  %v674_v52 = vmul.f32 %v3167_v1, %v417_v40 }
 0x177   : > { %2195 = vst [vmem:[%s3245_s24 + $0x600] sm:$0xff] %v1939_v42  ;;  %v1183_v50 = vmul.f32 0.5, %v927_v43  ;;  %v929_v51 = vadd.f32 %v3172_v5, %v672_v44  ;;  %v675_v53 = vmul.f32 %v3167_v1, %v418_v41  ;;  %v2808_v54 = vpop.eup %2807  ;;  %v676_v57 = vmul.f32 %v3167_v1, %v419_v45 }
 0x178   : > { %2196 = vst [vmem:[%s3245_s24 + $0x608] sm:$0xff] %v1940_v47  ;;  %v1184_v55 = vmul.f32 0.5, %v928_v48  ;;  %v930_v56 = vadd.f32 %v3172_v5, %v673_v49  ;;  %v677_v58 = vmul.f32 %v3167_v1, %v420_v46  ;;  %v2810_v59 = vpop.eup %2809  ;;  %v1685_v60 = vmul.f32 0.5, %v2808_v54  ;;  %v426_v47 = vld [vmem:[%s3160_s13 + $0x6c8] sm:$0xff]  ;;  %v427_v48 = vld [vmem:[%s3160_s13 + $0x6d0] sm:$0xff] }
 0x179   : > { %2827 = vtanh.f32 %v1183_v50  ;;  %v1185_v61 = vmul.f32 0.5, %v929_v51  ;;  %v931_v62 = vadd.f32 %v3172_v5, %v674_v52  ;;  %v2812_v63 = vpop.eup %2811  ;;  %v1686_v0 = vmul.f32 0.5, %v2810_v59 }
 0x17a   : > { %2829 = vtanh.f32 %v1184_v55  ;;  %v1186_v2 = vmul.f32 0.5, %v930_v56  ;;  %v932_v3 = vadd.f32 %v3172_v5, %v675_v53  ;;  %v1941_v6 = vadd.f32 0.5, %v1685_v60  ;;  %v428_v53 = vld [vmem:[%s3160_s13 + $0x6d8] sm:$0xff] }
 0x17b   : > { %v2814_v4 = vpop.eup %2813  ;;  %v1687_v7 = vmul.f32 0.5, %v2812_v63  ;;  %2831 = vtanh.f32 %v1185_v61  ;;  %v1187_v8 = vmul.f32 0.5, %v931_v62  ;;  %v1942_v10 = vadd.f32 0.5, %v1686_v0 }
 0x17c   : > { %v2816_v9 = vpop.eup %2815  ;;  %v1688_v11 = vmul.f32 0.5, %v2814_v4  ;;  %2833 = vtanh.f32 %v1186_v2  ;;  %v1188_v12 = vmul.f32 0.5, %v932_v3  ;;  %2197 = vst [vmem:[%s3245_s24 + $0x610] sm:$0xff] %v1941_v6  ;;  %v933_v17 = vadd.f32 %v3172_v5, %v676_v57 }
 0x17d   : > { %v2818_v14 = vpop.eup %2817  ;;  %v1943_v15 = vadd.f32 0.5, %v1687_v7  ;;  %v1689_v16 = vmul.f32 0.5, %v2816_v9  ;;  %2835 = vtanh.f32 %v1187_v8  ;;  %2198 = vst [vmem:[%s3245_s24 + $0x618] sm:$0xff] %v1942_v10  ;;  %v934_v23 = vadd.f32 %v3172_v5, %v677_v58  ;;  %v429_v7 = vld [vmem:[%s3160_s13 + $0x6e0] sm:$0xff] }
 0x17e   : > { %v2820_v20 = vpop.eup %2819  ;;  %v1944_v21 = vadd.f32 0.5, %v1688_v11  ;;  %v1690_v22 = vmul.f32 0.5, %v2818_v14  ;;  %2837 = vtanh.f32 %v1188_v12  ;;  %v1189_v27 = vmul.f32 0.5, %v933_v17  ;;  %v430_v12 = vld [vmem:[%s3160_s13 + $0x6e8] sm:$0xff] }
 0x17f   : > { %2199 = vst [vmem:[%s3245_s24 + $0x620] sm:$0xff] %v1943_v15  ;;  %v1945_v25 = vadd.f32 0.5, %v1689_v16  ;;  %v1691_v26 = vmul.f32 0.5, %v2820_v20  ;;  %v678_v28 = vmul.f32 %v3167_v1, %v421_v13  ;;  %v1190_v30 = vmul.f32 0.5, %v934_v23 }
 0x180   : > { %2200 = vst [vmem:[%s3245_s24 + $0x628] sm:$0xff] %v1944_v21  ;;  %v1946_v29 = vadd.f32 0.5, %v1690_v22  ;;  %v679_v31 = vmul.f32 %v3167_v1, %v422_v18  ;;  %v680_v32 = vmul.f32 %v3167_v1, %v423_v19  ;;  %v2822_v34 = vpop.eup %2821  ;;  %2839 = vtanh.f32 %v1189_v27  ;;  %v431_v18 = vld [vmem:[%s3160_s13 + $0x6f0] sm:$0xff] }
 0x181   : > { %2201 = vst [vmem:[%s3245_s24 + $0x630] sm:$0xff] %v1945_v25  ;;  %v1947_v35 = vadd.f32 0.5, %v1691_v26  ;;  %v935_v36 = vadd.f32 %v3172_v5, %v678_v28  ;;  %v681_v37 = vmul.f32 %v3167_v1, %v424_v24  ;;  %v2824_v38 = vpop.eup %2823  ;;  %v1692_v39 = vmul.f32 0.5, %v2822_v34  ;;  %v432_v24 = vld [vmem:[%s3160_s13 + $0x6f8] sm:$0xff]  ;;  %v433_v28 = vld [vmem:[%s3160_s13 + $0x700] sm:$0xff] }
 0x182   : > { %2202 = vst [vmem:[%s3245_s24 + $0x638] sm:$0xff] %v1946_v29  ;;  %2841 = vtanh.f32 %v1190_v30  ;;  %v936_v40 = vadd.f32 %v3172_v5, %v679_v31  ;;  %v937_v41 = vadd.f32 %v3172_v5, %v680_v32  ;;  %v2826_v42 = vpop.eup %2825  ;;  %v1693_v43 = vmul.f32 0.5, %v2824_v38  ;;  %v434_v32 = vld [vmem:[%s3160_s13 + $0x708] sm:$0xff] }
 0x183   : > { %2203 = vst [vmem:[%s3245_s24 + $0x640] sm:$0xff] %v1947_v35  ;;  %v1191_v44 = vmul.f32 0.5, %v935_v36  ;;  %v938_v45 = vadd.f32 %v3172_v5, %v681_v37  ;;  %v682_v46 = vmul.f32 %v3167_v1, %v425_v33  ;;  %v1948_v49 = vadd.f32 0.5, %v1692_v39 }
 0x184   : > { %v1694_v50 = vmul.f32 0.5, %v2826_v42  ;;  %v1192_v51 = vmul.f32 0.5, %v936_v40  ;;  %v1193_v52 = vmul.f32 0.5, %v937_v41  ;;  %v1949_v54 = vadd.f32 0.5, %v1693_v43 }
 0x185   : > { %2843 = vtanh.f32 %v1191_v44  ;;  %v1194_v55 = vmul.f32 0.5, %v938_v45  ;;  %v939_v56 = vadd.f32 %v3172_v5, %v682_v46  ;;  %2204 = vst [vmem:[%s3245_s24 + $0x648] sm:$0xff] %v1948_v49  ;;  %v683_v59 = vmul.f32 %v3167_v1, %v426_v47  ;;  %v435_v46 = vld [vmem:[%s3160_s13 + $0x710] sm:$0xff] }
 0x186   : > { %v2828_v57 = vpop.eup %2827  ;;  %v1950_v58 = vadd.f32 0.5, %v1694_v50  ;;  %2845 = vtanh.f32 %v1192_v51  ;;  %v684_v60 = vmul.f32 %v3167_v1, %v427_v48  ;;  %2205 = vst [vmem:[%s3245_s24 + $0x650] sm:$0xff] %v1949_v54  ;;  %v685_v0 = vmul.f32 %v3167_v1, %v428_v53  ;;  %v436_v50 = vld [vmem:[%s3160_s13 + $0x718] sm:$0xff] }
 0x187   : > { %v2830_v61 = vpop.eup %2829  ;;  %v1695_v62 = vmul.f32 0.5, %v2828_v57  ;;  %2847 = vtanh.f32 %v1193_v52  ;;  %v1195_v63 = vmul.f32 0.5, %v939_v56  ;;  %v940_v4 = vadd.f32 %v3172_v5, %v683_v59 }
 0x188   : > { %v2832_v2 = vpop.eup %2831  ;;  %2206 = vst [vmem:[%s3245_s24 + $0x658] sm:$0xff] %v1950_v58  ;;  %v1696_v3 = vmul.f32 0.5, %v2830_v61  ;;  %2849 = vtanh.f32 %v1194_v55  ;;  %v941_v6 = vadd.f32 %v3172_v5, %v684_v60  ;;  %v942_v11 = vadd.f32 %v3172_v5, %v685_v0 }
 0x189   : > { %v2834_v8 = vpop.eup %2833  ;;  %v1951_v9 = vadd.f32 0.5, %v1695_v62  ;;  %v1697_v10 = vmul.f32 0.5, %v2832_v2  ;;  %2851 = vtanh.f32 %v1195_v63  ;;  %v1196_v16 = vmul.f32 0.5, %v940_v4  ;;  %v437_v63 = vld [vmem:[%s3160_s13 + $0x720] sm:$0xff] }
 0x18a   : > { %v2836_v13 = vpop.eup %2835  ;;  %v1952_v14 = vadd.f32 0.5, %v1696_v3  ;;  %v1698_v15 = vmul.f32 0.5, %v2834_v8  ;;  %v1197_v17 = vmul.f32 0.5, %v941_v6  ;;  %v1198_v22 = vmul.f32 0.5, %v942_v11  ;;  %v438_v6 = vld [vmem:[%s3160_s13 + $0x728] sm:$0xff] }
 0x18b   : > { %v2838_v19 = vpop.eup %2837  ;;  %2207 = vst [vmem:[%s3245_s24 + $0x660] sm:$0xff] %v1951_v9  ;;  %v1953_v20 = vadd.f32 0.5, %v1697_v10  ;;  %v1699_v21 = vmul.f32 0.5, %v2836_v13  ;;  %v686_v23 = vmul.f32 %v3167_v1, %v429_v7  ;;  %2853 = vtanh.f32 %v1196_v16  ;;  %v439_v7 = vld [vmem:[%s3160_s13 + $0x730] sm:$0xff] }
 0x18c   : > { %2208 = vst [vmem:[%s3245_s24 + $0x668] sm:$0xff] %v1952_v14  ;;  %v1954_v25 = vadd.f32 0.5, %v1698_v15  ;;  %v1700_v26 = vmul.f32 0.5, %v2838_v19  ;;  %v687_v27 = vmul.f32 %v3167_v1, %v430_v12  ;;  %2855 = vtanh.f32 %v1197_v17  ;;  %v440_v12 = vld [vmem:[%s3160_s13 + $0x738] sm:$0xff] }
 0x18d   : > { %2209 = vst [vmem:[%s3245_s24 + $0x670] sm:$0xff] %v1953_v20  ;;  %v1955_v29 = vadd.f32 0.5, %v1699_v21  ;;  %v943_v30 = vadd.f32 %v3172_v5, %v686_v23  ;;  %v688_v31 = vmul.f32 %v3167_v1, %v431_v18  ;;  %v2840_v33 = vpop.eup %2839  ;;  %2857 = vtanh.f32 %v1198_v22  ;;  %v441_v21 = vld [vmem:[%s3160_s13 + $0x740] sm:$0xff] }
 0x18e   : > { %2210 = vst [vmem:[%s3245_s24 + $0x678] sm:$0xff] %v1954_v25  ;;  %v1956_v34 = vadd.f32 0.5, %v1700_v26  ;;  %v944_v35 = vadd.f32 %v3172_v5, %v687_v27  ;;  %v689_v36 = vmul.f32 %v3167_v1, %v432_v24  ;;  %v1701_v38 = vmul.f32 0.5, %v2840_v33 }
 0x18f   : > { %v2842_v37 = vpop.eup %2841  ;;  %2211 = vst [vmem:[%s3245_s24 + $0x680] sm:$0xff] %v1955_v29  ;;  %v1199_v39 = vmul.f32 0.5, %v943_v30  ;;  %v945_v40 = vadd.f32 %v3172_v5, %v688_v31  ;;  %v690_v41 = vmul.f32 %v3167_v1, %v433_v28  ;;  %v691_v45 = vmul.f32 %v3167_v1, %v434_v32 }
 0x190   : > { %2212 = vst [vmem:[%s3245_s24 + $0x688] sm:$0xff] %v1956_v34  ;;  %v1702_v42 = vmul.f32 0.5, %v2842_v37  ;;  %v1200_v43 = vmul.f32 0.5, %v944_v35  ;;  %v946_v44 = vadd.f32 %v3172_v5, %v689_v36  ;;  %v1957_v47 = vadd.f32 0.5, %v1701_v38  ;;  %v442_v35 = vld [vmem:[%s3160_s13 + $0x748] sm:$0xff]  ;;  %v443_v36 = vld [vmem:[%s3160_s13 + $0x750] sm:$0xff] }
 0x191   : > { %2859 = vtanh.f32 %v1199_v39  ;;  %v1201_v48 = vmul.f32 0.5, %v945_v40  ;;  %v947_v49 = vadd.f32 %v3172_v5, %v690_v41  ;;  %v948_v54 = vadd.f32 %v3172_v5, %v691_v45  ;;  %v444_v41 = vld [vmem:[%s3160_s13 + $0x758] sm:$0xff] }
 0x192   : > { %v2844_v51 = vpop.eup %2843  ;;  %v1958_v52 = vadd.f32 0.5, %v1702_v42  ;;  %2861 = vtanh.f32 %v1200_v43  ;;  %v1202_v53 = vmul.f32 0.5, %v946_v44  ;;  %2213 = vst [vmem:[%s3245_s24 + $0x690] sm:$0xff] %v1957_v47  ;;  %v692_v58 = vmul.f32 %v3167_v1, %v435_v46 }
 0x193   : > { %v2846_v55 = vpop.eup %2845  ;;  %v1703_v56 = vmul.f32 0.5, %v2844_v51  ;;  %2863 = vtanh.f32 %v1201_v48  ;;  %v1203_v57 = vmul.f32 0.5, %v947_v49  ;;  %v1204_v61 = vmul.f32 0.5, %v948_v54 }
 0x194   : > { %v2848_v59 = vpop.eup %2847  ;;  %2214 = vst [vmem:[%s3245_s24 + $0x698] sm:$0xff] %v1958_v52  ;;  %v1704_v60 = vmul.f32 0.5, %v2846_v55  ;;  %2865 = vtanh.f32 %v1202_v53  ;;  %v693_v62 = vmul.f32 %v3167_v1, %v436_v50  ;;  %v949_v4 = vadd.f32 %v3172_v5, %v692_v58 }
 0x195   : > { %v2850_v0 = vpop.eup %2849  ;;  %v1959_v2 = vadd.f32 0.5, %v1703_v56  ;;  %v1705_v3 = vmul.f32 0.5, %v2848_v59  ;;  %2867 = vtanh.f32 %v1203_v57  ;;  %v694_v16 = vmul.f32 %v3167_v1, %v437_v63  ;;  %v445_v57 = vld [vmem:[%s3160_s13 + $0x760] sm:$0xff] }
 0x196   : > { %v2852_v8 = vpop.eup %2851  ;;  %v1960_v9 = vadd.f32 0.5, %v1704_v60  ;;  %v1706_v10 = vmul.f32 0.5, %v2850_v0  ;;  %2869 = vtanh.f32 %v1204_v61  ;;  %v950_v11 = vadd.f32 %v3172_v5, %v693_v62  ;;  %v446_v62 = vld [vmem:[%s3160_s13 + $0x768] sm:$0xff] }
 0x197   : > { %2215 = vst [vmem:[%s3245_s24 + $0x6a0] sm:$0xff] %v1959_v2  ;;  %v1961_v13 = vadd.f32 0.5, %v1705_v3  ;;  %v1707_v14 = vmul.f32 0.5, %v2852_v8  ;;  %v1205_v15 = vmul.f32 0.5, %v949_v4  ;;  %v695_v19 = vmul.f32 %v3167_v1, %v438_v6  ;;  %v447_v6 = vld [vmem:[%s3160_s13 + $0x770] sm:$0xff] }
 0x198   : > { %2216 = vst [vmem:[%s3245_s24 + $0x6a8] sm:$0xff] %v1960_v9  ;;  %v1962_v17 = vadd.f32 0.5, %v1706_v10  ;;  %v1206_v18 = vmul.f32 0.5, %v950_v11  ;;  %v696_v20 = vmul.f32 %v3167_v1, %v439_v7  ;;  %v2854_v22 = vpop.eup %2853  ;;  %v951_v24 = vadd.f32 %v3172_v5, %v694_v16  ;;  %v449_v16 = vld [vmem:[%s3160_s13 + $0x780] sm:$0xff] }
 0x199   : > { %2217 = vst [vmem:[%s3245_s24 + $0x6b0] sm:$0xff] %v1961_v13  ;;  %v1963_v23 = vadd.f32 0.5, %v1707_v14  ;;  %2871 = vtanh.f32 %v1205_v15  ;;  %v697_v25 = vmul.f32 %v3167_v1, %v440_v12  ;;  %v2856_v26 = vpop.eup %2855  ;;  %v1708_v27 = vmul.f32 0.5, %v2854_v22  ;;  %v448_v12 = vld [vmem:[%s3160_s13 + $0x778] sm:$0xff] }
 0x19a   : > { %2218 = vst [vmem:[%s3245_s24 + $0x6b8] sm:$0xff] %v1962_v17  ;;  %2873 = vtanh.f32 %v1206_v18  ;;  %v952_v28 = vadd.f32 %v3172_v5, %v695_v19  ;;  %v953_v29 = vadd.f32 %v3172_v5, %v696_v20  ;;  %v2858_v30 = vpop.eup %2857  ;;  %v1709_v31 = vmul.f32 0.5, %v2856_v26  ;;  %v450_v20 = vld [vmem:[%s3160_s13 + $0x788] sm:$0xff] }
 0x19b   : > { %2219 = vst [vmem:[%s3245_s24 + $0x6c0] sm:$0xff] %v1963_v23  ;;  %v1207_v32 = vmul.f32 0.5, %v951_v24  ;;  %v954_v33 = vadd.f32 %v3172_v5, %v697_v25  ;;  %v698_v34 = vmul.f32 %v3167_v1, %v441_v21  ;;  %v1964_v37 = vadd.f32 0.5, %v1708_v27 }
 0x19c   : > { %v1710_v38 = vmul.f32 0.5, %v2858_v30  ;;  %v1208_v39 = vmul.f32 0.5, %v952_v28  ;;  %v1209_v40 = vmul.f32 0.5, %v953_v29  ;;  %v1965_v42 = vadd.f32 0.5, %v1709_v31 }
 0x19d   : > { %2875 = vtanh.f32 %v1207_v32  ;;  %v1210_v43 = vmul.f32 0.5, %v954_v33  ;;  %v955_v44 = vadd.f32 %v3172_v5, %v698_v34  ;;  %2220 = vst [vmem:[%s3245_s24 + $0x6c8] sm:$0xff] %v1964_v37  ;;  %v699_v47 = vmul.f32 %v3167_v1, %v442_v35  ;;  %v451_v34 = vld [vmem:[%s3160_s13 + $0x790] sm:$0xff] }
 0x19e   : > { %v2860_v45 = vpop.eup %2859  ;;  %v1966_v46 = vadd.f32 0.5, %v1710_v38  ;;  %2877 = vtanh.f32 %v1208_v39  ;;  %v700_v48 = vmul.f32 %v3167_v1, %v443_v36  ;;  %2221 = vst [vmem:[%s3245_s24 + $0x6d0] sm:$0xff] %v1965_v42  ;;  %v701_v52 = vmul.f32 %v3167_v1, %v444_v41  ;;  %v452_v38 = vld [vmem:[%s3160_s13 + $0x798] sm:$0xff] }
 0x19f   : > { %v2862_v49 = vpop.eup %2861  ;;  %v1711_v50 = vmul.f32 0.5, %v2860_v45  ;;  %2879 = vtanh.f32 %v1209_v40  ;;  %v1211_v51 = vmul.f32 0.5, %v955_v44  ;;  %v956_v55 = vadd.f32 %v3172_v5, %v699_v47 }
 0x1a0   : > { %v2864_v53 = vpop.eup %2863  ;;  %2222 = vst [vmem:[%s3245_s24 + $0x6d8] sm:$0xff] %v1966_v46  ;;  %v1712_v54 = vmul.f32 0.5, %v2862_v49  ;;  %2881 = vtanh.f32 %v1210_v43  ;;  %v957_v56 = vadd.f32 %v3172_v5, %v700_v48  ;;  %v958_v61 = vadd.f32 %v3172_v5, %v701_v52 }
 0x1a1   : > { %v2866_v58 = vpop.eup %2865  ;;  %v1967_v59 = vadd.f32 0.5, %v1711_v50  ;;  %v1713_v60 = vmul.f32 0.5, %v2864_v53  ;;  %2883 = vtanh.f32 %v1211_v51  ;;  %v1212_v3 = vmul.f32 0.5, %v956_v55  ;;  %v453_v51 = vld [vmem:[%s3160_s13 + $0x7a0] sm:$0xff] }
 0x1a2   : > { %v2868_v63 = vpop.eup %2867  ;;  %v1968_v0 = vadd.f32 0.5, %v1712_v54  ;;  %v1714_v2 = vmul.f32 0.5, %v2866_v58  ;;  %v1213_v4 = vmul.f32 0.5, %v957_v56  ;;  %v1214_v10 = vmul.f32 0.5, %v958_v61  ;;  %v454_v56 = vld [vmem:[%s3160_s13 + $0x7a8] sm:$0xff] }
 0x1a3   : > { %v2870_v7 = vpop.eup %2869  ;;  %2223 = vst [vmem:[%s3245_s24 + $0x6e0] sm:$0xff] %v1967_v59  ;;  %v1969_v8 = vadd.f32 0.5, %v1713_v60  ;;  %v1715_v9 = vmul.f32 0.5, %v2868_v63  ;;  %v702_v11 = vmul.f32 %v3167_v1, %v445_v57  ;;  %2885 = vtanh.f32 %v1212_v3  ;;  %v455_v57 = vld [vmem:[%s3160_s13 + $0x7b0] sm:$0xff] }
 0x1a4   : > { %2224 = vst [vmem:[%s3245_s24 + $0x6e8] sm:$0xff] %v1968_v0  ;;  %v1970_v13 = vadd.f32 0.5, %v1714_v2  ;;  %v1716_v14 = vmul.f32 0.5, %v2870_v7  ;;  %v703_v15 = vmul.f32 %v3167_v1, %v446_v62  ;;  %2887 = vtanh.f32 %v1213_v4  ;;  %v456_v62 = vld [vmem:[%s3160_s13 + $0x7b8] sm:$0xff] }
 0x1a5   : > { %2225 = vst [vmem:[%s3245_s24 + $0x6f0] sm:$0xff] %v1969_v8  ;;  %v1971_v17 = vadd.f32 0.5, %v1715_v9  ;;  %v959_v18 = vadd.f32 %v3172_v5, %v702_v11  ;;  %v704_v19 = vmul.f32 %v3167_v1, %v447_v6  ;;  %2889 = vtanh.f32 %v1214_v10  ;;  %v457_v9 = vld [vmem:[%s3160_s13 + $0x7c0] sm:$0xff] }
 0x1a6   : > { %v2872_v21 = vpop.eup %2871  ;;  %2226 = vst [vmem:[%s3245_s24 + $0x6f8] sm:$0xff] %v1970_v13  ;;  %v1972_v22 = vadd.f32 0.5, %v1716_v14  ;;  %v960_v23 = vadd.f32 %v3172_v5, %v703_v15  ;;  %v705_v24 = vmul.f32 %v3167_v1, %v448_v12  ;;  %v706_v29 = vmul.f32 %v3167_v1, %v449_v16 }
 0x1a7   : > { %v2874_v25 = vpop.eup %2873  ;;  %2227 = vst [vmem:[%s3245_s24 + $0x700] sm:$0xff] %v1971_v17  ;;  %v1717_v26 = vmul.f32 0.5, %v2872_v21  ;;  %v1215_v27 = vmul.f32 0.5, %v959_v18  ;;  %v961_v28 = vadd.f32 %v3172_v5, %v704_v19  ;;  %v707_v33 = vmul.f32 %v3167_v1, %v450_v20 }
 0x1a8   : > { %2228 = vst [vmem:[%s3245_s24 + $0x708] sm:$0xff] %v1972_v22  ;;  %v1718_v30 = vmul.f32 0.5, %v2874_v25  ;;  %v1216_v31 = vmul.f32 0.5, %v960_v23  ;;  %v962_v32 = vadd.f32 %v3172_v5, %v705_v24  ;;  %v963_v37 = vadd.f32 %v3172_v5, %v706_v29  ;;  %v458_v23 = vld [vmem:[%s3160_s13 + $0x7c8] sm:$0xff]  ;;  %v459_v24 = vld [vmem:[%s3160_s13 + $0x7d0] sm:$0xff]  ;;  %v460_v29 = vld [vmem:[%s3160_s13 + $0x7d8] sm:$0xff] }
 0x1a9   : > { %v1973_v35 = vadd.f32 0.5, %v1717_v26  ;;  %2891 = vtanh.f32 %v1215_v27  ;;  %v1217_v36 = vmul.f32 0.5, %v961_v28  ;;  %v964_v42 = vadd.f32 %v3172_v5, %v707_v33 }
 0x1aa   : > { %v2876_v39 = vpop.eup %2875  ;;  %v1974_v40 = vadd.f32 0.5, %v1718_v30  ;;  %2893 = vtanh.f32 %v1216_v31  ;;  %v1218_v41 = vmul.f32 0.5, %v962_v32  ;;  %v1219_v45 = vmul.f32 0.5, %v963_v37 }
 0x1ab   : > { %v2878_v43 = vpop.eup %2877  ;;  %2229 = vst [vmem:[%s3245_s24 + $0x710] sm:$0xff] %v1973_v35  ;;  %v1719_v44 = vmul.f32 0.5, %v2876_v39  ;;  %2895 = vtanh.f32 %v1217_v36  ;;  %v708_v46 = vmul.f32 %v3167_v1, %v451_v34  ;;  %v1220_v49 = vmul.f32 0.5, %v964_v42 }
 0x1ac   : > { %v2880_v47 = vpop.eup %2879  ;;  %2230 = vst [vmem:[%s3245_s24 + $0x718] sm:$0xff] %v1974_v40  ;;  %v1720_v48 = vmul.f32 0.5, %v2878_v43  ;;  %2897 = vtanh.f32 %v1218_v41  ;;  %v709_v50 = vmul.f32 %v3167_v1, %v452_v38  ;;  %v710_v3 = vmul.f32 %v3167_v1, %v453_v51 }
 0x1ad   : > { %v2882_v52 = vpop.eup %2881  ;;  %v1975_v53 = vadd.f32 0.5, %v1719_v44  ;;  %v1721_v54 = vmul.f32 0.5, %v2880_v47  ;;  %2899 = vtanh.f32 %v1219_v45  ;;  %v965_v55 = vadd.f32 %v3172_v5, %v708_v46  ;;  %v461_v45 = vld [vmem:[%s3160_s13 + $0x7e0] sm:$0xff] }
 0x1ae   : > { %v2884_v58 = vpop.eup %2883  ;;  %v1976_v59 = vadd.f32 0.5, %v1720_v48  ;;  %v1722_v60 = vmul.f32 0.5, %v2882_v52  ;;  %2901 = vtanh.f32 %v1220_v49  ;;  %v966_v61 = vadd.f32 %v3172_v5, %v709_v50  ;;  %v462_v50 = vld [vmem:[%s3160_s13 + $0x7e8] sm:$0xff] }
 0x1af   : > { %2231 = vst [vmem:[%s3245_s24 + $0x720] sm:$0xff] %v1975_v53  ;;  %v1977_v63 = vadd.f32 0.5, %v1721_v54  ;;  %v1723_v0 = vmul.f32 0.5, %v2884_v58  ;;  %v1221_v2 = vmul.f32 0.5, %v965_v55  ;;  %v711_v7 = vmul.f32 %v3167_v1, %v454_v56  ;;  %v463_v56 = vld [vmem:[%s3160_s13 + $0x7f0] sm:$0xff] }
 0x1b0   : > { %2232 = vst [vmem:[%s3245_s24 + $0x728] sm:$0xff] %v1976_v59  ;;  %v1978_v4 = vadd.f32 0.5, %v1722_v60  ;;  %v1222_v6 = vmul.f32 0.5, %v966_v61  ;;  %v712_v8 = vmul.f32 %v3167_v1, %v455_v57  ;;  %v2886_v10 = vpop.eup %2885  ;;  %v967_v12 = vadd.f32 %v3172_v5, %v710_v3 }
 0x1b1   : > { %2233 = vst [vmem:[%s3245_s24 + $0x730] sm:$0xff] %v1977_v63  ;;  %v1979_v11 = vadd.f32 0.5, %v1723_v0  ;;  %2903 = vtanh.f32 %v1221_v2  ;;  %v713_v13 = vmul.f32 %v3167_v1, %v456_v62  ;;  %v2888_v14 = vpop.eup %2887  ;;  %v1724_v15 = vmul.f32 0.5, %v2886_v10  ;;  %v464_v62 = vld [vmem:[%s3160_s13 + $0x7f8] sm:$0xff] }
 0x1b2   : > { %2234 = vst [vmem:[%s3245_s24 + $0x738] sm:$0xff] %v1978_v4  ;;  %2905 = vtanh.f32 %v1222_v6  ;;  %v968_v16 = vadd.f32 %v3172_v5, %v711_v7  ;;  %v969_v17 = vadd.f32 %v3172_v5, %v712_v8  ;;  %v2890_v18 = vpop.eup %2889  ;;  %v1725_v19 = vmul.f32 0.5, %v2888_v14 }
 0x1b3   : > { %2235 = vst [vmem:[%s3245_s24 + $0x740] sm:$0xff] %v1979_v11  ;;  %v1223_v20 = vmul.f32 0.5, %v967_v12  ;;  %v970_v21 = vadd.f32 %v3172_v5, %v713_v13  ;;  %v714_v22 = vmul.f32 %v3167_v1, %v457_v9  ;;  %v1980_v25 = vadd.f32 0.5, %v1724_v15 }
 0x1b4   : > { %v1726_v26 = vmul.f32 0.5, %v2890_v18  ;;  %v1224_v27 = vmul.f32 0.5, %v968_v16  ;;  %v1225_v28 = vmul.f32 0.5, %v969_v17  ;;  %v1981_v30 = vadd.f32 0.5, %v1725_v19 }
 0x1b5   : > { %2907 = vtanh.f32 %v1223_v20  ;;  %v1226_v31 = vmul.f32 0.5, %v970_v21  ;;  %v971_v32 = vadd.f32 %v3172_v5, %v714_v22  ;;  %2236 = vst [vmem:[%s3245_s24 + $0x748] sm:$0xff] %v1980_v25  ;;  %v715_v35 = vmul.f32 %v3167_v1, %v458_v23 }
 0x1b6   : > { %v2892_v33 = vpop.eup %2891  ;;  %v1982_v34 = vadd.f32 0.5, %v1726_v26  ;;  %2909 = vtanh.f32 %v1224_v27  ;;  %v716_v36 = vmul.f32 %v3167_v1, %v459_v24  ;;  %2237 = vst [vmem:[%s3245_s24 + $0x750] sm:$0xff] %v1981_v30  ;;  %v717_v40 = vmul.f32 %v3167_v1, %v460_v29 }
 0x1b7   : > { %v2894_v37 = vpop.eup %2893  ;;  %v1727_v38 = vmul.f32 0.5, %v2892_v33  ;;  %2911 = vtanh.f32 %v1225_v28  ;;  %v1227_v39 = vmul.f32 0.5, %v971_v32  ;;  %v972_v43 = vadd.f32 %v3172_v5, %v715_v35 }
 0x1b8   : > { %v2896_v41 = vpop.eup %2895  ;;  %2238 = vst [vmem:[%s3245_s24 + $0x758] sm:$0xff] %v1982_v34  ;;  %v1728_v42 = vmul.f32 0.5, %v2894_v37  ;;  %2913 = vtanh.f32 %v1226_v31  ;;  %v973_v44 = vadd.f32 %v3172_v5, %v716_v36  ;;  %v974_v49 = vadd.f32 %v3172_v5, %v717_v40 }
 0x1b9   : > { %v2898_v46 = vpop.eup %2897  ;;  %v1983_v47 = vadd.f32 0.5, %v1727_v38  ;;  %v1729_v48 = vmul.f32 0.5, %v2896_v41  ;;  %2915 = vtanh.f32 %v1227_v39  ;;  %v1228_v54 = vmul.f32 0.5, %v972_v43 }
 0x1ba   : > { %v2900_v51 = vpop.eup %2899  ;;  %v1984_v52 = vadd.f32 0.5, %v1728_v42  ;;  %v1730_v53 = vmul.f32 0.5, %v2898_v46  ;;  %v1229_v55 = vmul.f32 0.5, %v973_v44  ;;  %v1230_v60 = vmul.f32 0.5, %v974_v49 }
 0x1bb   : > { %v2902_v57 = vpop.eup %2901  ;;  %2239 = vst [vmem:[%s3245_s24 + $0x760] sm:$0xff] %v1983_v47  ;;  %v1985_v58 = vadd.f32 0.5, %v1729_v48  ;;  %v1731_v59 = vmul.f32 0.5, %v2900_v51  ;;  %v718_v61 = vmul.f32 %v3167_v1, %v461_v45  ;;  %2917 = vtanh.f32 %v1228_v54 }
 0x1bc   : > { %2240 = vst [vmem:[%s3245_s24 + $0x768] sm:$0xff] %v1984_v52  ;;  %v1986_v63 = vadd.f32 0.5, %v1730_v53  ;;  %v1732_v0 = vmul.f32 0.5, %v2902_v57  ;;  %v719_v2 = vmul.f32 %v3167_v1, %v462_v50  ;;  %2919 = vtanh.f32 %v1229_v55 }
 0x1bd   : > { %2241 = vst [vmem:[%s3245_s24 + $0x770] sm:$0xff] %v1985_v58  ;;  %v1987_v3 = vadd.f32 0.5, %v1731_v59  ;;  %v975_v4 = vadd.f32 %v3172_v5, %v718_v61  ;;  %v720_v6 = vmul.f32 %v3167_v1, %v463_v56  ;;  %2921 = vtanh.f32 %v1230_v60 }
 0x1be   : > { %v2904_v7 = vpop.eup %2903  ;;  %2242 = vst [vmem:[%s3245_s24 + $0x778] sm:$0xff] %v1986_v63  ;;  %v1988_v8 = vadd.f32 0.5, %v1732_v0  ;;  %v976_v9 = vadd.f32 %v3172_v5, %v719_v2  ;;  %v721_v10 = vmul.f32 %v3167_v1, %v464_v62 }
 0x1bf   : > { %v2906_v11 = vpop.eup %2905  ;;  %2243 = vst [vmem:[%s3245_s24 + $0x780] sm:$0xff] %v1987_v3  ;;  %v1733_v12 = vmul.f32 0.5, %v2904_v7  ;;  %v1231_v13 = vmul.f32 0.5, %v975_v4  ;;  %v977_v14 = vadd.f32 %v3172_v5, %v720_v6 }
 0x1c0   : > { %2244 = vst [vmem:[%s3245_s24 + $0x788] sm:$0xff] %v1988_v8  ;;  %v1734_v15 = vmul.f32 0.5, %v2906_v11  ;;  %v1232_v16 = vmul.f32 0.5, %v976_v9  ;;  %v978_v17 = vadd.f32 %v3172_v5, %v721_v10 }
 0x1c1   : > { %v1989_v18 = vadd.f32 0.5, %v1733_v12  ;;  %2923 = vtanh.f32 %v1231_v13  ;;  %v1233_v19 = vmul.f32 0.5, %v977_v14 }
 0x1c2   : > { %v2908_v20 = vpop.eup %2907  ;;  %v1990_v21 = vadd.f32 0.5, %v1734_v15  ;;  %2925 = vtanh.f32 %v1232_v16  ;;  %v1234_v1 = vmul.f32 0.5, %v978_v17 }
 0x1c3   : > { %v2910_v22 = vpop.eup %2909  ;;  %2245 = vst [vmem:[%s3245_s24 + $0x790] sm:$0xff] %v1989_v18  ;;  %v1735_v23 = vmul.f32 0.5, %v2908_v20  ;;  %2927 = vtanh.f32 %v1233_v19 }
 0x1c4   : > { %v2912_v24 = vpop.eup %2911  ;;  %2246 = vst [vmem:[%s3245_s24 + $0x798] sm:$0xff] %v1990_v21  ;;  %v1736_v25 = vmul.f32 0.5, %v2910_v22  ;;  %2929 = vtanh.f32 %v1234_v1 }
 0x1c5   : > { %v2914_v5 = vpop.eup %2913  ;;  %v1991_v26 = vadd.f32 0.5, %v1735_v23  ;;  %v1737_v27 = vmul.f32 0.5, %v2912_v24 }
 0x1c6   : > { %v2916_v28 = vpop.eup %2915  ;;  %v1992_v29 = vadd.f32 0.5, %v1736_v25  ;;  %v1738_v30 = vmul.f32 0.5, %v2914_v5 }
 0x1c7   : > { %2247 = vst [vmem:[%s3245_s24 + $0x7a0] sm:$0xff] %v1991_v26  ;;  %v1993_v31 = vadd.f32 0.5, %v1737_v27  ;;  %v1739_v32 = vmul.f32 0.5, %v2916_v28 }
 0x1c8   : > { %2248 = vst [vmem:[%s3245_s24 + $0x7a8] sm:$0xff] %v1992_v29  ;;  %v1994_v33 = vadd.f32 0.5, %v1738_v30  ;;  %v2918_v34 = vpop.eup %2917 }
 0x1c9   : > { %2249 = vst [vmem:[%s3245_s24 + $0x7b0] sm:$0xff] %v1993_v31  ;;  %v1995_v35 = vadd.f32 0.5, %v1739_v32  ;;  %v2920_v36 = vpop.eup %2919  ;;  %v1740_v37 = vmul.f32 0.5, %v2918_v34 }
 0x1ca   : > { %2250 = vst [vmem:[%s3245_s24 + $0x7b8] sm:$0xff] %v1994_v33  ;;  %v2922_v38 = vpop.eup %2921  ;;  %v1741_v39 = vmul.f32 0.5, %v2920_v36 }
 0x1cb   : > { %2251 = vst [vmem:[%s3245_s24 + $0x7c0] sm:$0xff] %v1995_v35  ;;  %v1996_v40 = vadd.f32 0.5, %v1740_v37  ;;  %v1742_v41 = vmul.f32 0.5, %v2922_v38 }
 0x1cc   : > { %v1997_v42 = vadd.f32 0.5, %v1741_v39 }
 0x1cd   : > { %2252 = vst [vmem:[%s3245_s24 + $0x7c8] sm:$0xff] %v1996_v40  ;;  %v1998_v44 = vadd.f32 0.5, %v1742_v41 }
 0x1ce   : > { %v2924_v43 = vpop.eup %2923  ;;  %2253 = vst [vmem:[%s3245_s24 + $0x7d0] sm:$0xff] %v1997_v42 }
 0x1cf   : > { %v2926_v45 = vpop.eup %2925  ;;  %v1743_v46 = vmul.f32 0.5, %v2924_v43  ;;  %2254 = vst [vmem:[%s3245_s24 + $0x7d8] sm:$0xff] %v1998_v44 }
 0x1d0   : > { %v2928_v47 = vpop.eup %2927  ;;  %v1744_v48 = vmul.f32 0.5, %v2926_v45 }
 0x1d1   : > { %v2930_v49 = vpop.eup %2929  ;;  %v1999_v50 = vadd.f32 0.5, %v1743_v46  ;;  %v1745_v51 = vmul.f32 0.5, %v2928_v47 }
 0x1d2   : > { %v2000_v52 = vadd.f32 0.5, %v1744_v48  ;;  %v1746_v53 = vmul.f32 0.5, %v2930_v49  ;;  %2266 = sbr.rel (!%p3099_p9) target bundleno = 498 (0x1f2), region = 40 }
 0x1d3   : > { %2255 = vst [vmem:[%s3245_s24 + $0x7e0] sm:$0xff] %v1999_v50  ;;  %v2001_v54 = vadd.f32 0.5, %v1745_v51 }
 0x1d4   : > { %2256 = vst [vmem:[%s3245_s24 + $0x7e8] sm:$0xff] %v2000_v52  ;;  %v2002_v55 = vadd.f32 0.5, %v1746_v53 }
 0x1d5   : > { %2257 = vst [vmem:[%s3245_s24 + $0x7f0] sm:$0xff] %v2001_v54 }
 0x1d6   : > { %2258 = vst [vmem:[%s3245_s24 + $0x7f8] sm:$0xff] %v2002_v55 }
 0x1d7   : > { %s4277_s14 = smov (!%p2269_p6, %s2268_s14), 256 }
 0x1d8   : > { %s4202_s15 = sshll.u32 %s4277_s14, 7 }
 0x1d9   : > { %s2273_s1 = ssub.s32 32768, %s4202_s15 }
 0x1da   : > { %2274 = vsyncadd %s2260_s11, %s2273_s1  ;;  %p2368_p10 = scmp.ne.s32.totalorder %s4202_s15, 0  ;;  %s2375_s25 = sshll.u32 %s3076_s0, 15 }
 0x1db   : > { %s4212_s27 = scalar_lea.hbm %s4263_s3, %s2375_s25  ;;  %s2279_s28 = sshll.u32 %s3245_s24, 4  ;;  %s4215_s28 = int_to_ptr.vmem [resolvable:$true] %s2279_s28 }
 0x1dc   : > { %s2957_s29 = scalar_lea.vmem %s4215_s28, %s4202_s15  ;;  %s3026_s30 = smov [#allocation7]  }
 0x1dd   : > { %p2958_p9 = scmp.ne.s32.totalorder %s4215_s28, %s2957_s29  ;;  %s2961_s5 = sshll.u32 %s3026_s30, 4  ;;  %s2962_s5 = int_to_ptr.vmem [resolvable:$false] %s2961_s5 }
 0x1de   : > { %s2963_s0 = scalar_lea.vmem %s2962_s5, 65536  ;;  %p2964_p7 = scmp.lt.s32.totalorder %s4215_s28, %s2962_s5 }
 0x1df   : > { %p2959_p11 = pnand %p2958_p9, %p2368_p10  ;;  %p2965_p8 = scmp.lt.s32.totalorder %s2963_s0, %s2957_s29 }
 0x1e1   : > { %p2960_p13 = pneg %p2959_p11  ;;  %p2966_p12 = por %p2965_p8, %p2964_p7 }
 0x1e3   : > { %p2967_p0 = pnand %p2966_p12, %p2960_p13 }
 0x1e5   : > { %2970 = shalt.err (!%p2967_p0)
}
 0x1e6   : > { %s2971_s7 = scalar_lea.hbm %s4212_s27, %s4202_s15  ;;  %s2975_s13 = scalar_lea.hbm %s4263_s3, 37504 }
 0x1e7   : > { %p2972_p1 = scmp.ne.s32.totalorder %s4212_s27, %s2971_s7  ;;  %p2976_p4 = scmp.lt.s32.totalorder %s4212_s27, %s4263_s3 }
 0x1e8   : > { %p2977_p5 = scmp.lt.s32.totalorder %s2975_s13, %s2971_s7 }
 0x1e9   : > { %p2973_p3 = pnand %p2972_p1, %p2368_p10 }
 0x1ea   : > { %p2978_p6 = por %p2977_p5, %p2976_p4 }
 0x1eb   : > { %p2974_p2 = pneg %p2973_p3 }
 0x1ed   : > { %p2979_p9 = pnand %p2978_p6, %p2974_p2 }
 0x1ef   : > { %2982 = shalt.err (!%p2979_p9)
}
 0x1f0   : > { %s3027_s24 = smov 128   ;;  %s3028_s12 = smov 8  }
 0x1f1   : > { %2285 = dma.vmem_to_hbm [thread:$0]  (%p2368_p10), %s4215_s28, %s4202_s15, %s4212_s27, %s2260_s11, %s3027_s24, %s3027_s24, %s3028_s12  }
 0x1f2 PF: > { %s2294_s14 = sand.u32 1, %s3009_s16   ;;  %p4268_p11 = scmp.ne.s32.totalorder %s4267_s26, 0 }
 0x1f3   : > { %p4269_p13 = scmp.ge.s32.totalorder %s3021_s19, 2  ;;  %s2295_s1 = scalar_lea.sflag [#allocation6], %s2294_s14 }
 0x1f5   : > { %p2379_p7 = pnand %p4269_p13, %p4268_p11 }
 0x1f7   : > { %p2380_p8 = pneg %p2379_p7 }
 0x1f9   : > { %3004 = dma.done.wait (%p2380_p8), %s2295_s1, 32768  }
 0x1fa   : > { %3006 = vsyncadd (%p2380_p8), %s2295_s1, 4294934528  ;;  %p18_p12 = scmp.ge.s32.totalorder %s3080_s20, 4   ;;  %s4270_s16 = smov %s3013_s17 }
 0x1fb   : > { %s4271_s17 = smov %s3017_s18  ;;  %s4272_s18 = smov %s3092_s23 }
 0x1fc   : > { %s4273_s19 = smov %s3080_s20  ;;  %20 = sbr.rel (!%p18_p12) target bundleno = 8 (0x8), region = 77 }
 0x201   :  { %2300 = vsyncpa [#allocation5], 1 }
 0x202   :  { %2302 = vsyncpa [#allocation5 + $0x1], 1 }
 0x203   :  { %2303 = vsyncpa [#allocation6], 1 }
 0x204   :  { %2305 = vsyncpa [#allocation6 + $0x1], 1 }

</bundles_post_ra>
